<compile_context>
chip_gen: v7x
topology: tpu7x:2x2x1
jax: 0.10.0
libtpu: 0.0.40
codegen_flags: <defaults>
</compile_context>

<pallas_src>
import functools

import jax
import jax.numpy as jnp
from jax.experimental import pallas as pl
from jax.experimental.pallas import tpu as pltpu


def _round_up(x, m):
    return ((x + m - 1) // m) * m


# ----------------------------------------------------------------------------
# Fused kernel: one grid step = B samples, all four layers.
#   x_ref  : (1, H, W, B)              input images (cin = 1)
#   w1_ref : (9, B, 16B)               conv1 taps, block-diagonal over batch
#   w2_ref : (9, 16B, 4B)              conv2 taps, block-diagonal over batch
#   wt1_ref: (4B, 4*16B)               tconv1, 4 (kh,kw) taps folded into lanes
#   wt2_ref: (4*16B, 16B)              tconv2, 4 (KH,KW) taps folded into lanes
#   o_ref  : (1, H/4, W/4, 16B)        lanes = (kh,kw,KH,KW,b), decoded outside
# ----------------------------------------------------------------------------
def _fused_autoencoder_kernel(
    x_ref, w1_ref, b1_ref, w2_ref, b2_ref, wt1_ref, bt1_ref, wt2_ref, bt2_ref,
    o_ref, pad1_ref, pad2_ref, hp1_ref, hp2_ref, *, H, W, B):
    C1, C2 = 16, 4
    L1, L2 = B * C1, B * C2
    H2, W2 = H // 2, W // 2
    H4, W4 = H // 4, W // 4
    WS1 = _round_up(W + 1, 8)        # conv1 slab width (mult of 8, >= W+1)
    WS2 = _round_up(W2 + 1, 8)       # conv2 slab width
    R1, R2 = H * WS1, H2 * WS2
    P1, P2 = (H + 4) * WS1, (H2 + 4) * WS2

    # ---- stage 1: conv1 (1->16, 3x3 same) + bias + ReLU --------------------
    # image row h lives at flat rows (h+2)*WS1 + [0, W); everything else is 0,
    # so the surrounding zeros provide the 'same' padding for free.
    pad1_ref[...] = jnp.zeros((P1, B), jnp.float32)
    for h in range(H):
        pad1_ref[pl.ds((h + 2) * WS1, W), :] = x_ref[0, h]          # (W, B)

    acc1 = jnp.zeros((R1, L1), jnp.float32)
    for kh in range(3):
        for kw in range(3):
            off = (kh + 1) * WS1 + (kw - 1)
            patch = pad1_ref[pl.ds(off, R1), :]                     # (R1, B)
            acc1 = acc1 + jnp.dot(patch, w1_ref[kh * 3 + kw],
                                  preferred_element_type=jnp.float32)
    a1 = jnp.maximum(acc1 + b1_ref[...], 0.0)                       # (R1, L1)

    # ---- 2x2 max-pool #1 ---------------------------------------------------
    a1v = a1.reshape(H2, 2, WS1, L1)               # leading-dim split (free)
    hp1 = jnp.maximum(a1v[:, 0], a1v[:, 1])        # (H/2, WS1, L1)
    hp1_ref[...] = hp1[:, 0:W, :]                  # drop slab garbage columns
    p1 = jnp.maximum(hp1_ref[:, pl.ds(0, W2, 2), :],
                     hp1_ref[:, pl.ds(1, W2, 2), :])                # (H/2, W/2, L1)

    # ---- stage 2: conv2 (16->4, 3x3 same) + bias + ReLU --------------------
    pad2_ref[...] = jnp.zeros((P2, L1), jnp.float32)
    for h in range(H2):
        pad2_ref[pl.ds((h + 2) * WS2, W2), :] = p1[h]               # (W/2, L1)

    acc2 = jnp.zeros((R2, L2), jnp.float32)
    for kh in range(3):
        for kw in range(3):
            off = (kh + 1) * WS2 + (kw - 1)
            patch = pad2_ref[pl.ds(off, R2), :]                     # (R2, L1)
            acc2 = acc2 + jnp.dot(patch, w2_ref[kh * 3 + kw],
                                  preferred_element_type=jnp.float32)
    a2 = jnp.maximum(acc2 + b2_ref[...], 0.0)                       # (R2, L2)

    # ---- 2x2 max-pool #2 ---------------------------------------------------
    a2v = a2.reshape(H4, 2, WS2, L2)
    hp2 = jnp.maximum(a2v[:, 0], a2v[:, 1])
    hp2_ref[...] = hp2[:, 0:W2, :]
    p2 = jnp.maximum(hp2_ref[:, pl.ds(0, W4, 2), :],
                     hp2_ref[:, pl.ds(1, W4, 2), :])                # (H/4, W/4, L2)

    # ---- decoder: tconv1 (4->16, k2 s2) + ReLU ; tconv2 (16->1, k2 s2) -----
    wt1, bt1 = wt1_ref[...], bt1_ref[...]
    wt2, bt2 = wt2_ref[...], bt2_ref[...]
    for h in range(H4):
        row = p2[h]                                                 # (W/4, L2)
        t1 = jnp.maximum(
            jnp.dot(row, wt1, preferred_element_type=jnp.float32) + bt1, 0.0)
        z = jnp.dot(t1, wt2, preferred_element_type=jnp.float32) + bt2
        o_ref[0, h] = z                                             # (W/4, 16B)


# ----------------------------------------------------------------------------
# Weight packing: fold the batch (block-diagonal) and the 2x2 transposed-conv
# taps into the lane dimension.  All tiny, runs in XLA once per call.
# ----------------------------------------------------------------------------
def _pack_params(p, B):
    f32 = jnp.float32
    eyeB = jnp.eye(B, dtype=f32)
    eyeG = jnp.eye(4, dtype=f32)

    w1 = p["w1"].astype(f32)                                   # (16, 1, 3, 3)
    w1t = jnp.transpose(w1[:, 0], (1, 2, 0)).reshape(9, 16)    # [tap, co]
    w1bd = jnp.einsum("pq,tc->tpqc", eyeB, w1t).reshape(9, B, B * 16)
    b1v = jnp.tile(p["b1"].astype(f32), B).reshape(1, B * 16)

    w2 = p["w2"].astype(f32)                                   # (4, 16, 3, 3)
    w2t = jnp.transpose(w2, (2, 3, 1, 0)).reshape(9, 16, 4)    # [tap, ci, co]
    w2bd = jnp.einsum("pq,tio->tpiqo", eyeB, w2t).reshape(9, B * 16, B * 4)
    b2v = jnp.tile(p["b2"].astype(f32), B).reshape(1, B * 4)

    tw1 = p["tw1"].astype(f32)                                 # (4, 16, 2, 2)
    t1m = jnp.transpose(tw1, (2, 3, 0, 1)).reshape(4, 4, 16)   # [g, ci, c1]
    wt1 = jnp.einsum("pq,gio->pigqo", eyeB, t1m).reshape(B * 4, 4 * B * 16)
    bt1v = jnp.tile(p["tb1"].astype(f32), 4 * B).reshape(1, 4 * B * 16)

    tw2 = p["tw2"].astype(f32)[:, 0]                           # (16, 2, 2)
    wt2 = jnp.einsum("gh,pq,ikl->gpihklq",
                     eyeG, eyeB, tw2).reshape(4 * B * 16, 4 * 4 * B)
    bt2v = jnp.full((1, 4 * 4 * B), p["tb2"].astype(f32)[0])
    return w1bd, b1v, w2bd, b2v, wt1, bt1v, wt2, bt2v


# ----------------------------------------------------------------------------
# Public forward pass: NCHW float32 in, NCHW float32 out.
# ----------------------------------------------------------------------------
def conv_autoencoder_forward(x_nchw, params, *, batch_tile=8):
    N, cin, H, W = x_nchw.shape
    assert cin == 1 and H % 4 == 0 and W % 4 == 0
    B = batch_tile
    G = (N + B - 1) // B
    Npad = G * B

    x = x_nchw[:, 0].astype(jnp.float32)
    if Npad != N:
        x = jnp.pad(x, ((0, Npad - N), (0, 0), (0, 0)))
    xg = jnp.transpose(x.reshape(G, B, H, W), (0, 2, 3, 1))    # (G, H, W, B)

    w1bd, b1v, w2bd, b2v, wt1, bt1v, wt2, bt2v = _pack_params(params, B)

    H2, W2, H4, W4 = H // 2, W // 2, H // 4, W // 4
    WS1 = _round_up(W + 1, 8)
    WS2 = _round_up(W2 + 1, 8)
    L1, L2, LO = 16 * B, 4 * B, 16 * B

    kernel = functools.partial(_fused_autoencoder_kernel, H=H, W=W, B=B)
    out_raw = pl.pallas_call(
        kernel,
        out_shape=jax.ShapeDtypeStruct((G, H4, W4, LO), jnp.float32),
        grid=(G,),
        in_specs=[
            pl.BlockSpec((1, H, W, B), lambda g: (g, 0, 0, 0)),
            pl.BlockSpec((9, B, L1), lambda g: (0, 0, 0)),
            pl.BlockSpec((1, L1), lambda g: (0, 0)),
            pl.BlockSpec((9, L1, L2), lambda g: (0, 0, 0)),
            pl.BlockSpec((1, L2), lambda g: (0, 0)),
            pl.BlockSpec((L2, 4 * L1), lambda g: (0, 0)),
            pl.BlockSpec((1, 4 * L1), lambda g: (0, 0)),
            pl.BlockSpec((4 * L1, LO), lambda g: (0, 0)),
            pl.BlockSpec((1, LO), lambda g: (0, 0)),
        ],
        out_specs=pl.BlockSpec((1, H4, W4, LO), lambda g: (g, 0, 0, 0)),
        scratch_shapes=[
            pltpu.VMEM(((H + 4) * WS1, B), jnp.float32),    # padded conv1 input
            pltpu.VMEM(((H2 + 4) * WS2, L1), jnp.float32),  # padded conv2 input
            pltpu.VMEM((H2, W, L1), jnp.float32),           # H-pooled conv1 out
            pltpu.VMEM((H4, W2, L2), jnp.float32),          # H-pooled conv2 out
        ],
        compiler_params=pltpu.CompilerParams(dimension_semantics=("parallel",)),
    )(xg, w1bd, b1v, w2bd, b2v, wt1, bt1v, wt2, bt2v)

    # Undo the (kh, kw, KH, KW, b)-in-lanes packing of the decoder output.
    o = out_raw.reshape(G, H4, W4, 2, 2, 2, 2, B)      # (g, h, w, kh, kw, KH, KW, b)
    o = jnp.transpose(o, (0, 7, 1, 3, 5, 2, 4, 6))     # (g, b, h, kh, KH, w, kw, KW)
    o = o.reshape(Npad, H, W)[:N]
    return o.reshape(N, 1, H, W)


# ----------------------------------------------------------------------------
# Parameter init (PyTorch-style uniform) and a pure-JAX reference.
# ----------------------------------------------------------------------------
def init_params(key):
    def u(k, shape, fan_in):
        bound = 1.0 / (fan_in ** 0.5)
        return jax.random.uniform(k, shape, jnp.float32, -bound, bound)

    ks = jax.random.split(key, 8)
    return {
        "w1": u(ks[0], (16, 1, 3, 3), 1 * 9),  "b1": u(ks[1], (16,), 1 * 9),
        "w2": u(ks[2], (4, 16, 3, 3), 16 * 9), "b2": u(ks[3], (4,), 16 * 9),
        "tw1": u(ks[4], (4, 16, 2, 2), 4 * 4), "tb1": u(ks[5], (16,), 4 * 4),
        "tw2": u(ks[6], (16, 1, 2, 2), 16 * 4), "tb2": u(ks[7], (1,), 16 * 4),
    }


def reference_forward(x, p):
    prec = jax.lax.Precision.HIGHEST

    def conv(x, w, b):
        y = jax.lax.conv_general_dilated(
            x, w, (1, 1), ((1, 1), (1, 1)),
            dimension_numbers=("NCHW", "OIHW", "NCHW"), precision=prec)
        return jax.nn.relu(y + b[None, :, None, None])

    def pool(x):
        return jax.lax.reduce_window(x, -jnp.inf, jax.lax.max,
                                     (1, 1, 2, 2), (1, 1, 2, 2), "VALID")

    def tconv(x, w, b):
        N, _, H, W = x.shape
        cout = w.shape[1]
        y = jnp.einsum("nihw,iokl->nohkwl", x, w, precision=prec)
        return y.reshape(N, cout, 2 * H, 2 * W) + b[None, :, None, None]

    x = pool(conv(x, p["w1"], p["b1"]))
    x = pool(conv(x, p["w2"], p["b2"]))
    x = jax.nn.relu(tconv(x, p["tw1"], p["tb1"]))
    return tconv(x, p["tw2"], p["tb2"])


if __name__ == "__main__":
    key = jax.random.PRNGKey(0)
    pkey, xkey = jax.random.split(key)
    params = init_params(pkey)
    x = jax.random.normal(xkey, (2, 1, 16, 16), jnp.float32)   # NCHW, like PyTorch

    out = jax.jit(conv_autoencoder_forward)(x, params)
    out = jax.block_until_ready(out)
    assert out.shape == (2, 1, 16, 16), out.shape

    ref = reference_forward(x, params)
    err = float(jnp.max(jnp.abs(out - ref)))
    assert err < 5e-2, f"max abs err {err}"
    print("KERNEL_OK")
</pallas_src>

<mosaic_0001>
module attributes {stable_mosaic.version = 11 : i64} {
  func.func @_fused_autoencoder_kernel(%arg0: i32, %arg1: memref<1x16x16x8xf32, #tpu.memory_space<vmem>>, %arg2: memref<9x8x128xf32, #tpu.memory_space<vmem>>, %arg3: memref<1x128xf32, #tpu.memory_space<vmem>>, %arg4: memref<9x128x32xf32, #tpu.memory_space<vmem>>, %arg5: memref<1x32xf32, #tpu.memory_space<vmem>>, %arg6: memref<32x512xf32, #tpu.memory_space<vmem>>, %arg7: memref<1x512xf32, #tpu.memory_space<vmem>>, %arg8: memref<512x128xf32, #tpu.memory_space<vmem>>, %arg9: memref<1x128xf32, #tpu.memory_space<vmem>>, %arg10: memref<1x4x4x128xf32, #tpu.memory_space<vmem>>, %arg11: memref<480x8xf32, #tpu.memory_space<vmem>>, %arg12: memref<192x128xf32, #tpu.memory_space<vmem>>, %arg13: memref<8x16x128xf32, #tpu.memory_space<vmem>>, %arg14: memref<4x8x32xf32, #tpu.memory_space<vmem>>) attributes {dimension_semantics = [#tpu.dimension_semantics<parallel>], iteration_bounds = array<i64: 1>, scalar_prefetch = 0 : i64, scratch_operands = 4 : i64, tpu.core_type = #tpu.core_type<tc>, window_params = [{transform_indices = @transform_0, window_bounds = array<i64: 1, 16, 16, 8>}, {pipeline_mode = #tpu.pipeline_mode<synchronous>, transform_indices = @transform_1, window_bounds = array<i64: 9, 8, 128>}, {pipeline_mode = #tpu.pipeline_mode<synchronous>, transform_indices = @transform_2, window_bounds = array<i64: 1, 128>}, {pipeline_mode = #tpu.pipeline_mode<synchronous>, transform_indices = @transform_3, window_bounds = array<i64: 9, 128, 32>}, {pipeline_mode = #tpu.pipeline_mode<synchronous>, transform_indices = @transform_4, window_bounds = array<i64: 1, 32>}, {pipeline_mode = #tpu.pipeline_mode<synchronous>, transform_indices = @transform_5, window_bounds = array<i64: 32, 512>}, {pipeline_mode = #tpu.pipeline_mode<synchronous>, transform_indices = @transform_6, window_bounds = array<i64: 1, 512>}, {pipeline_mode = #tpu.pipeline_mode<synchronous>, transform_indices = @transform_7, window_bounds = array<i64: 512, 128>}, {pipeline_mode = #tpu.pipeline_mode<synchronous>, transform_indices = @transform_8, window_bounds = array<i64: 1, 128>}, {transform_indices = @transform_9, window_bounds = array<i64: 1, 4, 4, 128>}]} {
    %cst = arith.constant 0.000000e+00 : f32
    %0 = vector.broadcast %cst : f32 to vector<480x8xf32>
    %c0 = arith.constant 0 : index
    %c0_0 = arith.constant 0 : index
    %1 = vector.load %arg11[%c0, %c0_0] : memref<480x8xf32, #tpu.memory_space<vmem>>, vector<480x8xf32>
    tpu.vector_store %arg11[%c0, %c0_0], %0 {strides = array<i32>} : memref<480x8xf32, #tpu.memory_space<vmem>>, vector<480x8xf32>,
    %c0_1 = arith.constant 0 : index
    %c0_2 = arith.constant 0 : index
    %c0_3 = arith.constant 0 : index
    %c0_4 = arith.constant 0 : index
    %2 = vector.load %arg1[%c0_1, %c0_2, %c0_3, %c0_4] : memref<1x16x16x8xf32, #tpu.memory_space<vmem>>, vector<1x1x16x8xf32>
    %3 = vector.shape_cast %2 : vector<1x1x16x8xf32> to vector<16x8xf32>
    %c48 = arith.constant 48 : index
    %c0_5 = arith.constant 0 : index
    %4 = vector.load %arg11[%c48, %c0_5] : memref<480x8xf32, #tpu.memory_space<vmem>>, vector<16x8xf32>
    tpu.vector_store %arg11[%c48, %c0_5], %3 {strides = array<i32>} : memref<480x8xf32, #tpu.memory_space<vmem>>, vector<16x8xf32>,
    %c0_6 = arith.constant 0 : index
    %c1 = arith.constant 1 : index
    %c0_7 = arith.constant 0 : index
    %c0_8 = arith.constant 0 : index
    %5 = vector.load %arg1[%c0_6, %c1, %c0_7, %c0_8] : memref<1x16x16x8xf32, #tpu.memory_space<vmem>>, vector<1x1x16x8xf32>
    %6 = vector.shape_cast %5 : vector<1x1x16x8xf32> to vector<16x8xf32>
    %c72 = arith.constant 72 : index
    %c0_9 = arith.constant 0 : index
    %7 = vector.load %arg11[%c72, %c0_9] : memref<480x8xf32, #tpu.memory_space<vmem>>, vector<16x8xf32>
    tpu.vector_store %arg11[%c72, %c0_9], %6 {strides = array<i32>} : memref<480x8xf32, #tpu.memory_space<vmem>>, vector<16x8xf32>,
    %c0_10 = arith.constant 0 : index
    %c2 = arith.constant 2 : index
    %c0_11 = arith.constant 0 : index
    %c0_12 = arith.constant 0 : index
    %8 = vector.load %arg1[%c0_10, %c2, %c0_11, %c0_12] : memref<1x16x16x8xf32, #tpu.memory_space<vmem>>, vector<1x1x16x8xf32>
    %9 = vector.shape_cast %8 : vector<1x1x16x8xf32> to vector<16x8xf32>
    %c96 = arith.constant 96 : index
    %c0_13 = arith.constant 0 : index
    %10 = vector.load %arg11[%c96, %c0_13] : memref<480x8xf32, #tpu.memory_space<vmem>>, vector<16x8xf32>
    tpu.vector_store %arg11[%c96, %c0_13], %9 {strides = array<i32>} : memref<480x8xf32, #tpu.memory_space<vmem>>, vector<16x8xf32>,
    %c0_14 = arith.constant 0 : index
    %c3 = arith.constant 3 : index
    %c0_15 = arith.constant 0 : index
    %c0_16 = arith.constant 0 : index
    %11 = vector.load %arg1[%c0_14, %c3, %c0_15, %c0_16] : memref<1x16x16x8xf32, #tpu.memory_space<vmem>>, vector<1x1x16x8xf32>
    %12 = vector.shape_cast %11 : vector<1x1x16x8xf32> to vector<16x8xf32>
    %c120 = arith.constant 120 : index
    %c0_17 = arith.constant 0 : index
    %13 = vector.load %arg11[%c120, %c0_17] : memref<480x8xf32, #tpu.memory_space<vmem>>, vector<16x8xf32>
    tpu.vector_store %arg11[%c120, %c0_17], %12 {strides = array<i32>} : memref<480x8xf32, #tpu.memory_space<vmem>>, vector<16x8xf32>,
    %c0_18 = arith.constant 0 : index
    %c4 = arith.constant 4 : index
    %c0_19 = arith.constant 0 : index
    %c0_20 = arith.constant 0 : index
    %14 = vector.load %arg1[%c0_18, %c4, %c0_19, %c0_20] : memref<1x16x16x8xf32, #tpu.memory_space<vmem>>, vector<1x1x16x8xf32>
    %15 = vector.shape_cast %14 : vector<1x1x16x8xf32> to vector<16x8xf32>
    %c144 = arith.constant 144 : index
    %c0_21 = arith.constant 0 : index
    %16 = vector.load %arg11[%c144, %c0_21] : memref<480x8xf32, #tpu.memory_space<vmem>>, vector<16x8xf32>
    tpu.vector_store %arg11[%c144, %c0_21], %15 {strides = array<i32>} : memref<480x8xf32, #tpu.memory_space<vmem>>, vector<16x8xf32>,
    %c0_22 = arith.constant 0 : index
    %c5 = arith.constant 5 : index
    %c0_23 = arith.constant 0 : index
    %c0_24 = arith.constant 0 : index
    %17 = vector.load %arg1[%c0_22, %c5, %c0_23, %c0_24] : memref<1x16x16x8xf32, #tpu.memory_space<vmem>>, vector<1x1x16x8xf32>
    %18 = vector.shape_cast %17 : vector<1x1x16x8xf32> to vector<16x8xf32>
    %c168 = arith.constant 168 : index
    %c0_25 = arith.constant 0 : index
    %19 = vector.load %arg11[%c168, %c0_25] : memref<480x8xf32, #tpu.memory_space<vmem>>, vector<16x8xf32>
    tpu.vector_store %arg11[%c168, %c0_25], %18 {strides = array<i32>} : memref<480x8xf32, #tpu.memory_space<vmem>>, vector<16x8xf32>,
    %c0_26 = arith.constant 0 : index
    %c6 = arith.constant 6 : index
    %c0_27 = arith.constant 0 : index
    %c0_28 = arith.constant 0 : index
    %20 = vector.load %arg1[%c0_26, %c6, %c0_27, %c0_28] : memref<1x16x16x8xf32, #tpu.memory_space<vmem>>, vector<1x1x16x8xf32>
    %21 = vector.shape_cast %20 : vector<1x1x16x8xf32> to vector<16x8xf32>
    %c192 = arith.constant 192 : index
    %c0_29 = arith.constant 0 : index
    %22 = vector.load %arg11[%c192, %c0_29] : memref<480x8xf32, #tpu.memory_space<vmem>>, vector<16x8xf32>
    tpu.vector_store %arg11[%c192, %c0_29], %21 {strides = array<i32>} : memref<480x8xf32, #tpu.memory_space<vmem>>, vector<16x8xf32>,
    %c0_30 = arith.constant 0 : index
    %c7 = arith.constant 7 : index
    %c0_31 = arith.constant 0 : index
    %c0_32 = arith.constant 0 : index
    %23 = vector.load %arg1[%c0_30, %c7, %c0_31, %c0_32] : memref<1x16x16x8xf32, #tpu.memory_space<vmem>>, vector<1x1x16x8xf32>
    %24 = vector.shape_cast %23 : vector<1x1x16x8xf32> to vector<16x8xf32>
    %c216 = arith.constant 216 : index
    %c0_33 = arith.constant 0 : index
    %25 = vector.load %arg11[%c216, %c0_33] : memref<480x8xf32, #tpu.memory_space<vmem>>, vector<16x8xf32>
    tpu.vector_store %arg11[%c216, %c0_33], %24 {strides = array<i32>} : memref<480x8xf32, #tpu.memory_space<vmem>>, vector<16x8xf32>,
    %c0_34 = arith.constant 0 : index
    %c8 = arith.constant 8 : index
    %c0_35 = arith.constant 0 : index
    %c0_36 = arith.constant 0 : index
    %26 = vector.load %arg1[%c0_34, %c8, %c0_35, %c0_36] : memref<1x16x16x8xf32, #tpu.memory_space<vmem>>, vector<1x1x16x8xf32>
    %27 = vector.shape_cast %26 : vector<1x1x16x8xf32> to vector<16x8xf32>
    %c240 = arith.constant 240 : index
    %c0_37 = arith.constant 0 : index
    %28 = vector.load %arg11[%c240, %c0_37] : memref<480x8xf32, #tpu.memory_space<vmem>>, vector<16x8xf32>
    tpu.vector_store %arg11[%c240, %c0_37], %27 {strides = array<i32>} : memref<480x8xf32, #tpu.memory_space<vmem>>, vector<16x8xf32>,
    %c0_38 = arith.constant 0 : index
    %c9 = arith.constant 9 : index
    %c0_39 = arith.constant 0 : index
    %c0_40 = arith.constant 0 : index
    %29 = vector.load %arg1[%c0_38, %c9, %c0_39, %c0_40] : memref<1x16x16x8xf32, #tpu.memory_space<vmem>>, vector<1x1x16x8xf32>
    %30 = vector.shape_cast %29 : vector<1x1x16x8xf32> to vector<16x8xf32>
    %c264 = arith.constant 264 : index
    %c0_41 = arith.constant 0 : index
    %31 = vector.load %arg11[%c264, %c0_41] : memref<480x8xf32, #tpu.memory_space<vmem>>, vector<16x8xf32>
    tpu.vector_store %arg11[%c264, %c0_41], %30 {strides = array<i32>} : memref<480x8xf32, #tpu.memory_space<vmem>>, vector<16x8xf32>,
    %c0_42 = arith.constant 0 : index
    %c10 = arith.constant 10 : index
    %c0_43 = arith.constant 0 : index
    %c0_44 = arith.constant 0 : index
    %32 = vector.load %arg1[%c0_42, %c10, %c0_43, %c0_44] : memref<1x16x16x8xf32, #tpu.memory_space<vmem>>, vector<1x1x16x8xf32>
    %33 = vector.shape_cast %32 : vector<1x1x16x8xf32> to vector<16x8xf32>
    %c288 = arith.constant 288 : index
    %c0_45 = arith.constant 0 : index
    %34 = vector.load %arg11[%c288, %c0_45] : memref<480x8xf32, #tpu.memory_space<vmem>>, vector<16x8xf32>
    tpu.vector_store %arg11[%c288, %c0_45], %33 {strides = array<i32>} : memref<480x8xf32, #tpu.memory_space<vmem>>, vector<16x8xf32>,
    %c0_46 = arith.constant 0 : index
    %c11 = arith.constant 11 : index
    %c0_47 = arith.constant 0 : index
    %c0_48 = arith.constant 0 : index
    %35 = vector.load %arg1[%c0_46, %c11, %c0_47, %c0_48] : memref<1x16x16x8xf32, #tpu.memory_space<vmem>>, vector<1x1x16x8xf32>
    %36 = vector.shape_cast %35 : vector<1x1x16x8xf32> to vector<16x8xf32>
    %c312 = arith.constant 312 : index
    %c0_49 = arith.constant 0 : index
    %37 = vector.load %arg11[%c312, %c0_49] : memref<480x8xf32, #tpu.memory_space<vmem>>, vector<16x8xf32>
    tpu.vector_store %arg11[%c312, %c0_49], %36 {strides = array<i32>} : memref<480x8xf32, #tpu.memory_space<vmem>>, vector<16x8xf32>,
    %c0_50 = arith.constant 0 : index
    %c12 = arith.constant 12 : index
    %c0_51 = arith.constant 0 : index
    %c0_52 = arith.constant 0 : index
    %38 = vector.load %arg1[%c0_50, %c12, %c0_51, %c0_52] : memref<1x16x16x8xf32, #tpu.memory_space<vmem>>, vector<1x1x16x8xf32>
    %39 = vector.shape_cast %38 : vector<1x1x16x8xf32> to vector<16x8xf32>
    %c336 = arith.constant 336 : index
    %c0_53 = arith.constant 0 : index
    %40 = vector.load %arg11[%c336, %c0_53] : memref<480x8xf32, #tpu.memory_space<vmem>>, vector<16x8xf32>
    tpu.vector_store %arg11[%c336, %c0_53], %39 {strides = array<i32>} : memref<480x8xf32, #tpu.memory_space<vmem>>, vector<16x8xf32>,
    %c0_54 = arith.constant 0 : index
    %c13 = arith.constant 13 : index
    %c0_55 = arith.constant 0 : index
    %c0_56 = arith.constant 0 : index
    %41 = vector.load %arg1[%c0_54, %c13, %c0_55, %c0_56] : memref<1x16x16x8xf32, #tpu.memory_space<vmem>>, vector<1x1x16x8xf32>
    %42 = vector.shape_cast %41 : vector<1x1x16x8xf32> to vector<16x8xf32>
    %c360 = arith.constant 360 : index
    %c0_57 = arith.constant 0 : index
    %43 = vector.load %arg11[%c360, %c0_57] : memref<480x8xf32, #tpu.memory_space<vmem>>, vector<16x8xf32>
    tpu.vector_store %arg11[%c360, %c0_57], %42 {strides = array<i32>} : memref<480x8xf32, #tpu.memory_space<vmem>>, vector<16x8xf32>,
    %c0_58 = arith.constant 0 : index
    %c14 = arith.constant 14 : index
    %c0_59 = arith.constant 0 : index
    %c0_60 = arith.constant 0 : index
    %44 = vector.load %arg1[%c0_58, %c14, %c0_59, %c0_60] : memref<1x16x16x8xf32, #tpu.memory_space<vmem>>, vector<1x1x16x8xf32>
    %45 = vector.shape_cast %44 : vector<1x1x16x8xf32> to vector<16x8xf32>
    %c384 = arith.constant 384 : index
    %c0_61 = arith.constant 0 : index
    %46 = vector.load %arg11[%c384, %c0_61] : memref<480x8xf32, #tpu.memory_space<vmem>>, vector<16x8xf32>
    tpu.vector_store %arg11[%c384, %c0_61], %45 {strides = array<i32>} : memref<480x8xf32, #tpu.memory_space<vmem>>, vector<16x8xf32>,
    %c0_62 = arith.constant 0 : index
    %c15 = arith.constant 15 : index
    %c0_63 = arith.constant 0 : index
    %c0_64 = arith.constant 0 : index
    %47 = vector.load %arg1[%c0_62, %c15, %c0_63, %c0_64] : memref<1x16x16x8xf32, #tpu.memory_space<vmem>>, vector<1x1x16x8xf32>
    %48 = vector.shape_cast %47 : vector<1x1x16x8xf32> to vector<16x8xf32>
    %c408 = arith.constant 408 : index
    %c0_65 = arith.constant 0 : index
    %49 = vector.load %arg11[%c408, %c0_65] : memref<480x8xf32, #tpu.memory_space<vmem>>, vector<16x8xf32>
    tpu.vector_store %arg11[%c408, %c0_65], %48 {strides = array<i32>} : memref<480x8xf32, #tpu.memory_space<vmem>>, vector<16x8xf32>,
    %cst_66 = arith.constant 0.000000e+00 : f32
    %50 = vector.broadcast %cst_66 : f32 to vector<384x128xf32>
    %c23 = arith.constant 23 : index
    %c0_67 = arith.constant 0 : index
    %51 = vector.load %arg11[%c23, %c0_67] : memref<480x8xf32, #tpu.memory_space<vmem>>, vector<384x8xf32>
    %c0_68 = arith.constant 0 : index
    %c0_69 = arith.constant 0 : index
    %c0_70 = arith.constant 0 : index
    %52 = vector.load %arg2[%c0_68, %c0_69, %c0_70] : memref<9x8x128xf32, #tpu.memory_space<vmem>>, vector<1x8x128xf32>
    %53 = vector.shape_cast %52 : vector<1x8x128xf32> to vector<8x128xf32>
    %cst_71 = arith.constant dense<0.000000e+00> : vector<384x128xf32>
    %54 = tpu.matmul %51, %53, %cst_71 {dimension_numbers = #tpu.dot_dimension_numbers<[1], [0], [0], [1], [0, 0, 1, 1], [], []>} : vector<384x8xf32>, vector<8x128xf32>, vector<384x128xf32> -> vector<384x128xf32>
    %55 = arith.addf %50, %54 : vector<384x128xf32>
    %c24 = arith.constant 24 : index
    %c0_72 = arith.constant 0 : index
    %56 = vector.load %arg11[%c24, %c0_72] : memref<480x8xf32, #tpu.memory_space<vmem>>, vector<384x8xf32>
    %c1_73 = arith.constant 1 : index
    %c0_74 = arith.constant 0 : index
    %c0_75 = arith.constant 0 : index
    %57 = vector.load %arg2[%c1_73, %c0_74, %c0_75] : memref<9x8x128xf32, #tpu.memory_space<vmem>>, vector<1x8x128xf32>
    %58 = vector.shape_cast %57 : vector<1x8x128xf32> to vector<8x128xf32>
    %cst_76 = arith.constant dense<0.000000e+00> : vector<384x128xf32>
    %59 = tpu.matmul %56, %58, %cst_76 {dimension_numbers = #tpu.dot_dimension_numbers<[1], [0], [0], [1], [0, 0, 1, 1], [], []>} : vector<384x8xf32>, vector<8x128xf32>, vector<384x128xf32> -> vector<384x128xf32>
    %60 = arith.addf %55, %59 : vector<384x128xf32>
    %c25 = arith.constant 25 : index
    %c0_77 = arith.constant 0 : index
    %61 = vector.load %arg11[%c25, %c0_77] : memref<480x8xf32, #tpu.memory_space<vmem>>, vector<384x8xf32>
    %c2_78 = arith.constant 2 : index
    %c0_79 = arith.constant 0 : index
    %c0_80 = arith.constant 0 : index
    %62 = vector.load %arg2[%c2_78, %c0_79, %c0_80] : memref<9x8x128xf32, #tpu.memory_space<vmem>>, vector<1x8x128xf32>
    %63 = vector.shape_cast %62 : vector<1x8x128xf32> to vector<8x128xf32>
    %cst_81 = arith.constant dense<0.000000e+00> : vector<384x128xf32>
    %64 = tpu.matmul %61, %63, %cst_81 {dimension_numbers = #tpu.dot_dimension_numbers<[1], [0], [0], [1], [0, 0, 1, 1], [], []>} : vector<384x8xf32>, vector<8x128xf32>, vector<384x128xf32> -> vector<384x128xf32>
    %65 = arith.addf %60, %64 : vector<384x128xf32>
    %c47 = arith.constant 47 : index
    %c0_82 = arith.constant 0 : index
    %66 = vector.load %arg11[%c47, %c0_82] : memref<480x8xf32, #tpu.memory_space<vmem>>, vector<384x8xf32>
    %c3_83 = arith.constant 3 : index
    %c0_84 = arith.constant 0 : index
    %c0_85 = arith.constant 0 : index
    %67 = vector.load %arg2[%c3_83, %c0_84, %c0_85] : memref<9x8x128xf32, #tpu.memory_space<vmem>>, vector<1x8x128xf32>
    %68 = vector.shape_cast %67 : vector<1x8x128xf32> to vector<8x128xf32>
    %cst_86 = arith.constant dense<0.000000e+00> : vector<384x128xf32>
    %69 = tpu.matmul %66, %68, %cst_86 {dimension_numbers = #tpu.dot_dimension_numbers<[1], [0], [0], [1], [0, 0, 1, 1], [], []>} : vector<384x8xf32>, vector<8x128xf32>, vector<384x128xf32> -> vector<384x128xf32>
    %70 = arith.addf %65, %69 : vector<384x128xf32>
    %c48_87 = arith.constant 48 : index
    %c0_88 = arith.constant 0 : index
    %71 = vector.load %arg11[%c48_87, %c0_88] : memref<480x8xf32, #tpu.memory_space<vmem>>, vector<384x8xf32>
    %c4_89 = arith.constant 4 : index
    %c0_90 = arith.constant 0 : index
    %c0_91 = arith.constant 0 : index
    %72 = vector.load %arg2[%c4_89, %c0_90, %c0_91] : memref<9x8x128xf32, #tpu.memory_space<vmem>>, vector<1x8x128xf32>
    %73 = vector.shape_cast %72 : vector<1x8x128xf32> to vector<8x128xf32>
    %cst_92 = arith.constant dense<0.000000e+00> : vector<384x128xf32>
    %74 = tpu.matmul %71, %73, %cst_92 {dimension_numbers = #tpu.dot_dimension_numbers<[1], [0], [0], [1], [0, 0, 1, 1], [], []>} : vector<384x8xf32>, vector<8x128xf32>, vector<384x128xf32> -> vector<384x128xf32>
    %75 = arith.addf %70, %74 : vector<384x128xf32>
    %c49 = arith.constant 49 : index
    %c0_93 = arith.constant 0 : index
    %76 = vector.load %arg11[%c49, %c0_93] : memref<480x8xf32, #tpu.memory_space<vmem>>, vector<384x8xf32>
    %c5_94 = arith.constant 5 : index
    %c0_95 = arith.constant 0 : index
    %c0_96 = arith.constant 0 : index
    %77 = vector.load %arg2[%c5_94, %c0_95, %c0_96] : memref<9x8x128xf32, #tpu.memory_space<vmem>>, vector<1x8x128xf32>
    %78 = vector.shape_cast %77 : vector<1x8x128xf32> to vector<8x128xf32>
    %cst_97 = arith.constant dense<0.000000e+00> : vector<384x128xf32>
    %79 = tpu.matmul %76, %78, %cst_97 {dimension_numbers = #tpu.dot_dimension_numbers<[1], [0], [0], [1], [0, 0, 1, 1], [], []>} : vector<384x8xf32>, vector<8x128xf32>, vector<384x128xf32> -> vector<384x128xf32>
    %80 = arith.addf %75, %79 : vector<384x128xf32>
    %c71 = arith.constant 71 : index
    %c0_98 = arith.constant 0 : index
    %81 = vector.load %arg11[%c71, %c0_98] : memref<480x8xf32, #tpu.memory_space<vmem>>, vector<384x8xf32>
    %c6_99 = arith.constant 6 : index
    %c0_100 = arith.constant 0 : index
    %c0_101 = arith.constant 0 : index
    %82 = vector.load %arg2[%c6_99, %c0_100, %c0_101] : memref<9x8x128xf32, #tpu.memory_space<vmem>>, vector<1x8x128xf32>
    %83 = vector.shape_cast %82 : vector<1x8x128xf32> to vector<8x128xf32>
    %cst_102 = arith.constant dense<0.000000e+00> : vector<384x128xf32>
    %84 = tpu.matmul %81, %83, %cst_102 {dimension_numbers = #tpu.dot_dimension_numbers<[1], [0], [0], [1], [0, 0, 1, 1], [], []>} : vector<384x8xf32>, vector<8x128xf32>, vector<384x128xf32> -> vector<384x128xf32>
    %85 = arith.addf %80, %84 : vector<384x128xf32>
    %c72_103 = arith.constant 72 : index
    %c0_104 = arith.constant 0 : index
    %86 = vector.load %arg11[%c72_103, %c0_104] : memref<480x8xf32, #tpu.memory_space<vmem>>, vector<384x8xf32>
    %c7_105 = arith.constant 7 : index
    %c0_106 = arith.constant 0 : index
    %c0_107 = arith.constant 0 : index
    %87 = vector.load %arg2[%c7_105, %c0_106, %c0_107] : memref<9x8x128xf32, #tpu.memory_space<vmem>>, vector<1x8x128xf32>
    %88 = vector.shape_cast %87 : vector<1x8x128xf32> to vector<8x128xf32>
    %cst_108 = arith.constant dense<0.000000e+00> : vector<384x128xf32>
    %89 = tpu.matmul %86, %88, %cst_108 {dimension_numbers = #tpu.dot_dimension_numbers<[1], [0], [0], [1], [0, 0, 1, 1], [], []>} : vector<384x8xf32>, vector<8x128xf32>, vector<384x128xf32> -> vector<384x128xf32>
    %90 = arith.addf %85, %89 : vector<384x128xf32>
    %c73 = arith.constant 73 : index
    %c0_109 = arith.constant 0 : index
    %91 = vector.load %arg11[%c73, %c0_109] : memref<480x8xf32, #tpu.memory_space<vmem>>, vector<384x8xf32>
    %c8_110 = arith.constant 8 : index
    %c0_111 = arith.constant 0 : index
    %c0_112 = arith.constant 0 : index
    %92 = vector.load %arg2[%c8_110, %c0_111, %c0_112] : memref<9x8x128xf32, #tpu.memory_space<vmem>>, vector<1x8x128xf32>
    %93 = vector.shape_cast %92 : vector<1x8x128xf32> to vector<8x128xf32>
    %cst_113 = arith.constant dense<0.000000e+00> : vector<384x128xf32>
    %94 = tpu.matmul %91, %93, %cst_113 {dimension_numbers = #tpu.dot_dimension_numbers<[1], [0], [0], [1], [0, 0, 1, 1], [], []>} : vector<384x8xf32>, vector<8x128xf32>, vector<384x128xf32> -> vector<384x128xf32>
    %95 = arith.addf %90, %94 : vector<384x128xf32>
    %c0_114 = arith.constant 0 : index
    %c0_115 = arith.constant 0 : index
    %96 = vector.load %arg3[%c0_114, %c0_115] : memref<1x128xf32, #tpu.memory_space<vmem>>, vector<1x128xf32>
    %97 = vector.broadcast %96 : vector<1x128xf32> to vector<384x128xf32>
    %98 = arith.addf %95, %97 : vector<384x128xf32>
    %cst_116 = arith.constant 0.000000e+00 : f32
    %99 = vector.broadcast %cst_116 : f32 to vector<384x128xf32>
    %100 = arith.maximumf %98, %99 : vector<384x128xf32>
    %101 = vector.shape_cast %100 : vector<384x128xf32> to vector<8x2x24x128xf32>
    %102 = vector.extract_strided_slice %101 {offsets = [0, 0, 0, 0], sizes = [8, 1, 24, 128], strides = [1, 1, 1, 1]} : vector<8x2x24x128xf32> to vector<8x1x24x128xf32>
    %103 = vector.shape_cast %102 : vector<8x1x24x128xf32> to vector<8x24x128xf32>
    %104 = vector.extract_strided_slice %101 {offsets = [0, 1, 0, 0], sizes = [8, 1, 24, 128], strides = [1, 1, 1, 1]} : vector<8x2x24x128xf32> to vector<8x1x24x128xf32>
    %105 = vector.shape_cast %104 : vector<8x1x24x128xf32> to vector<8x24x128xf32>
    %106 = arith.maximumf %103, %105 : vector<8x24x128xf32>
    %107 = vector.extract_strided_slice %106 {offsets = [0, 0, 0], sizes = [8, 16, 128], strides = [1, 1, 1]} : vector<8x24x128xf32> to vector<8x16x128xf32>
    %c0_117 = arith.constant 0 : index
    %c0_118 = arith.constant 0 : index
    %c0_119 = arith.constant 0 : index
    %108 = vector.load %arg13[%c0_117, %c0_118, %c0_119] : memref<8x16x128xf32, #tpu.memory_space<vmem>>, vector<8x16x128xf32>
    tpu.vector_store %arg13[%c0_117, %c0_118, %c0_119], %107 {strides = array<i32>} : memref<8x16x128xf32, #tpu.memory_space<vmem>>, vector<8x16x128xf32>,
    %c0_120 = arith.constant 0 : index
    %c0_121 = arith.constant 0 : index
    %c0_122 = arith.constant 0 : index
    %109 = tpu.strided_load %arg13[%c0_120, %c0_121, %c0_122] {strides = array<i32: 1, 2, 1>} : memref<8x16x128xf32, #tpu.memory_space<vmem>>, vector<8x8x128xf32>
    %c0_123 = arith.constant 0 : index
    %c1_124 = arith.constant 1 : index
    %c0_125 = arith.constant 0 : index
    %110 = tpu.strided_load %arg13[%c0_123, %c1_124, %c0_125] {strides = array<i32: 1, 2, 1>} : memref<8x16x128xf32, #tpu.memory_space<vmem>>, vector<8x8x128xf32>
    %111 = arith.maximumf %109, %110 : vector<8x8x128xf32>
    %cst_126 = arith.constant 0.000000e+00 : f32
    %112 = vector.broadcast %cst_126 : f32 to vector<192x128xf32>
    %c0_127 = arith.constant 0 : index
    %c0_128 = arith.constant 0 : index
    %113 = vector.load %arg12[%c0_127, %c0_128] : memref<192x128xf32, #tpu.memory_space<vmem>>, vector<192x128xf32>
    tpu.vector_store %arg12[%c0_127, %c0_128], %112 {strides = array<i32>} : memref<192x128xf32, #tpu.memory_space<vmem>>, vector<192x128xf32>,
    %114 = vector.extract_strided_slice %111 {offsets = [0, 0, 0], sizes = [1, 8, 128], strides = [1, 1, 1]} : vector<8x8x128xf32> to vector<1x8x128xf32>
    %115 = vector.shape_cast %114 : vector<1x8x128xf32> to vector<8x128xf32>
    %c32 = arith.constant 32 : index
    %c0_129 = arith.constant 0 : index
    %116 = vector.load %arg12[%c32, %c0_129] : memref<192x128xf32, #tpu.memory_space<vmem>>, vector<8x128xf32>
    tpu.vector_store %arg12[%c32, %c0_129], %115 {strides = array<i32>} : memref<192x128xf32, #tpu.memory_space<vmem>>, vector<8x128xf32>,
    %117 = vector.extract_strided_slice %111 {offsets = [1, 0, 0], sizes = [1, 8, 128], strides = [1, 1, 1]} : vector<8x8x128xf32> to vector<1x8x128xf32>
    %118 = vector.shape_cast %117 : vector<1x8x128xf32> to vector<8x128xf32>
    %c48_130 = arith.constant 48 : index
    %c0_131 = arith.constant 0 : index
    %119 = vector.load %arg12[%c48_130, %c0_131] : memref<192x128xf32, #tpu.memory_space<vmem>>, vector<8x128xf32>
    tpu.vector_store %arg12[%c48_130, %c0_131], %118 {strides = array<i32>} : memref<192x128xf32, #tpu.memory_space<vmem>>, vector<8x128xf32>,
    %120 = vector.extract_strided_slice %111 {offsets = [2, 0, 0], sizes = [1, 8, 128], strides = [1, 1, 1]} : vector<8x8x128xf32> to vector<1x8x128xf32>
    %121 = vector.shape_cast %120 : vector<1x8x128xf32> to vector<8x128xf32>
    %c64 = arith.constant 64 : index
    %c0_132 = arith.constant 0 : index
    %122 = vector.load %arg12[%c64, %c0_132] : memref<192x128xf32, #tpu.memory_space<vmem>>, vector<8x128xf32>
    tpu.vector_store %arg12[%c64, %c0_132], %121 {strides = array<i32>} : memref<192x128xf32, #tpu.memory_space<vmem>>, vector<8x128xf32>,
    %123 = vector.extract_strided_slice %111 {offsets = [3, 0, 0], sizes = [1, 8, 128], strides = [1, 1, 1]} : vector<8x8x128xf32> to vector<1x8x128xf32>
    %124 = vector.shape_cast %123 : vector<1x8x128xf32> to vector<8x128xf32>
    %c80 = arith.constant 80 : index
    %c0_133 = arith.constant 0 : index
    %125 = vector.load %arg12[%c80, %c0_133] : memref<192x128xf32, #tpu.memory_space<vmem>>, vector<8x128xf32>
    tpu.vector_store %arg12[%c80, %c0_133], %124 {strides = array<i32>} : memref<192x128xf32, #tpu.memory_space<vmem>>, vector<8x128xf32>,
    %126 = vector.extract_strided_slice %111 {offsets = [4, 0, 0], sizes = [1, 8, 128], strides = [1, 1, 1]} : vector<8x8x128xf32> to vector<1x8x128xf32>
    %127 = vector.shape_cast %126 : vector<1x8x128xf32> to vector<8x128xf32>
    %c96_134 = arith.constant 96 : index
    %c0_135 = arith.constant 0 : index
    %128 = vector.load %arg12[%c96_134, %c0_135] : memref<192x128xf32, #tpu.memory_space<vmem>>, vector<8x128xf32>
    tpu.vector_store %arg12[%c96_134, %c0_135], %127 {strides = array<i32>} : memref<192x128xf32, #tpu.memory_space<vmem>>, vector<8x128xf32>,
    %129 = vector.extract_strided_slice %111 {offsets = [5, 0, 0], sizes = [1, 8, 128], strides = [1, 1, 1]} : vector<8x8x128xf32> to vector<1x8x128xf32>
    %130 = vector.shape_cast %129 : vector<1x8x128xf32> to vector<8x128xf32>
    %c112 = arith.constant 112 : index
    %c0_136 = arith.constant 0 : index
    %131 = vector.load %arg12[%c112, %c0_136] : memref<192x128xf32, #tpu.memory_space<vmem>>, vector<8x128xf32>
    tpu.vector_store %arg12[%c112, %c0_136], %130 {strides = array<i32>} : memref<192x128xf32, #tpu.memory_space<vmem>>, vector<8x128xf32>,
    %132 = vector.extract_strided_slice %111 {offsets = [6, 0, 0], sizes = [1, 8, 128], strides = [1, 1, 1]} : vector<8x8x128xf32> to vector<1x8x128xf32>
    %133 = vector.shape_cast %132 : vector<1x8x128xf32> to vector<8x128xf32>
    %c128 = arith.constant 128 : index
    %c0_137 = arith.constant 0 : index
    %134 = vector.load %arg12[%c128, %c0_137] : memref<192x128xf32, #tpu.memory_space<vmem>>, vector<8x128xf32>
    tpu.vector_store %arg12[%c128, %c0_137], %133 {strides = array<i32>} : memref<192x128xf32, #tpu.memory_space<vmem>>, vector<8x128xf32>,
    %135 = vector.extract_strided_slice %111 {offsets = [7, 0, 0], sizes = [1, 8, 128], strides = [1, 1, 1]} : vector<8x8x128xf32> to vector<1x8x128xf32>
    %136 = vector.shape_cast %135 : vector<1x8x128xf32> to vector<8x128xf32>
    %c144_138 = arith.constant 144 : index
    %c0_139 = arith.constant 0 : index
    %137 = vector.load %arg12[%c144_138, %c0_139] : memref<192x128xf32, #tpu.memory_space<vmem>>, vector<8x128xf32>
    tpu.vector_store %arg12[%c144_138, %c0_139], %136 {strides = array<i32>} : memref<192x128xf32, #tpu.memory_space<vmem>>, vector<8x128xf32>,
    %cst_140 = arith.constant 0.000000e+00 : f32
    %138 = vector.broadcast %cst_140 : f32 to vector<128x32xf32>
    %c15_141 = arith.constant 15 : index
    %c0_142 = arith.constant 0 : index
    %139 = vector.load %arg12[%c15_141, %c0_142] : memref<192x128xf32, #tpu.memory_space<vmem>>, vector<128x128xf32>
    %c0_143 = arith.constant 0 : index
    %c0_144 = arith.constant 0 : index
    %c0_145 = arith.constant 0 : index
    %140 = vector.load %arg4[%c0_143, %c0_144, %c0_145] : memref<9x128x32xf32, #tpu.memory_space<vmem>>, vector<1x128x32xf32>
    %141 = vector.shape_cast %140 : vector<1x128x32xf32> to vector<128x32xf32>
    %cst_146 = arith.constant dense<0.000000e+00> : vector<128x32xf32>
    %142 = tpu.matmul %139, %141, %cst_146 {dimension_numbers = #tpu.dot_dimension_numbers<[1], [0], [0], [1], [0, 0, 1, 1], [], []>} : vector<128x128xf32>, vector<128x32xf32>, vector<128x32xf32> -> vector<128x32xf32>
    %143 = arith.addf %138, %142 : vector<128x32xf32>
    %c16 = arith.constant 16 : index
    %c0_147 = arith.constant 0 : index
    %144 = vector.load %arg12[%c16, %c0_147] : memref<192x128xf32, #tpu.memory_space<vmem>>, vector<128x128xf32>
    %c1_148 = arith.constant 1 : index
    %c0_149 = arith.constant 0 : index
    %c0_150 = arith.constant 0 : index
    %145 = vector.load %arg4[%c1_148, %c0_149, %c0_150] : memref<9x128x32xf32, #tpu.memory_space<vmem>>, vector<1x128x32xf32>
    %146 = vector.shape_cast %145 : vector<1x128x32xf32> to vector<128x32xf32>
    %cst_151 = arith.constant dense<0.000000e+00> : vector<128x32xf32>
    %147 = tpu.matmul %144, %146, %cst_151 {dimension_numbers = #tpu.dot_dimension_numbers<[1], [0], [0], [1], [0, 0, 1, 1], [], []>} : vector<128x128xf32>, vector<128x32xf32>, vector<128x32xf32> -> vector<128x32xf32>
    %148 = arith.addf %143, %147 : vector<128x32xf32>
    %c17 = arith.constant 17 : index
    %c0_152 = arith.constant 0 : index
    %149 = vector.load %arg12[%c17, %c0_152] : memref<192x128xf32, #tpu.memory_space<vmem>>, vector<128x128xf32>
    %c2_153 = arith.constant 2 : index
    %c0_154 = arith.constant 0 : index
    %c0_155 = arith.constant 0 : index
    %150 = vector.load %arg4[%c2_153, %c0_154, %c0_155] : memref<9x128x32xf32, #tpu.memory_space<vmem>>, vector<1x128x32xf32>
    %151 = vector.shape_cast %150 : vector<1x128x32xf32> to vector<128x32xf32>
    %cst_156 = arith.constant dense<0.000000e+00> : vector<128x32xf32>
    %152 = tpu.matmul %149, %151, %cst_156 {dimension_numbers = #tpu.dot_dimension_numbers<[1], [0], [0], [1], [0, 0, 1, 1], [], []>} : vector<128x128xf32>, vector<128x32xf32>, vector<128x32xf32> -> vector<128x32xf32>
    %153 = arith.addf %148, %152 : vector<128x32xf32>
    %c31 = arith.constant 31 : index
    %c0_157 = arith.constant 0 : index
    %154 = vector.load %arg12[%c31, %c0_157] : memref<192x128xf32, #tpu.memory_space<vmem>>, vector<128x128xf32>
    %c3_158 = arith.constant 3 : index
    %c0_159 = arith.constant 0 : index
    %c0_160 = arith.constant 0 : index
    %155 = vector.load %arg4[%c3_158, %c0_159, %c0_160] : memref<9x128x32xf32, #tpu.memory_space<vmem>>, vector<1x128x32xf32>
    %156 = vector.shape_cast %155 : vector<1x128x32xf32> to vector<128x32xf32>
    %cst_161 = arith.constant dense<0.000000e+00> : vector<128x32xf32>
    %157 = tpu.matmul %154, %156, %cst_161 {dimension_numbers = #tpu.dot_dimension_numbers<[1], [0], [0], [1], [0, 0, 1, 1], [], []>} : vector<128x128xf32>, vector<128x32xf32>, vector<128x32xf32> -> vector<128x32xf32>
    %158 = arith.addf %153, %157 : vector<128x32xf32>
    %c32_162 = arith.constant 32 : index
    %c0_163 = arith.constant 0 : index
    %159 = vector.load %arg12[%c32_162, %c0_163] : memref<192x128xf32, #tpu.memory_space<vmem>>, vector<128x128xf32>
    %c4_164 = arith.constant 4 : index
    %c0_165 = arith.constant 0 : index
    %c0_166 = arith.constant 0 : index
    %160 = vector.load %arg4[%c4_164, %c0_165, %c0_166] : memref<9x128x32xf32, #tpu.memory_space<vmem>>, vector<1x128x32xf32>
    %161 = vector.shape_cast %160 : vector<1x128x32xf32> to vector<128x32xf32>
    %cst_167 = arith.constant dense<0.000000e+00> : vector<128x32xf32>
    %162 = tpu.matmul %159, %161, %cst_167 {dimension_numbers = #tpu.dot_dimension_numbers<[1], [0], [0], [1], [0, 0, 1, 1], [], []>} : vector<128x128xf32>, vector<128x32xf32>, vector<128x32xf32> -> vector<128x32xf32>
    %163 = arith.addf %158, %162 : vector<128x32xf32>
    %c33 = arith.constant 33 : index
    %c0_168 = arith.constant 0 : index
    %164 = vector.load %arg12[%c33, %c0_168] : memref<192x128xf32, #tpu.memory_space<vmem>>, vector<128x128xf32>
    %c5_169 = arith.constant 5 : index
    %c0_170 = arith.constant 0 : index
    %c0_171 = arith.constant 0 : index
    %165 = vector.load %arg4[%c5_169, %c0_170, %c0_171] : memref<9x128x32xf32, #tpu.memory_space<vmem>>, vector<1x128x32xf32>
    %166 = vector.shape_cast %165 : vector<1x128x32xf32> to vector<128x32xf32>
    %cst_172 = arith.constant dense<0.000000e+00> : vector<128x32xf32>
    %167 = tpu.matmul %164, %166, %cst_172 {dimension_numbers = #tpu.dot_dimension_numbers<[1], [0], [0], [1], [0, 0, 1, 1], [], []>} : vector<128x128xf32>, vector<128x32xf32>, vector<128x32xf32> -> vector<128x32xf32>
    %168 = arith.addf %163, %167 : vector<128x32xf32>
    %c47_173 = arith.constant 47 : index
    %c0_174 = arith.constant 0 : index
    %169 = vector.load %arg12[%c47_173, %c0_174] : memref<192x128xf32, #tpu.memory_space<vmem>>, vector<128x128xf32>
    %c6_175 = arith.constant 6 : index
    %c0_176 = arith.constant 0 : index
    %c0_177 = arith.constant 0 : index
    %170 = vector.load %arg4[%c6_175, %c0_176, %c0_177] : memref<9x128x32xf32, #tpu.memory_space<vmem>>, vector<1x128x32xf32>
    %171 = vector.shape_cast %170 : vector<1x128x32xf32> to vector<128x32xf32>
    %cst_178 = arith.constant dense<0.000000e+00> : vector<128x32xf32>
    %172 = tpu.matmul %169, %171, %cst_178 {dimension_numbers = #tpu.dot_dimension_numbers<[1], [0], [0], [1], [0, 0, 1, 1], [], []>} : vector<128x128xf32>, vector<128x32xf32>, vector<128x32xf32> -> vector<128x32xf32>
    %173 = arith.addf %168, %172 : vector<128x32xf32>
    %c48_179 = arith.constant 48 : index
    %c0_180 = arith.constant 0 : index
    %174 = vector.load %arg12[%c48_179, %c0_180] : memref<192x128xf32, #tpu.memory_space<vmem>>, vector<128x128xf32>
    %c7_181 = arith.constant 7 : index
    %c0_182 = arith.constant 0 : index
    %c0_183 = arith.constant 0 : index
    %175 = vector.load %arg4[%c7_181, %c0_182, %c0_183] : memref<9x128x32xf32, #tpu.memory_space<vmem>>, vector<1x128x32xf32>
    %176 = vector.shape_cast %175 : vector<1x128x32xf32> to vector<128x32xf32>
    %cst_184 = arith.constant dense<0.000000e+00> : vector<128x32xf32>
    %177 = tpu.matmul %174, %176, %cst_184 {dimension_numbers = #tpu.dot_dimension_numbers<[1], [0], [0], [1], [0, 0, 1, 1], [], []>} : vector<128x128xf32>, vector<128x32xf32>, vector<128x32xf32> -> vector<128x32xf32>
    %178 = arith.addf %173, %177 : vector<128x32xf32>
    %c49_185 = arith.constant 49 : index
    %c0_186 = arith.constant 0 : index
    %179 = vector.load %arg12[%c49_185, %c0_186] : memref<192x128xf32, #tpu.memory_space<vmem>>, vector<128x128xf32>
    %c8_187 = arith.constant 8 : index
    %c0_188 = arith.constant 0 : index
    %c0_189 = arith.constant 0 : index
    %180 = vector.load %arg4[%c8_187, %c0_188, %c0_189] : memref<9x128x32xf32, #tpu.memory_space<vmem>>, vector<1x128x32xf32>
    %181 = vector.shape_cast %180 : vector<1x128x32xf32> to vector<128x32xf32>
    %cst_190 = arith.constant dense<0.000000e+00> : vector<128x32xf32>
    %182 = tpu.matmul %179, %181, %cst_190 {dimension_numbers = #tpu.dot_dimension_numbers<[1], [0], [0], [1], [0, 0, 1, 1], [], []>} : vector<128x128xf32>, vector<128x32xf32>, vector<128x32xf32> -> vector<128x32xf32>
    %183 = arith.addf %178, %182 : vector<128x32xf32>
    %c0_191 = arith.constant 0 : index
    %c0_192 = arith.constant 0 : index
    %184 = vector.load %arg5[%c0_191, %c0_192] : memref<1x32xf32, #tpu.memory_space<vmem>>, vector<1x32xf32>
    %185 = vector.broadcast %184 : vector<1x32xf32> to vector<128x32xf32>
    %186 = arith.addf %183, %185 : vector<128x32xf32>
    %cst_193 = arith.constant 0.000000e+00 : f32
    %187 = vector.broadcast %cst_193 : f32 to vector<128x32xf32>
    %188 = arith.maximumf %186, %187 : vector<128x32xf32>
    %189 = vector.shape_cast %188 : vector<128x32xf32> to vector<4x2x16x32xf32>
    %190 = vector.extract_strided_slice %189 {offsets = [0, 0, 0, 0], sizes = [4, 1, 16, 32], strides = [1, 1, 1, 1]} : vector<4x2x16x32xf32> to vector<4x1x16x32xf32>
    %191 = vector.shape_cast %190 : vector<4x1x16x32xf32> to vector<4x16x32xf32>
    %192 = vector.extract_strided_slice %189 {offsets = [0, 1, 0, 0], sizes = [4, 1, 16, 32], strides = [1, 1, 1, 1]} : vector<4x2x16x32xf32> to vector<4x1x16x32xf32>
    %193 = vector.shape_cast %192 : vector<4x1x16x32xf32> to vector<4x16x32xf32>
    %194 = arith.maximumf %191, %193 : vector<4x16x32xf32>
    %195 = vector.extract_strided_slice %194 {offsets = [0, 0, 0], sizes = [4, 8, 32], strides = [1, 1, 1]} : vector<4x16x32xf32> to vector<4x8x32xf32>
    %c0_194 = arith.constant 0 : index
    %c0_195 = arith.constant 0 : index
    %c0_196 = arith.constant 0 : index
    %196 = vector.load %arg14[%c0_194, %c0_195, %c0_196] : memref<4x8x32xf32, #tpu.memory_space<vmem>>, vector<4x8x32xf32>
    tpu.vector_store %arg14[%c0_194, %c0_195, %c0_196], %195 {strides = array<i32>} : memref<4x8x32xf32, #tpu.memory_space<vmem>>, vector<4x8x32xf32>,
    %c0_197 = arith.constant 0 : index
    %c0_198 = arith.constant 0 : index
    %c0_199 = arith.constant 0 : index
    %197 = tpu.strided_load %arg14[%c0_197, %c0_198, %c0_199] {strides = array<i32: 1, 2, 1>} : memref<4x8x32xf32, #tpu.memory_space<vmem>>, vector<4x4x32xf32>
    %c0_200 = arith.constant 0 : index
    %c1_201 = arith.constant 1 : index
    %c0_202 = arith.constant 0 : index
    %198 = tpu.strided_load %arg14[%c0_200, %c1_201, %c0_202] {strides = array<i32: 1, 2, 1>} : memref<4x8x32xf32, #tpu.memory_space<vmem>>, vector<4x4x32xf32>
    %199 = arith.maximumf %197, %198 : vector<4x4x32xf32>
    %c0_203 = arith.constant 0 : index
    %c0_204 = arith.constant 0 : index
    %200 = vector.load %arg6[%c0_203, %c0_204] : memref<32x512xf32, #tpu.memory_space<vmem>>, vector<32x512xf32>
    %c0_205 = arith.constant 0 : index
    %c0_206 = arith.constant 0 : index
    %201 = vector.load %arg7[%c0_205, %c0_206] : memref<1x512xf32, #tpu.memory_space<vmem>>, vector<1x512xf32>
    %c0_207 = arith.constant 0 : index
    %c0_208 = arith.constant 0 : index
    %202 = vector.load %arg8[%c0_207, %c0_208] : memref<512x128xf32, #tpu.memory_space<vmem>>, vector<512x128xf32>
    %c0_209 = arith.constant 0 : index
    %c0_210 = arith.constant 0 : index
    %203 = vector.load %arg9[%c0_209, %c0_210] : memref<1x128xf32, #tpu.memory_space<vmem>>, vector<1x128xf32>
    %204 = vector.extract_strided_slice %199 {offsets = [0, 0, 0], sizes = [1, 4, 32], strides = [1, 1, 1]} : vector<4x4x32xf32> to vector<1x4x32xf32>
    %205 = vector.shape_cast %204 : vector<1x4x32xf32> to vector<4x32xf32>
    %cst_211 = arith.constant dense<0.000000e+00> : vector<4x512xf32>
    %206 = tpu.matmul %205, %200, %cst_211 {dimension_numbers = #tpu.dot_dimension_numbers<[1], [0], [0], [1], [0, 0, 1, 1], [], []>} : vector<4x32xf32>, vector<32x512xf32>, vector<4x512xf32> -> vector<4x512xf32>
    %207 = vector.broadcast %201 : vector<1x512xf32> to vector<4x512xf32>
    %208 = arith.addf %206, %207 : vector<4x512xf32>
    %cst_212 = arith.constant 0.000000e+00 : f32
    %209 = vector.broadcast %cst_212 : f32 to vector<4x512xf32>
    %210 = arith.maximumf %208, %209 : vector<4x512xf32>
    %cst_213 = arith.constant dense<0.000000e+00> : vector<4x128xf32>
    %211 = tpu.matmul %210, %202, %cst_213 {dimension_numbers = #tpu.dot_dimension_numbers<[1], [0], [0], [1], [0, 0, 1, 1], [], []>} : vector<4x512xf32>, vector<512x128xf32>, vector<4x128xf32> -> vector<4x128xf32>
    %212 = vector.broadcast %203 : vector<1x128xf32> to vector<4x128xf32>
    %213 = arith.addf %211, %212 : vector<4x128xf32>
    %c0_214 = arith.constant 0 : index
    %c0_215 = arith.constant 0 : index
    %c0_216 = arith.constant 0 : index
    %c0_217 = arith.constant 0 : index
    %214 = vector.load %arg10[%c0_214, %c0_215, %c0_216, %c0_217] : memref<1x4x4x128xf32, #tpu.memory_space<vmem>>, vector<1x1x4x128xf32>
    %215 = vector.shape_cast %214 : vector<1x1x4x128xf32> to vector<4x128xf32>
    %216 = vector.shape_cast %213 : vector<4x128xf32> to vector<1x1x4x128xf32>
    tpu.vector_store %arg10[%c0_214, %c0_215, %c0_216, %c0_217], %216 {strides = array<i32>} : memref<1x4x4x128xf32, #tpu.memory_space<vmem>>, vector<1x1x4x128xf32>,
    %217 = vector.extract_strided_slice %199 {offsets = [1, 0, 0], sizes = [1, 4, 32], strides = [1, 1, 1]} : vector<4x4x32xf32> to vector<1x4x32xf32>
    %218 = vector.shape_cast %217 : vector<1x4x32xf32> to vector<4x32xf32>
    %cst_218 = arith.constant dense<0.000000e+00> : vector<4x512xf32>
    %219 = tpu.matmul %218, %200, %cst_218 {dimension_numbers = #tpu.dot_dimension_numbers<[1], [0], [0], [1], [0, 0, 1, 1], [], []>} : vector<4x32xf32>, vector<32x512xf32>, vector<4x512xf32> -> vector<4x512xf32>
    %220 = vector.broadcast %201 : vector<1x512xf32> to vector<4x512xf32>
    %221 = arith.addf %219, %220 : vector<4x512xf32>
    %cst_219 = arith.constant 0.000000e+00 : f32
    %222 = vector.broadcast %cst_219 : f32 to vector<4x512xf32>
    %223 = arith.maximumf %221, %222 : vector<4x512xf32>
    %cst_220 = arith.constant dense<0.000000e+00> : vector<4x128xf32>
    %224 = tpu.matmul %223, %202, %cst_220 {dimension_numbers = #tpu.dot_dimension_numbers<[1], [0], [0], [1], [0, 0, 1, 1], [], []>} : vector<4x512xf32>, vector<512x128xf32>, vector<4x128xf32> -> vector<4x128xf32>
    %225 = vector.broadcast %203 : vector<1x128xf32> to vector<4x128xf32>
    %226 = arith.addf %224, %225 : vector<4x128xf32>
    %c0_221 = arith.constant 0 : index
    %c1_222 = arith.constant 1 : index
    %c0_223 = arith.constant 0 : index
    %c0_224 = arith.constant 0 : index
    %227 = vector.load %arg10[%c0_221, %c1_222, %c0_223, %c0_224] : memref<1x4x4x128xf32, #tpu.memory_space<vmem>>, vector<1x1x4x128xf32>
    %228 = vector.shape_cast %227 : vector<1x1x4x128xf32> to vector<4x128xf32>
    %229 = vector.shape_cast %226 : vector<4x128xf32> to vector<1x1x4x128xf32>
    tpu.vector_store %arg10[%c0_221, %c1_222, %c0_223, %c0_224], %229 {strides = array<i32>} : memref<1x4x4x128xf32, #tpu.memory_space<vmem>>, vector<1x1x4x128xf32>,
    %230 = vector.extract_strided_slice %199 {offsets = [2, 0, 0], sizes = [1, 4, 32], strides = [1, 1, 1]} : vector<4x4x32xf32> to vector<1x4x32xf32>
    %231 = vector.shape_cast %230 : vector<1x4x32xf32> to vector<4x32xf32>
    %cst_225 = arith.constant dense<0.000000e+00> : vector<4x512xf32>
    %232 = tpu.matmul %231, %200, %cst_225 {dimension_numbers = #tpu.dot_dimension_numbers<[1], [0], [0], [1], [0, 0, 1, 1], [], []>} : vector<4x32xf32>, vector<32x512xf32>, vector<4x512xf32> -> vector<4x512xf32>
    %233 = vector.broadcast %201 : vector<1x512xf32> to vector<4x512xf32>
    %234 = arith.addf %232, %233 : vector<4x512xf32>
    %cst_226 = arith.constant 0.000000e+00 : f32
    %235 = vector.broadcast %cst_226 : f32 to vector<4x512xf32>
    %236 = arith.maximumf %234, %235 : vector<4x512xf32>
    %cst_227 = arith.constant dense<0.000000e+00> : vector<4x128xf32>
    %237 = tpu.matmul %236, %202, %cst_227 {dimension_numbers = #tpu.dot_dimension_numbers<[1], [0], [0], [1], [0, 0, 1, 1], [], []>} : vector<4x512xf32>, vector<512x128xf32>, vector<4x128xf32> -> vector<4x128xf32>
    %238 = vector.broadcast %203 : vector<1x128xf32> to vector<4x128xf32>
    %239 = arith.addf %237, %238 : vector<4x128xf32>
    %c0_228 = arith.constant 0 : index
    %c2_229 = arith.constant 2 : index
    %c0_230 = arith.constant 0 : index
    %c0_231 = arith.constant 0 : index
    %240 = vector.load %arg10[%c0_228, %c2_229, %c0_230, %c0_231] : memref<1x4x4x128xf32, #tpu.memory_space<vmem>>, vector<1x1x4x128xf32>
    %241 = vector.shape_cast %240 : vector<1x1x4x128xf32> to vector<4x128xf32>
    %242 = vector.shape_cast %239 : vector<4x128xf32> to vector<1x1x4x128xf32>
    tpu.vector_store %arg10[%c0_228, %c2_229, %c0_230, %c0_231], %242 {strides = array<i32>} : memref<1x4x4x128xf32, #tpu.memory_space<vmem>>, vector<1x1x4x128xf32>,
    %243 = vector.extract_strided_slice %199 {offsets = [3, 0, 0], sizes = [1, 4, 32], strides = [1, 1, 1]} : vector<4x4x32xf32> to vector<1x4x32xf32>
    %244 = vector.shape_cast %243 : vector<1x4x32xf32> to vector<4x32xf32>
    %cst_232 = arith.constant dense<0.000000e+00> : vector<4x512xf32>
    %245 = tpu.matmul %244, %200, %cst_232 {dimension_numbers = #tpu.dot_dimension_numbers<[1], [0], [0], [1], [0, 0, 1, 1], [], []>} : vector<4x32xf32>, vector<32x512xf32>, vector<4x512xf32> -> vector<4x512xf32>
    %246 = vector.broadcast %201 : vector<1x512xf32> to vector<4x512xf32>
    %247 = arith.addf %245, %246 : vector<4x512xf32>
    %cst_233 = arith.constant 0.000000e+00 : f32
    %248 = vector.broadcast %cst_233 : f32 to vector<4x512xf32>
    %249 = arith.maximumf %247, %248 : vector<4x512xf32>
    %cst_234 = arith.constant dense<0.000000e+00> : vector<4x128xf32>
    %250 = tpu.matmul %249, %202, %cst_234 {dimension_numbers = #tpu.dot_dimension_numbers<[1], [0], [0], [1], [0, 0, 1, 1], [], []>} : vector<4x512xf32>, vector<512x128xf32>, vector<4x128xf32> -> vector<4x128xf32>
    %251 = vector.broadcast %203 : vector<1x128xf32> to vector<4x128xf32>
    %252 = arith.addf %250, %251 : vector<4x128xf32>
    %c0_235 = arith.constant 0 : index
    %c3_236 = arith.constant 3 : index
    %c0_237 = arith.constant 0 : index
    %c0_238 = arith.constant 0 : index
    %253 = vector.load %arg10[%c0_235, %c3_236, %c0_237, %c0_238] : memref<1x4x4x128xf32, #tpu.memory_space<vmem>>, vector<1x1x4x128xf32>
    %254 = vector.shape_cast %253 : vector<1x1x4x128xf32> to vector<4x128xf32>
    %255 = vector.shape_cast %252 : vector<4x128xf32> to vector<1x1x4x128xf32>
    tpu.vector_store %arg10[%c0_235, %c3_236, %c0_237, %c0_238], %255 {strides = array<i32>} : memref<1x4x4x128xf32, #tpu.memory_space<vmem>>, vector<1x1x4x128xf32>,
    return
  }
  func.func @transform_0(%arg0: i32) -> (i32, i32, i32, i32) {
    %c0_i32 = arith.constant 0 : i32
    %c0_i32_0 = arith.constant 0 : i32
    %c0_i32_1 = arith.constant 0 : i32
    %c0_i32_2 = arith.constant 0 : i32
    return %arg0, %c0_i32, %c0_i32_0, %c0_i32_1 : i32, i32, i32, i32
  }
  func.func @transform_1(%arg0: i32) -> (i32, i32, i32) {
    %c0_i32 = arith.constant 0 : i32
    %c0_i32_0 = arith.constant 0 : i32
    %c0_i32_1 = arith.constant 0 : i32
    %c0_i32_2 = arith.constant 0 : i32
    return %c0_i32, %c0_i32_0, %c0_i32_1 : i32, i32, i32
  }
  func.func @transform_2(%arg0: i32) -> (i32, i32) {
    %c0_i32 = arith.constant 0 : i32
    %c0_i32_0 = arith.constant 0 : i32
    %c0_i32_1 = arith.constant 0 : i32
    return %c0_i32, %c0_i32_0 : i32, i32
  }
  func.func @transform_3(%arg0: i32) -> (i32, i32, i32) {
    %c0_i32 = arith.constant 0 : i32
    %c0_i32_0 = arith.constant 0 : i32
    %c0_i32_1 = arith.constant 0 : i32
    %c0_i32_2 = arith.constant 0 : i32
    return %c0_i32, %c0_i32_0, %c0_i32_1 : i32, i32, i32
  }
  func.func @transform_4(%arg0: i32) -> (i32, i32) {
    %c0_i32 = arith.constant 0 : i32
    %c0_i32_0 = arith.constant 0 : i32
    %c0_i32_1 = arith.constant 0 : i32
    return %c0_i32, %c0_i32_0 : i32, i32
  }
  func.func @transform_5(%arg0: i32) -> (i32, i32) {
    %c0_i32 = arith.constant 0 : i32
    %c0_i32_0 = arith.constant 0 : i32
    %c0_i32_1 = arith.constant 0 : i32
    return %c0_i32, %c0_i32_0 : i32, i32
  }
  func.func @transform_6(%arg0: i32) -> (i32, i32) {
    %c0_i32 = arith.constant 0 : i32
    %c0_i32_0 = arith.constant 0 : i32
    %c0_i32_1 = arith.constant 0 : i32
    return %c0_i32, %c0_i32_0 : i32, i32
  }
  func.func @transform_7(%arg0: i32) -> (i32, i32) {
    %c0_i32 = arith.constant 0 : i32
    %c0_i32_0 = arith.constant 0 : i32
    %c0_i32_1 = arith.constant 0 : i32
    return %c0_i32, %c0_i32_0 : i32, i32
  }
  func.func @transform_8(%arg0: i32) -> (i32, i32) {
    %c0_i32 = arith.constant 0 : i32
    %c0_i32_0 = arith.constant 0 : i32
    %c0_i32_1 = arith.constant 0 : i32
    return %c0_i32, %c0_i32_0 : i32, i32
  }
  func.func @transform_9(%arg0: i32) -> (i32, i32, i32, i32) {
    %c0_i32 = arith.constant 0 : i32
    %c0_i32_0 = arith.constant 0 : i32
    %c0_i32_1 = arith.constant 0 : i32
    %c0_i32_2 = arith.constant 0 : i32
    return %arg0, %c0_i32, %c0_i32_0, %c0_i32_1 : i32, i32, i32, i32
  }
}

</mosaic_0001>

<bundles_post_ra>
// kernel: tile.28
= control target key start
LH: loop header
LB: loop body
LE: loop exit
PB: predicated region body
PF: predicated region fallthrough
CT: control target
= control target key end

     0   :  { %s40_s0 = inlined_call_operand.vmem [shape: f32[16], index: 0, kind: input, shape index: {}]   ;;  %s41_s1 = inlined_call_operand.vmem [shape: f32[32,16], index: 1, kind: output, shape index: {}]  }
   0x1   :  { %v4_v0 = vld [vmem:[%s40_s0] ss:$0 sm:$0xff] }
   0x2   :  { %5 = vst [vmem:[%s41_s1] sm:$0xff] %v4_v0  ;;  %12 = vst [vmem:[%s41_s1 + $0x8] sm:$0xff] %v4_v0 }
   0x3   :  { %13 = vst [vmem:[%s41_s1 + $0x10] sm:$0xff] %v4_v0  ;;  %14 = vst [vmem:[%s41_s1 + $0x18] sm:$0xff] %v4_v0 }

// kernel: tile.29
= control target key start
LH: loop header
LB: loop body
LE: loop exit
PB: predicated region body
PF: predicated region fallthrough
CT: control target
= control target key end

     0   :  { %s89_s8 = smov 112   ;;  %s90_s11 = smov 80   ;;  %vm3_vm0 = vcmask 130048   ;;  %vm9_vm1 = vcmask 1048448   ;;  %vm15_vm2 = vcmask 917248   ;;  %vm21_vm3 = vcmask 786048   ;;  %s142_s0 = inlined_call_operand.vmem [shape: f32[32,16], index: 0, kind: input, shape index: {}]   ;;  %s143_s1 = inlined_call_operand.vmem [shape: f32[1,512], index: 1, kind: output, shape index: {}]  }
   0x1   :  { %v72_v0 = vld [vmem:[%s142_s0 + $0x7] ss:$8 sm:$0xf]   ;;  %v74_v1 = vld [vmem:[%s142_s0 + $0x5] ss:$8 sm:$0xf]  }
   0x2   :  { %7 = vrot.lane.b32.xlu0 %v72_v0, %s89_s8  ;;  %19 = vrot.lane.b32.xlu1 %v74_v1, %s90_s11  ;;  %v73_v2 = vld [vmem:[%s142_s0 + $0x6] ss:$8 sm:$0xf]   ;;  %v75_v3 = vld [vmem:[%s142_s0 + $0x4] ss:$8 sm:$0xf]  }
   0x3   :  { %s91_s16 = smov 96   ;;  %v2_v4 = vld [vmem:[%s142_s0] ss:$8 sm:$0xf]   ;;  %s92_s19 = smov 64   ;;  %vm27_vm4 = vcmask 654848  }
   0x4   :  { %v76_v5 = vld [vmem:[%s142_s0 + $0x3] ss:$8 sm:$0xf]   ;;  %4 = vst.msk [vmem:[#allocation0] ss:$8 sm:$0xf] %vm3_vm0, %v2_v4  }
   0x5   :  { %v77_v6 = vld [vmem:[%s142_s0 + $0x2] ss:$8 sm:$0xf]   ;;  %s93_s24 = smov 48   ;;  %s94_s25 = smov 32   ;;  %vm33_vm5 = vcmask 523648  }
   0x6   :  { %13 = vrot.lane.b32.xlu0 %v73_v2, %s91_s16  ;;  %25 = vrot.lane.b32.xlu1 %v75_v3, %s92_s19  ;;  %v78_v7 = vld [vmem:[%s142_s0 + $0x1] ss:$8 sm:$0xf]   ;;  %s95_s0 = smov 16   ;;  %vm39_vm6 = vcmask 392448   ;;  %vm45_vm7 = vcmask 261248  }
   0xa   :  { %31 = vrot.lane.b32.xlu0 %v76_v5, %s93_s24  ;;  %37 = vrot.lane.b32.xlu1 %v77_v6, %s94_s25 }
   0xe   :  { %43 = vrot.lane.b32.xlu0 %v78_v7, %s95_s0 }
  0x74   :  { %v8_v8 = vpop.permute.xlu0 %7   ;;  %v20_v9 = vpop.permute.xlu1 %19  }
  0x75   :  { %10 = vst.msk [vmem:[#allocation0] ss:$8 sm:$0xf] %vm9_vm1, %v8_v8  }
  0x78   :  { %v14_v10 = vpop.permute.xlu0 %13   ;;  %v26_v11 = vpop.permute.xlu1 %25  }
  0x79   :  { %16 = vst.msk [vmem:[#allocation0] ss:$8 sm:$0xf] %vm15_vm2, %v14_v10  }
  0x7a   :  { %22 = vst.msk [vmem:[#allocation0] ss:$8 sm:$0xf] %vm21_vm3, %v20_v9  }
  0x7b   :  { %28 = vst.msk [vmem:[#allocation0] ss:$8 sm:$0xf] %vm27_vm4, %v26_v11  }
  0x7c   :  { %v32_v12 = vpop.permute.xlu0 %31   ;;  %v38_v13 = vpop.permute.xlu1 %37  }
  0x7d   :  { %34 = vst.msk [vmem:[#allocation0] ss:$8 sm:$0xf] %vm33_vm5, %v32_v12  }
  0x7e   :  { %40 = vst.msk [vmem:[#allocation0] ss:$8 sm:$0xf] %vm39_vm6, %v38_v13  }
  0x80   :  { %v44_v14 = vpop.permute.xlu0 %43  }
  0x81   :  { %46 = vst.msk [vmem:[#allocation0] ss:$8 sm:$0xf] %vm45_vm7, %v44_v14  }
  0x88   :  { %v50_v15 = vld [vmem:[#allocation0] sm:$0x1]  ;;  %v54_v16 = vld [vmem:[#allocation0 + $0x8] sm:$0x1]  ;;  %v59_v17 = vld [vmem:[#allocation0 + $0x10] sm:$0x1] }
  0x89   :  { %52 = vst [vmem:[%s143_s1] sm:$0x1] %v50_v15  ;;  %79 = vst [vmem:[%s143_s1 + $0x1] sm:$0x1] %v54_v16  ;;  %v65_v18 = vld [vmem:[#allocation0 + $0x18] sm:$0x1] }
  0x8a   :  { %80 = vst [vmem:[%s143_s1 + $0x2] sm:$0x1] %v59_v17  ;;  %81 = vst [vmem:[%s143_s1 + $0x3] sm:$0x1] %v65_v18 }

// kernel: tile.18
= control target key start
LH: loop header
LB: loop body
LE: loop exit
PB: predicated region body
PF: predicated region fallthrough
CT: control target
= control target key end

     0   :  { %s22_s0 = inlined_call_operand.vmem [shape: f32[16], index: 0, kind: input, shape index: {}]   ;;  %s23_s1 = inlined_call_operand.vmem [shape: f32[8,16], index: 1, kind: output, shape index: {}]  }
   0x1   :  { %v4_v0 = vld [vmem:[%s22_s0] ss:$0 sm:$0xff] }
   0x2   :  { %5 = vst [vmem:[%s23_s1] sm:$0xff] %v4_v0 }

// kernel: tile.19
= control target key start
LH: loop header
LB: loop body
LE: loop exit
PB: predicated region body
PF: predicated region fallthrough
CT: control target
= control target key end

     0   :  { %s67_s10 = smov 112   ;;  %s68_s11 = smov 80   ;;  %vm3_vm0 = vcmask 130048   ;;  %vm9_vm1 = vcmask 1048448   ;;  %vm15_vm2 = vcmask 917248   ;;  %vm21_vm3 = vcmask 786048   ;;  %s111_s0 = inlined_call_operand.vmem [shape: f32[8,16], index: 0, kind: input, shape index: {}]   ;;  %s112_s1 = inlined_call_operand.vmem [shape: f32[1,128], index: 1, kind: output, shape index: {}]  }
   0x1   :  { %v53_v0 = vld [vmem:[%s111_s0 + $0x7] sm:$0x1]   ;;  %v55_v1 = vld [vmem:[%s111_s0 + $0x5] sm:$0x1]   ;;  %v54_v2 = vld [vmem:[%s111_s0 + $0x6] sm:$0x1]  }
   0x2   :  { %7 = vrot.lane.b32.xlu0 %v53_v0, %s67_s10  ;;  %19 = vrot.lane.b32.xlu1 %v55_v1, %s68_s11  ;;  %v56_v3 = vld [vmem:[%s111_s0 + $0x4] sm:$0x1]   ;;  %v2_v4 = vld [vmem:[%s111_s0] sm:$0x1]   ;;  %s69_s18 = smov 96   ;;  %s70_s19 = smov 64  }
   0x3   :  { %4 = vst.msk [vmem:[#allocation0] sm:$0x1] %vm3_vm0, %v2_v4   ;;  %v57_v5 = vld [vmem:[%s111_s0 + $0x3] sm:$0x1]   ;;  %v58_v6 = vld [vmem:[%s111_s0 + $0x2] sm:$0x1]  }
   0x4   :  { %s71_s24 = smov 48   ;;  %s72_s25 = smov 32   ;;  %v59_v7 = vld [vmem:[%s111_s0 + $0x1] sm:$0x1]   ;;  %vm27_vm4 = vcmask 654848   ;;  %vm33_vm5 = vcmask 523648  }
   0x5   :  { %s73_s0 = smov 16   ;;  %vm39_vm6 = vcmask 392448   ;;  %vm45_vm7 = vcmask 261248  }
   0x6   :  { %13 = vrot.lane.b32.xlu0 %v54_v2, %s69_s18  ;;  %25 = vrot.lane.b32.xlu1 %v56_v3, %s70_s19 }
   0xa   :  { %31 = vrot.lane.b32.xlu0 %v57_v5, %s71_s24  ;;  %37 = vrot.lane.b32.xlu1 %v58_v6, %s72_s25 }
   0xe   :  { %43 = vrot.lane.b32.xlu0 %v59_v7, %s73_s0 }
  0x74   :  { %v8_v8 = vpop.permute.xlu0 %7   ;;  %v20_v9 = vpop.permute.xlu1 %19  }
  0x75   :  { %10 = vst.msk [vmem:[#allocation0] sm:$0x1] %vm9_vm1, %v8_v8  }
  0x78   :  { %v14_v10 = vpop.permute.xlu0 %13   ;;  %v26_v11 = vpop.permute.xlu1 %25  }
  0x79   :  { %16 = vst.msk [vmem:[#allocation0] sm:$0x1] %vm15_vm2, %v14_v10  }
  0x7a   :  { %22 = vst.msk [vmem:[#allocation0] sm:$0x1] %vm21_vm3, %v20_v9  }
  0x7b   :  { %28 = vst.msk [vmem:[#allocation0] sm:$0x1] %vm27_vm4, %v26_v11  }
  0x7c   :  { %v32_v12 = vpop.permute.xlu0 %31   ;;  %v38_v13 = vpop.permute.xlu1 %37  }
  0x7d   :  { %34 = vst.msk [vmem:[#allocation0] sm:$0x1] %vm33_vm5, %v32_v12  }
  0x7e   :  { %40 = vst.msk [vmem:[#allocation0] sm:$0x1] %vm39_vm6, %v38_v13  }
  0x80   :  { %v44_v14 = vpop.permute.xlu0 %43  }
  0x81   :  { %46 = vst.msk [vmem:[#allocation0] sm:$0x1] %vm45_vm7, %v44_v14  }
  0x88   :  { %v50_v15 = vld [vmem:[#allocation0] sm:$0x1] }
  0x89   :  { %52 = vst [vmem:[%s112_s1] sm:$0x1] %v50_v15 }

// kernel: tile.23
= control target key start
LH: loop header
LB: loop body
LE: loop exit
PB: predicated region body
PF: predicated region fallthrough
CT: control target
= control target key end

     0   :  { %s22_s0 = inlined_call_operand.vmem [shape: f32[4], index: 0, kind: input, shape index: {}]   ;;  %s23_s1 = inlined_call_operand.vmem [shape: f32[8,4], index: 1, kind: output, shape index: {}]  }
   0x1   :  { %v4_v0 = vld [vmem:[%s22_s0] ss:$0 sm:$0xff] }
   0x2   :  { %5 = vst [vmem:[%s23_s1] sm:$0xff] %v4_v0 }

// kernel: tile.24
= control target key start
LH: loop header
LB: loop body
LE: loop exit
PB: predicated region body
PF: predicated region fallthrough
CT: control target
= control target key end

     0   :  { %s67_s10 = smov 28   ;;  %s68_s11 = smov 20   ;;  %vm3_vm0 = vcmask 31744   ;;  %vm9_vm1 = vcmask 261344   ;;  %vm15_vm2 = vcmask 228544   ;;  %vm21_vm3 = vcmask 195744   ;;  %s111_s0 = inlined_call_operand.vmem [shape: f32[8,4], index: 0, kind: input, shape index: {}]   ;;  %s112_s1 = inlined_call_operand.vmem [shape: f32[1,32], index: 1, kind: output, shape index: {}]  }
   0x1   :  { %v53_v0 = vld [vmem:[%s111_s0 + $0x7] sm:$0x1]   ;;  %v55_v1 = vld [vmem:[%s111_s0 + $0x5] sm:$0x1]   ;;  %v54_v2 = vld [vmem:[%s111_s0 + $0x6] sm:$0x1]  }
   0x2   :  { %7 = vrot.lane.b32.xlu0 %v53_v0, %s67_s10  ;;  %19 = vrot.lane.b32.xlu1 %v55_v1, %s68_s11  ;;  %v56_v3 = vld [vmem:[%s111_s0 + $0x4] sm:$0x1]   ;;  %v2_v4 = vld [vmem:[%s111_s0] sm:$0x1]   ;;  %s69_s18 = smov 24   ;;  %s70_s19 = smov 16  }
   0x3   :  { %4 = vst.msk [vmem:[#allocation0] sm:$0x1] %vm3_vm0, %v2_v4   ;;  %v57_v5 = vld [vmem:[%s111_s0 + $0x3] sm:$0x1]   ;;  %v58_v6 = vld [vmem:[%s111_s0 + $0x2] sm:$0x1]  }
   0x4   :  { %s71_s24 = smov 12   ;;  %s72_s25 = smov 8   ;;  %v59_v7 = vld [vmem:[%s111_s0 + $0x1] sm:$0x1]   ;;  %vm27_vm4 = vcmask 162944   ;;  %vm33_vm5 = vcmask 130144  }
   0x5   :  { %s73_s0 = smov 4   ;;  %vm39_vm6 = vcmask 97344   ;;  %vm45_vm7 = vcmask 64544  }
   0x6   :  { %13 = vrot.lane.b32.xlu0 %v54_v2, %s69_s18  ;;  %25 = vrot.lane.b32.xlu1 %v56_v3, %s70_s19 }
   0xa   :  { %31 = vrot.lane.b32.xlu0 %v57_v5, %s71_s24  ;;  %37 = vrot.lane.b32.xlu1 %v58_v6, %s72_s25 }
   0xe   :  { %43 = vrot.lane.b32.xlu0 %v59_v7, %s73_s0 }
  0x74   :  { %v8_v8 = vpop.permute.xlu0 %7   ;;  %v20_v9 = vpop.permute.xlu1 %19  }
  0x75   :  { %10 = vst.msk [vmem:[#allocation0] sm:$0x1] %vm9_vm1, %v8_v8  }
  0x78   :  { %v14_v10 = vpop.permute.xlu0 %13   ;;  %v26_v11 = vpop.permute.xlu1 %25  }
  0x79   :  { %16 = vst.msk [vmem:[#allocation0] sm:$0x1] %vm15_vm2, %v14_v10  }
  0x7a   :  { %22 = vst.msk [vmem:[#allocation0] sm:$0x1] %vm21_vm3, %v20_v9  }
  0x7b   :  { %28 = vst.msk [vmem:[#allocation0] sm:$0x1] %vm27_vm4, %v26_v11  }
  0x7c   :  { %v32_v12 = vpop.permute.xlu0 %31   ;;  %v38_v13 = vpop.permute.xlu1 %37  }
  0x7d   :  { %34 = vst.msk [vmem:[#allocation0] sm:$0x1] %vm33_vm5, %v32_v12  }
  0x7e   :  { %40 = vst.msk [vmem:[#allocation0] sm:$0x1] %vm39_vm6, %v38_v13  }
  0x80   :  { %v44_v14 = vpop.permute.xlu0 %43  }
  0x81   :  { %46 = vst.msk [vmem:[#allocation0] sm:$0x1] %vm45_vm7, %v44_v14  }
  0x88   :  { %v50_v15 = vld [vmem:[#allocation0] sm:$0x1] }
  0x89   :  { %52 = vst [vmem:[%s112_s1] sm:$0x1] %v50_v15 }

// kernel: conv_autoencoder_forward.1
= control target key start
LH: loop header
LB: loop body
LE: loop exit
PB: predicated region body
PF: predicated region fallthrough
CT: control target
= control target key end

     0   :  { %vm32_vm0 = vcmask 64512   ;;  %v14403_v2 = vmov 0.0   ;;  %vm6528_vm1 = vcmask 261120   ;;  %s14393_s1 = inlined_call_operand.vmem [shape: f32[9,8,128], index: 1, kind: input, shape index: {}]   ;;  %s14394_s0 = inlined_call_operand.vmem [shape: f32[1,16,16,8], index: 0, kind: input, shape index: {}]   ;;  %s14395_s3 = inlined_call_operand.vmem [shape: f32[9,128,32], index: 3, kind: input, shape index: {}]   ;;  %s14396_s2 = inlined_call_operand.vmem [shape: f32[1,128], index: 2, kind: input, shape index: {}]   ;;  %s14397_s5 = inlined_call_operand.vmem [shape: f32[32,512], index: 5, kind: input, shape index: {}]   ;;  %s14398_s4 = inlined_call_operand.vmem [shape: f32[1,32], index: 4, kind: input, shape index: {}]   ;;  %s14399_s7 = inlined_call_operand.vmem [shape: f32[512,128], index: 7, kind: input, shape index: {}]   ;;  %s14400_s6 = inlined_call_operand.vmem [shape: f32[1,512], index: 6, kind: input, shape index: {}]   ;;  %s14401_s8 = inlined_call_operand.vmem [shape: f32[1,128], index: 8, kind: input, shape index: {}]   ;;  %s14402_s9 = inlined_call_operand.vmem [shape: f32[1,4,4,128], index: 9, kind: output, shape index: {}]  }
   0x1   :  { %v11415_v0 = vld [vmem:[%s14393_s1] sm:$0xff]  ;;  %v11420_v1 = vld [vmem:[%s14393_s1 + $0x8] sm:$0xff]  ;;  %36 = vst.msk [vmem:[#allocation2 + $0x18] sm:$0xff] %vm32_vm0, %v14403_v2  ;;  %35 = vst.msk [vmem:[#allocation2 + $0x10] sm:$0xff] %vm32_vm0, %v14403_v2 }
   0x2   :  { %37 = vst.msk [vmem:[#allocation2 + $0x20] sm:$0xff] %vm32_vm0, %v14403_v2  ;;  %38 = vst.msk [vmem:[#allocation2 + $0x28] sm:$0xff] %vm32_vm0, %v14403_v2  ;;  %v7955_v3 = vld [vmem:[%s14393_s1 + $0x10] sm:$0xff]  ;;  %9523 = vmatprep.subr.mxu0 %v11415_v0  ;;  %9449 = vmatprep.subr.mxu1 %v11420_v1  ;;  %v93_v4 = vld [vmem:[%s14394_s0] sm:$0xff] }
   0x3   :  { %39 = vst.msk [vmem:[#allocation2 + $0x30] sm:$0xff] %vm32_vm0, %v14403_v2  ;;  %40 = vst.msk [vmem:[#allocation2 + $0x38] sm:$0xff] %vm32_vm0, %v14403_v2  ;;  %v94_v5 = vld [vmem:[%s14394_s0 + $0x8] sm:$0xff]  ;;  %v7828_v6 = vld [vmem:[%s14394_s0 + $0x10] sm:$0xff]  ;;  %9524 = vmatpush3.msra.mxu0 %v11415_v0  ;;  %9450 = vmatpush3.msra.mxu1 %v11420_v1 }
   0x4   :  { %41 = vst.msk [vmem:[#allocation2 + $0x40] sm:$0xff] %vm32_vm0, %v14403_v2  ;;  %42 = vst.msk [vmem:[#allocation2 + $0x48] sm:$0xff] %vm32_vm0, %v14403_v2  ;;  %v7829_v7 = vld [vmem:[%s14394_s0 + $0x18] sm:$0xff]  ;;  %v7830_v8 = vld [vmem:[%s14394_s0 + $0x20] sm:$0xff]  ;;  %9597 = vmatprep.subr.mxu0 %v7955_v3  ;;  %11227 = vmatprep.subr.mxu1 %v11415_v0 }
   0x5   :  { %43 = vst.msk [vmem:[#allocation2 + $0x50] sm:$0xff] %vm32_vm0, %v14403_v2  ;;  %44 = vst.msk [vmem:[#allocation2 + $0x58] sm:$0xff] %vm32_vm0, %v14403_v2  ;;  %v7831_v9 = vld [vmem:[%s14394_s0 + $0x28] sm:$0xff]  ;;  %v7832_v10 = vld [vmem:[%s14394_s0 + $0x30] sm:$0xff] }
   0x6   :  { %45 = vst.msk [vmem:[#allocation2 + $0x60] sm:$0xff] %vm32_vm0, %v14403_v2  ;;  %46 = vst.msk [vmem:[#allocation2 + $0x68] sm:$0xff] %vm32_vm0, %v14403_v2  ;;  %v7833_v11 = vld [vmem:[%s14394_s0 + $0x38] sm:$0xff]  ;;  %v7834_v12 = vld [vmem:[%s14394_s0 + $0x40] sm:$0xff] }
   0x7   :  { %47 = vst.msk [vmem:[#allocation2 + $0x70] sm:$0xff] %vm32_vm0, %v14403_v2  ;;  %48 = vst.msk [vmem:[#allocation2 + $0x78] sm:$0xff] %vm32_vm0, %v14403_v2  ;;  %v7835_v13 = vld [vmem:[%s14394_s0 + $0x48] sm:$0xff]  ;;  %v7836_v14 = vld [vmem:[%s14394_s0 + $0x50] sm:$0xff] }
   0x8   :  { %49 = vst.msk [vmem:[#allocation2 + $0x80] sm:$0xff] %vm32_vm0, %v14403_v2  ;;  %50 = vst.msk [vmem:[#allocation2 + $0x88] sm:$0xff] %vm32_vm0, %v14403_v2  ;;  %v7837_v15 = vld [vmem:[%s14394_s0 + $0x58] sm:$0xff]  ;;  %v7838_v16 = vld [vmem:[%s14394_s0 + $0x60] sm:$0xff] }
   0x9   :  { %51 = vst.msk [vmem:[#allocation2 + $0x90] sm:$0xff] %vm32_vm0, %v14403_v2  ;;  %52 = vst.msk [vmem:[#allocation2 + $0x98] sm:$0xff] %vm32_vm0, %v14403_v2  ;;  %v7839_v17 = vld [vmem:[%s14394_s0 + $0x68] sm:$0xff]  ;;  %v7840_v18 = vld [vmem:[%s14394_s0 + $0x70] sm:$0xff] }
   0xa   :  { %53 = vst.msk [vmem:[#allocation2 + $0xa0] sm:$0xff] %vm32_vm0, %v14403_v2  ;;  %54 = vst.msk [vmem:[#allocation2 + $0xa8] sm:$0xff] %vm32_vm0, %v14403_v2  ;;  %v7841_v19 = vld [vmem:[%s14394_s0 + $0x78] sm:$0xff]  ;;  %v7842_v20 = vld [vmem:[%s14394_s0 + $0x80] sm:$0xff] }
   0xb   :  { %55 = vst.msk [vmem:[#allocation2 + $0xb0] sm:$0xff] %vm32_vm0, %v14403_v2  ;;  %56 = vst.msk [vmem:[#allocation2 + $0xb8] sm:$0xff] %vm32_vm0, %v14403_v2  ;;  %v7843_v21 = vld [vmem:[%s14394_s0 + $0x88] sm:$0xff]  ;;  %v221_v22 = vld [vmem:[#allocation2 + $0x18] sm:$0xff] }
   0xc   :  { %57 = vst.msk [vmem:[#allocation2 + $0xc0] sm:$0xff] %vm32_vm0, %v14403_v2  ;;  %58 = vst.msk [vmem:[#allocation2 + $0xc8] sm:$0xff] %vm32_vm0, %v14403_v2  ;;  %v172_v23 = vld [vmem:[#allocation2 + $0x17] sm:$0xff]  ;;  %v222_v24 = vld [vmem:[#allocation2 + $0x20] sm:$0xff]  ;;  %9451 = vmatprep.mubr.msk.f32.mxu1 %vm32_vm0, %v221_v22 }
   0xd   :  { %59 = vst.msk [vmem:[#allocation2 + $0xd0] sm:$0xff] %vm32_vm0, %v14403_v2  ;;  %60 = vst.msk [vmem:[#allocation2 + $0xd8] sm:$0xff] %vm32_vm0, %v14403_v2  ;;  %9525 = vmatprep.mubr.msk.f32.mxu0 %vm32_vm0, %v172_v23  ;;  %v173_v25 = vld [vmem:[#allocation2 + $0x1f] sm:$0xff]  ;;  %v223_v26 = vld [vmem:[#allocation2 + $0x28] sm:$0xff]  ;;  %9452 = vmatmul.mubr.msk.f32.vlgmr.msra.gmra.mrb[0].mxu1 %vm32_vm0, %v222_v24 }
   0xe   :  { %61 = vst.msk [vmem:[#allocation2 + $0xe0] sm:$0xff] %vm32_vm0, %v14403_v2  ;;  %62 = vst.msk [vmem:[#allocation2 + $0xe8] sm:$0xff] %vm32_vm0, %v14403_v2  ;;  %v174_v27 = vld [vmem:[#allocation2 + $0x27] sm:$0xff]  ;;  %9526 = vmatmul.mubr.msk.f32.vlgmr.msra.gmra.mrb[0].mxu0 %vm32_vm0, %v173_v25  ;;  %9454 = vmatprep.mubr.msk.f32.mxu1 %vm32_vm0, %v223_v26  ;;  %v11672_v38 = vld [vmem:[#allocation2 + $0x58] sm:$0xff] }
   0xf   :  { %63 = vst.msk [vmem:[#allocation2 + $0xf0] sm:$0xff] %vm32_vm0, %v14403_v2  ;;  %64 = vst.msk [vmem:[#allocation2 + $0xf8] sm:$0xff] %vm32_vm0, %v14403_v2  ;;  %9598 = vmatpush3.msra.mxu0 %v7955_v3  ;;  %9528 = vmatprep.mubr.msk.f32.mxu0 %vm32_vm0, %v174_v27  ;;  %v11652_v32 = vld [vmem:[#allocation2 + $0x40] sm:$0xff]  ;;  %v11700_v44 = vld [vmem:[#allocation2 + $0x70] sm:$0xff] }
  0x10   :  { %65 = vst.msk [vmem:[#allocation2 + $0x100] sm:$0xff] %vm32_vm0, %v14403_v2  ;;  %66 = vst.msk [vmem:[#allocation2 + $0x108] sm:$0xff] %vm32_vm0, %v14403_v2  ;;  %11228 = vmatpush3.msra.mxu1 %v11415_v0  ;;  %v7844_v48 = vld [vmem:[%s14394_s0 + $0x90] sm:$0xff]  ;;  %v7845_v49 = vld [vmem:[%s14394_s0 + $0x98] sm:$0xff] }
  0x11   :  { %67 = vst.msk [vmem:[#allocation2 + $0x110] sm:$0xff] %vm32_vm0, %v14403_v2  ;;  %68 = vst.msk [vmem:[#allocation2 + $0x118] sm:$0xff] %vm32_vm0, %v14403_v2  ;;  %v11719_v50 = vld [vmem:[%s14393_s1 + $0x18] sm:$0xff]  ;;  %v11733_v53 = vld [vmem:[#allocation2 + $0x88] sm:$0xff] }
  0x12   :  { %69 = vst.msk [vmem:[#allocation2 + $0x120] sm:$0xff] %vm32_vm0, %v14403_v2  ;;  %70 = vst.msk [vmem:[#allocation2 + $0x128] sm:$0xff] %vm32_vm0, %v14403_v2  ;;  %9671 = vmatprep.subr.mxu0 %v11719_v50  ;;  %v7846_v55 = vld [vmem:[%s14394_s0 + $0xa0] sm:$0xff]  ;;  %v7847_v58 = vld [vmem:[%s14394_s0 + $0xa8] sm:$0xff] }
  0x13   :  { %71 = vst.msk [vmem:[#allocation2 + $0x130] sm:$0xff] %vm32_vm0, %v14403_v2  ;;  %72 = vst.msk [vmem:[#allocation2 + $0x138] sm:$0xff] %vm32_vm0, %v14403_v2  ;;  %v7848_v61 = vld [vmem:[%s14394_s0 + $0xb0] sm:$0xff]  ;;  %v7849_v62 = vld [vmem:[%s14394_s0 + $0xb8] sm:$0xff] }
  0x14   :  { %73 = vst.msk [vmem:[#allocation2 + $0x140] sm:$0xff] %vm32_vm0, %v14403_v2  ;;  %74 = vst.msk [vmem:[#allocation2 + $0x148] sm:$0xff] %vm32_vm0, %v14403_v2  ;;  %v11776_v63 = vld [vmem:[#allocation2 + $0xa0] sm:$0xff] }
  0x15   :  { %75 = vst.msk [vmem:[#allocation2 + $0x150] sm:$0xff] %vm32_vm0, %v14403_v2  ;;  %76 = vst.msk [vmem:[#allocation2 + $0x158] sm:$0xff] %vm32_vm0, %v14403_v2  ;;  %v11870_v24 = vld [vmem:[#allocation2 + $0xe8] sm:$0xff] }
  0x16   :  { %77 = vst.msk [vmem:[#allocation2 + $0x160] sm:$0xff] %vm32_vm0, %v14403_v2  ;;  %78 = vst.msk [vmem:[#allocation2 + $0x168] sm:$0xff] %vm32_vm0, %v14403_v2 }
  0x17   :  { %79 = vst.msk [vmem:[#allocation2 + $0x170] sm:$0xff] %vm32_vm0, %v14403_v2  ;;  %80 = vst.msk [vmem:[#allocation2 + $0x178] sm:$0xff] %vm32_vm0, %v14403_v2 }
  0x18   :  { %81 = vst.msk [vmem:[#allocation2 + $0x180] sm:$0xff] %vm32_vm0, %v14403_v2  ;;  %82 = vst.msk [vmem:[#allocation2 + $0x188] sm:$0xff] %vm32_vm0, %v14403_v2 }
  0x19   :  { %83 = vst.msk [vmem:[#allocation2 + $0x190] sm:$0xff] %vm32_vm0, %v14403_v2  ;;  %84 = vst.msk [vmem:[#allocation2 + $0x198] sm:$0xff] %vm32_vm0, %v14403_v2 }
  0x1a   :  { %85 = vst.msk [vmem:[#allocation2 + $0x1a0] sm:$0xff] %vm32_vm0, %v14403_v2  ;;  %86 = vst.msk [vmem:[#allocation2 + $0x1a8] sm:$0xff] %vm32_vm0, %v14403_v2 }
  0x1b   :  { %87 = vst.msk [vmem:[#allocation2 + $0x1b0] sm:$0xff] %vm32_vm0, %v14403_v2  ;;  %88 = vst.msk [vmem:[#allocation2 + $0x1b8] sm:$0xff] %vm32_vm0, %v14403_v2 }
  0x1c   :  { %89 = vst.msk [vmem:[#allocation2 + $0x1c0] sm:$0xff] %vm32_vm0, %v14403_v2  ;;  %90 = vst.msk [vmem:[#allocation2 + $0x1c8] sm:$0xff] %vm32_vm0, %v14403_v2 }
  0x1d   :  { %4884 = vst [vmem:[#allocation3] sm:$0xff] %v14403_v2  ;;  %4885 = vst [vmem:[#allocation3 + $0x8] sm:$0xff] %v14403_v2 }
  0x1e   :  { %4886 = vst [vmem:[#allocation3 + $0x10] sm:$0xff] %v14403_v2  ;;  %4887 = vst [vmem:[#allocation3 + $0x18] sm:$0xff] %v14403_v2 }
  0x1f   :  { %4889 = vst [vmem:[#allocation3 + $0x28] sm:$0xff] %v14403_v2  ;;  %4891 = vst [vmem:[#allocation3 + $0x38] sm:$0xff] %v14403_v2 }
  0x20   :  { %4893 = vst [vmem:[#allocation3 + $0x48] sm:$0xff] %v14403_v2  ;;  %4895 = vst [vmem:[#allocation3 + $0x58] sm:$0xff] %v14403_v2 }
  0x21   :  { %4897 = vst [vmem:[#allocation3 + $0x68] sm:$0xff] %v14403_v2  ;;  %4899 = vst [vmem:[#allocation3 + $0x78] sm:$0xff] %v14403_v2 }
  0x22   :  { %4901 = vst [vmem:[#allocation3 + $0x88] sm:$0xff] %v14403_v2  ;;  %4903 = vst [vmem:[#allocation3 + $0x98] sm:$0xff] %v14403_v2 }
  0x23   :  { %4904 = vst [vmem:[#allocation3 + $0xa0] sm:$0xff] %v14403_v2  ;;  %4905 = vst [vmem:[#allocation3 + $0xa8] sm:$0xff] %v14403_v2 }
  0x24   :  { %4906 = vst [vmem:[#allocation3 + $0xb0] sm:$0xff] %v14403_v2  ;;  %95 = vst.msk [vmem:[#allocation2 + $0x30] sm:$0xff] %vm32_vm0, %v93_v4  ;;  %v7850_v4 = vld [vmem:[%s14394_s0 + $0xc0] sm:$0xff] }
  0x25   :  { %96 = vst.msk [vmem:[#allocation2 + $0x38] sm:$0xff] %vm32_vm0, %v94_v5  ;;  %100 = vst.msk [vmem:[#allocation2 + $0x48] sm:$0xff] %vm32_vm0, %v7828_v6  ;;  %v7851_v5 = vld [vmem:[%s14394_s0 + $0xc8] sm:$0xff]  ;;  %v7852_v6 = vld [vmem:[%s14394_s0 + $0xd0] sm:$0xff] }
  0x26   :  { %101 = vst.msk [vmem:[#allocation2 + $0x50] sm:$0xff] %vm32_vm0, %v7829_v7  ;;  %105 = vst.msk [vmem:[#allocation2 + $0x60] sm:$0xff] %vm32_vm0, %v7830_v8 }
  0x27   :  { %106 = vst.msk [vmem:[#allocation2 + $0x68] sm:$0xff] %vm32_vm0, %v7831_v9  ;;  %110 = vst.msk [vmem:[#allocation2 + $0x78] sm:$0xff] %vm32_vm0, %v7832_v10  ;;  %v7853_v9 = vld [vmem:[%s14394_s0 + $0xd8] sm:$0xff] }
  0x28   :  { %111 = vst.msk [vmem:[#allocation2 + $0x80] sm:$0xff] %vm32_vm0, %v7833_v11  ;;  %115 = vst.msk [vmem:[#allocation2 + $0x90] sm:$0xff] %vm32_vm0, %v7834_v12  ;;  %v11813_v10 = vld [vmem:[#allocation2 + $0xb8] sm:$0xff]  ;;  %v7854_v12 = vld [vmem:[%s14394_s0 + $0xe0] sm:$0xff] }
  0x29   :  { %116 = vst.msk [vmem:[#allocation2 + $0x98] sm:$0xff] %vm32_vm0, %v7835_v13  ;;  %120 = vst.msk [vmem:[#allocation2 + $0xa8] sm:$0xff] %vm32_vm0, %v7836_v14  ;;  %v7855_v13 = vld [vmem:[%s14394_s0 + $0xe8] sm:$0xff] }
  0x2a   :  { %121 = vst.msk [vmem:[#allocation2 + $0xb0] sm:$0xff] %vm32_vm0, %v7837_v15  ;;  %125 = vst.msk [vmem:[#allocation2 + $0xc0] sm:$0xff] %vm32_vm0, %v7838_v16 }
  0x2b   :  { %126 = vst.msk [vmem:[#allocation2 + $0xc8] sm:$0xff] %vm32_vm0, %v7839_v17  ;;  %130 = vst.msk [vmem:[#allocation2 + $0xd8] sm:$0xff] %vm32_vm0, %v7840_v18  ;;  %v11634_v28 = vld [vmem:[#allocation2 + $0x30] sm:$0xff] }
  0x2c   :  { %131 = vst.msk [vmem:[#allocation2 + $0xe0] sm:$0xff] %vm32_vm0, %v7841_v19  ;;  %135 = vst.msk [vmem:[#allocation2 + $0xf0] sm:$0xff] %vm32_vm0, %v7842_v20  ;;  %v11636_v29 = vld [vmem:[#allocation2 + $0x2f] sm:$0xff]  ;;  %v11639_v30 = vld [vmem:[#allocation2 + $0x38] sm:$0xff]  ;;  %9455 = vmatmul.mubr.msk.f32.gmra.mrb[2].mxu1 %vm32_vm0, %v11634_v28 }
  0x2d   :  { %136 = vst.msk [vmem:[#allocation2 + $0xf8] sm:$0xff] %vm32_vm0, %v7843_v21  ;;  %v11641_v31 = vld [vmem:[#allocation2 + $0x37] sm:$0xff]  ;;  %9529 = vmatmul.mubr.msk.f32.gmra.mrb[2].mxu0 %vm32_vm0, %v11636_v29  ;;  %9457 = vmatprep.mubr.msk.f32.mxu1 %vm32_vm0, %v11639_v30  ;;  %v11654_v33 = vld [vmem:[#allocation2 + $0x3f] sm:$0xff]  ;;  %v11656_v34 = vld [vmem:[#allocation2 + $0x48] sm:$0xff] }
  0x2e   :  { %9531 = vmatprep.mubr.msk.f32.mxu0 %vm32_vm0, %v11641_v31  ;;  %v11658_v35 = vld [vmem:[#allocation2 + $0x47] sm:$0xff]  ;;  %v11668_v36 = vld [vmem:[#allocation2 + $0x50] sm:$0xff]  ;;  %v11686_v41 = vld [vmem:[#allocation2 + $0x5f] sm:$0xff]  ;;  %140 = vst.msk [vmem:[#allocation2 + $0x108] sm:$0xff] %vm32_vm0, %v7844_v48 }
  0x2f   :  { %v11670_v37 = vld [vmem:[#allocation2 + $0x4f] sm:$0xff]  ;;  %v11674_v39 = vld [vmem:[#allocation2 + $0x57] sm:$0xff]  ;;  %v11684_v40 = vld [vmem:[#allocation2 + $0x60] sm:$0xff]  ;;  %141 = vst.msk [vmem:[#allocation2 + $0x110] sm:$0xff] %vm32_vm0, %v7845_v49 }
  0x30   :  { %9458 = vmatmul.mubr.msk.f32.gmra.mrb[4].mxu1 %vm32_vm0, %v11652_v32  ;;  %v11688_v42 = vld [vmem:[#allocation2 + $0x68] sm:$0xff]  ;;  %v11704_v46 = vld [vmem:[#allocation2 + $0x78] sm:$0xff]  ;;  %v11729_v51 = vld [vmem:[#allocation2 + $0x80] sm:$0xff]  ;;  %145 = vst.msk [vmem:[#allocation2 + $0x120] sm:$0xff] %vm32_vm0, %v7846_v55 }
  0x31   :  { %9532 = vmatmul.mubr.msk.f32.gmra.mrb[4].mxu0 %vm32_vm0, %v11654_v33  ;;  %9460 = vmatprep.mubr.msk.f32.mxu1 %vm32_vm0, %v11656_v34  ;;  %v11690_v43 = vld [vmem:[#allocation2 + $0x67] sm:$0xff]  ;;  %v11702_v45 = vld [vmem:[#allocation2 + $0x6f] sm:$0xff]  ;;  %v11706_v47 = vld [vmem:[#allocation2 + $0x77] sm:$0xff]  ;;  %146 = vst.msk [vmem:[#allocation2 + $0x128] sm:$0xff] %vm32_vm0, %v7847_v58 }
  0x32   :  { %9534 = vmatprep.mubr.msk.f32.mxu0 %vm32_vm0, %v11658_v35  ;;  %v11731_v52 = vld [vmem:[#allocation2 + $0x7f] sm:$0xff]  ;;  %v11735_v54 = vld [vmem:[#allocation2 + $0x87] sm:$0xff]  ;;  %v11749_v56 = vld [vmem:[#allocation2 + $0x90] sm:$0xff]  ;;  %14463 = vst [vmem:[#allocation8_spill] sm:$0xff] %v11776_v63 }
  0x33   :  { %14461 = vst [vmem:[#allocation6_spill] sm:$0xff] %v11749_v56  ;;  %v11751_v57 = vld [vmem:[#allocation2 + $0x8f] sm:$0xff]  ;;  %v11757_v59 = vld [vmem:[#allocation2 + $0x98] sm:$0xff]  ;;  %150 = vst.msk [vmem:[#allocation2 + $0x138] sm:$0xff] %vm32_vm0, %v7848_v61 }
  0x34   :  { %9461 = vmatmul.mubr.msk.f32.gmra.mrb[6].mxu1 %vm32_vm0, %v11668_v36  ;;  %14462 = vst [vmem:[#allocation7_spill] sm:$0xff] %v11757_v59  ;;  %v11759_v60 = vld [vmem:[#allocation2 + $0x97] sm:$0xff]  ;;  %v11778_v0 = vld [vmem:[#allocation2 + $0x9f] sm:$0xff]  ;;  %151 = vst.msk [vmem:[#allocation2 + $0x140] sm:$0xff] %vm32_vm0, %v7849_v62 }
  0x35   :  { %9535 = vmatmul.mubr.msk.f32.gmra.mrb[6].mxu0 %vm32_vm0, %v11670_v37  ;;  %9463 = vmatprep.mubr.msk.f32.mxu1 %vm32_vm0, %v11672_v38  ;;  %v11782_v1 = vld [vmem:[#allocation2 + $0xa8] sm:$0xff]  ;;  %155 = vst.msk [vmem:[#allocation2 + $0x150] sm:$0xff] %vm32_vm0, %v7850_v4  ;;  %156 = vst.msk [vmem:[#allocation2 + $0x158] sm:$0xff] %vm32_vm0, %v7851_v5  ;;  %v11805_v7 = vld [vmem:[#allocation2 + $0xb0] sm:$0xff] }
  0x36   :  { %9537 = vmatprep.mubr.msk.f32.mxu0 %vm32_vm0, %v11674_v39  ;;  %14464 = vst [vmem:[#allocation9_spill] sm:$0xff] %v11782_v1  ;;  %v11784_v3 = vld [vmem:[#allocation2 + $0xa7] sm:$0xff]  ;;  %14465 = vst [vmem:[#allocation10_spill] sm:$0xff] %v11805_v7  ;;  %v11807_v8 = vld [vmem:[#allocation2 + $0xaf] sm:$0xff] }
  0x37   :  { %160 = vst.msk [vmem:[#allocation2 + $0x168] sm:$0xff] %vm32_vm0, %v7852_v6  ;;  %14466 = vst [vmem:[#allocation11_spill] sm:$0xff] %v11813_v10  ;;  %v11815_v11 = vld [vmem:[#allocation2 + $0xb7] sm:$0xff]  ;;  %v11834_v14 = vld [vmem:[#allocation2 + $0xc0] sm:$0xff] }
  0x38   :  { %9464 = vmatmul.mubr.msk.f32.gmra.mrb[8].mxu1 %vm32_vm0, %v11684_v40  ;;  %161 = vst.msk [vmem:[#allocation2 + $0x170] sm:$0xff] %vm32_vm0, %v7853_v9  ;;  %165 = vst.msk [vmem:[#allocation2 + $0x180] sm:$0xff] %vm32_vm0, %v7854_v12  ;;  %v11836_v15 = vld [vmem:[#allocation2 + $0xbf] sm:$0xff]  ;;  %v11838_v16 = vld [vmem:[#allocation2 + $0xc8] sm:$0xff] }
  0x39   :  { %9538 = vmatmul.mubr.msk.f32.gmra.mrb[8].mxu0 %vm32_vm0, %v11686_v41  ;;  %9466 = vmatprep.mubr.msk.f32.mxu1 %vm32_vm0, %v11688_v42  ;;  %166 = vst.msk [vmem:[#allocation2 + $0x188] sm:$0xff] %vm32_vm0, %v7855_v13  ;;  %14467 = vst [vmem:[#allocation12_spill] sm:$0xff] %v11834_v14  ;;  %v11840_v17 = vld [vmem:[#allocation2 + $0xc7] sm:$0xff]  ;;  %v11850_v18 = vld [vmem:[#allocation2 + $0xd0] sm:$0xff] }
  0x3a   :  { %9540 = vmatprep.mubr.msk.f32.mxu0 %vm32_vm0, %v11690_v43  ;;  %14468 = vst [vmem:[#allocation13_spill] sm:$0xff] %v11838_v16  ;;  %14469 = vst [vmem:[#allocation14_spill] sm:$0xff] %v11850_v18  ;;  %v11852_v19 = vld [vmem:[#allocation2 + $0xcf] sm:$0xff]  ;;  %v11854_v20 = vld [vmem:[#allocation2 + $0xd8] sm:$0xff] }
  0x3b   :  { %14470 = vst [vmem:[#allocation15_spill] sm:$0xff] %v11854_v20  ;;  %v11856_v21 = vld [vmem:[#allocation2 + $0xd7] sm:$0xff]  ;;  %v11866_v22 = vld [vmem:[#allocation2 + $0xe0] sm:$0xff]  ;;  %14472 = vst [vmem:[#allocation17_spill] sm:$0xff] %v11870_v24 }
  0x3c   :  { %9467 = vmatmul.mubr.msk.f32.gmra.mrb[10].mxu1 %vm32_vm0, %v11700_v44  ;;  %14471 = vst [vmem:[#allocation16_spill] sm:$0xff] %v11866_v22  ;;  %v11868_v23 = vld [vmem:[#allocation2 + $0xdf] sm:$0xff]  ;;  %v11872_v25 = vld [vmem:[#allocation2 + $0xe7] sm:$0xff]  ;;  %v11882_v26 = vld [vmem:[#allocation2 + $0xf0] sm:$0xff] }
  0x3d   :  { %9541 = vmatmul.mubr.msk.f32.gmra.mrb[10].mxu0 %vm32_vm0, %v11702_v45  ;;  %9469 = vmatprep.mubr.msk.f32.mxu1 %vm32_vm0, %v11704_v46  ;;  %14473 = vst [vmem:[#allocation18_spill] sm:$0xff] %v11882_v26  ;;  %v11884_v27 = vld [vmem:[#allocation2 + $0xef] sm:$0xff]  ;;  %v11886_v48 = vld [vmem:[#allocation2 + $0xf8] sm:$0xff]  ;;  %v11902_v58 = vld [vmem:[#allocation2 + $0x100] sm:$0xff] }
  0x3e   :  { %9543 = vmatprep.mubr.msk.f32.mxu0 %vm32_vm0, %v11706_v47  ;;  %14474 = vst [vmem:[#allocation19_spill] sm:$0xff] %v11886_v48  ;;  %v11888_v49 = vld [vmem:[#allocation2 + $0xf7] sm:$0xff]  ;;  %14475 = vst [vmem:[#allocation20_spill] sm:$0xff] %v11902_v58  ;;  %v11904_v61 = vld [vmem:[#allocation2 + $0xff] sm:$0xff] }
  0x3f   :  { %v7856_v55 = vld [vmem:[%s14394_s0 + $0xf0] sm:$0xff]  ;;  %v11906_v62 = vld [vmem:[#allocation2 + $0x107] sm:$0xff]  ;;  %v1137_v9 = vld [vmem:[#allocation2 + $0x19] sm:$0xff] }
  0x40   :  { %9470 = vmatmul.mubr.msk.f32.gmra.mrb[12].mxu1 %vm32_vm0, %v11729_v51  ;;  %170 = vst.msk [vmem:[#allocation2 + $0x198] sm:$0xff] %vm32_vm0, %v7856_v55  ;;  %v11908_v4 = vld [vmem:[#allocation2 + $0x108] sm:$0xff]  ;;  %v11920_v6 = vld [vmem:[#allocation2 + $0x110] sm:$0xff]  ;;  %v11922_v12 = vld [vmem:[#allocation2 + $0x118] sm:$0xff] }
  0x41   :  { %9544 = vmatmul.mubr.msk.f32.gmra.mrb[12].mxu0 %vm32_vm0, %v11731_v52  ;;  %9472 = vmatprep.mubr.msk.f32.mxu1 %vm32_vm0, %v11733_v53  ;;  %14476 = vst [vmem:[#allocation21_spill] sm:$0xff] %v11908_v4  ;;  %v11916_v5 = vld [vmem:[#allocation2 + $0x10f] sm:$0xff]  ;;  %14477 = vst [vmem:[#allocation22_spill] sm:$0xff] %v11920_v6  ;;  %v1138_v13 = vld [vmem:[#allocation2 + $0x21] sm:$0xff] }
  0x42   :  { %9546 = vmatprep.mubr.msk.f32.mxu0 %vm32_vm0, %v11735_v54  ;;  %14478 = vst [vmem:[#allocation23_spill] sm:$0xff] %v11922_v12  ;;  %v11931_v55 = vld [vmem:[#allocation2 + $0x120] sm:$0xff]  ;;  %v1139_v2 = vld [vmem:[#allocation2 + $0x29] sm:$0xff] }
  0x43   :  { %14479 = vst [vmem:[#allocation24_spill] sm:$0xff] %v11931_v55 }
  0x44   :  { %9473 = vmatmul.mubr.msk.f32.gmra.mrb[14].mxu1 %vm32_vm0, %v11749_v56  ;;  %v12149_v56 = vld [vmem:[#allocation2 + $0x131] sm:$0xff] }
  0x45   :  { %9547 = vmatmul.mubr.msk.f32.gmra.mrb[14].mxu0 %vm32_vm0, %v11751_v57  ;;  %9475 = vmatprep.mubr.msk.f32.mxu1 %vm32_vm0, %v11757_v59  ;;  %v12143_v59 = vld [vmem:[#allocation2 + $0x129] sm:$0xff]  ;;  %14511 = vst [vmem:[#allocation55_spill] sm:$0xff] %v12149_v56 }
  0x46   :  { %9549 = vmatprep.mubr.msk.f32.mxu0 %vm32_vm0, %v11759_v60  ;;  %14510 = vst [vmem:[#allocation54_spill] sm:$0xff] %v12143_v59 }
  0x48   :  { %9476 = vmatmul.mubr.msk.f32.gmra.mrb[16].mxu1 %vm32_vm0, %v11776_v63  ;;  %v12118_v63 = vld [vmem:[#allocation2 + $0x187] sm:$0xff] }
  0x49   :  { %9550 = vmatmul.mubr.msk.f32.gmra.mrb[16].mxu0 %vm32_vm0, %v11778_v0  ;;  %9478 = vmatprep.mubr.msk.f32.mxu1 %vm32_vm0, %v11782_v1  ;;  %v12116_v1 = vld [vmem:[#allocation2 + $0x109] sm:$0xff] }
  0x4a   :  { %9552 = vmatprep.mubr.msk.f32.mxu0 %vm32_vm0, %v11784_v3  ;;  %14505 = vst [vmem:[#allocation50_spill] sm:$0xff] %v12116_v1 }
  0x4c   :  { %9479 = vmatmul.mubr.msk.f32.gmra.mrb[18].mxu1 %vm32_vm0, %v11805_v7  ;;  %v12114_v7 = vld [vmem:[#allocation2 + $0x17f] sm:$0xff] }
  0x4d   :  { %9553 = vmatmul.mubr.msk.f32.gmra.mrb[18].mxu0 %vm32_vm0, %v11807_v8  ;;  %9481 = vmatprep.mubr.msk.f32.mxu1 %vm32_vm0, %v11813_v10  ;;  %v12098_v10 = vld [vmem:[#allocation2 + $0x177] sm:$0xff] }
  0x4e   :  { %9555 = vmatprep.mubr.msk.f32.mxu0 %vm32_vm0, %v11815_v11 }
  0x50   :  { %9482 = vmatmul.mubr.msk.f32.gmra.mrb[20].mxu1 %vm32_vm0, %v11834_v14  ;;  %v12096_v14 = vld [vmem:[#allocation2 + $0xf9] sm:$0xff] }
  0x51   :  { %9556 = vmatmul.mubr.msk.f32.gmra.mrb[20].mxu0 %vm32_vm0, %v11836_v15  ;;  %9484 = vmatprep.mubr.msk.f32.mxu1 %vm32_vm0, %v11838_v16  ;;  %v12082_v16 = vld [vmem:[#allocation2 + $0x167] sm:$0xff]  ;;  %14503 = vst [vmem:[#allocation48_spill] sm:$0xff] %v12096_v14 }
  0x52   :  { %9558 = vmatprep.mubr.msk.f32.mxu0 %vm32_vm0, %v11840_v17 }
  0x54   :  { %9485 = vmatmul.mubr.msk.f32.gmra.mrb[22].mxu1 %vm32_vm0, %v11850_v18  ;;  %v12080_v18 = vld [vmem:[#allocation2 + $0xe9] sm:$0xff] }
  0x55   :  { %9559 = vmatmul.mubr.msk.f32.gmra.mrb[22].mxu0 %vm32_vm0, %v11852_v19  ;;  %9487 = vmatprep.mubr.msk.f32.mxu1 %vm32_vm0, %v11854_v20  ;;  %v12066_v20 = vld [vmem:[#allocation2 + $0x157] sm:$0xff]  ;;  %14501 = vst [vmem:[#allocation46_spill] sm:$0xff] %v12080_v18 }
  0x56   :  { %9561 = vmatprep.mubr.msk.f32.mxu0 %vm32_vm0, %v11856_v21 }
  0x58   :  { %9488 = vmatmul.mubr.msk.f32.gmra.mrb[24].mxu1 %vm32_vm0, %v11866_v22  ;;  %v12064_v22 = vld [vmem:[#allocation2 + $0xd9] sm:$0xff] }
  0x59   :  { %9562 = vmatmul.mubr.msk.f32.gmra.mrb[24].mxu0 %vm32_vm0, %v11868_v23  ;;  %9490 = vmatprep.mubr.msk.f32.mxu1 %vm32_vm0, %v11870_v24  ;;  %v12051_v24 = vld [vmem:[#allocation2 + $0x147] sm:$0xff]  ;;  %14499 = vst [vmem:[#allocation44_spill] sm:$0xff] %v12064_v22 }
  0x5a   :  { %9564 = vmatprep.mubr.msk.f32.mxu0 %vm32_vm0, %v11872_v25 }
  0x5c   :  { %9491 = vmatmul.mubr.msk.f32.gmra.mrb[26].mxu1 %vm32_vm0, %v11882_v26  ;;  %v12049_v26 = vld [vmem:[#allocation2 + $0xc9] sm:$0xff] }
  0x5d   :  { %9565 = vmatmul.mubr.msk.f32.gmra.mrb[26].mxu0 %vm32_vm0, %v11884_v27  ;;  %9493 = vmatprep.mubr.msk.f32.mxu1 %vm32_vm0, %v11886_v48  ;;  %v11953_v48 = vld [vmem:[#allocation2 + $0x138] sm:$0xff]  ;;  %14497 = vst [vmem:[#allocation42_spill] sm:$0xff] %v12049_v26 }
  0x5e   :  { %9567 = vmatprep.mubr.msk.f32.mxu0 %vm32_vm0, %v11888_v49  ;;  %14484 = vst [vmem:[#allocation29_spill] sm:$0xff] %v11953_v48 }
  0x60   :  { %9494 = vmatmul.mubr.msk.f32.gmra.mrb[28].mxu1 %vm32_vm0, %v11902_v58  ;;  %v11938_v58 = vld [vmem:[%s14393_s1 + $0x20] sm:$0xff] }
  0x61   :  { %9568 = vmatmul.mubr.msk.f32.gmra.mrb[28].mxu0 %vm32_vm0, %v11904_v61  ;;  %9496 = vmatprep.mubr.msk.f32.mxu1 %vm32_vm0, %v11908_v4  ;;  %v11933_v4 = vld [vmem:[#allocation2 + $0x128] sm:$0xff] }
  0x62   :  { %9570 = vmatprep.mubr.msk.f32.mxu0 %vm32_vm0, %v11906_v62  ;;  %14480 = vst [vmem:[#allocation25_spill] sm:$0xff] %v11933_v4 }
  0x64   :  { %9497 = vmatmul.mubr.msk.f32.gmra.mrb[30].mxu1 %vm32_vm0, %v11920_v6  ;;  %v11949_v6 = vld [vmem:[#allocation2 + $0x39] sm:$0xff] }
  0x65   :  { %9571 = vmatmul.mubr.msk.f32.gmra.mrb[30].mxu0 %vm32_vm0, %v11916_v5  ;;  %9499 = vmatprep.mubr.msk.f32.mxu1 %vm32_vm0, %v11922_v12  ;;  %v11947_v12 = vld [vmem:[#allocation2 + $0x130] sm:$0xff]  ;;  %14483 = vst [vmem:[#allocation28_spill] sm:$0xff] %v11949_v6 }
  0x66   :  { %9599 = vmatprep.mubr.msk.f32.mxu0 %vm32_vm0, %v1137_v9  ;;  %v11945_v9 = vld [vmem:[#allocation2 + $0x31] sm:$0xff]  ;;  %14482 = vst [vmem:[#allocation27_spill] sm:$0xff] %v11947_v12 }
  0x67   :  { %14481 = vst [vmem:[#allocation26_spill] sm:$0xff] %v11945_v9 }
  0x68   :  { %9500 = vmatmul.mubr.msk.f32.gmra.mrb[32].mxu1 %vm32_vm0, %v11931_v55  ;;  %v12038_v55 = vld [vmem:[#allocation2 + $0x137] sm:$0xff] }
  0x69   :  { %9600 = vmatmul.mubr.msk.f32.vlgmr.msra.gmra.mrb[0].mxu0 %vm32_vm0, %v1138_v13  ;;  %9502 = vmatprep.mubr.msk.f32.mxu1 %vm32_vm0, %v11933_v4  ;;  %v1143_v13 = vld [vmem:[#allocation2 + $0x49] sm:$0xff] }
  0x6a   :  { %9672 = vmatpush3.msra.mxu0 %v11719_v50  ;;  %9602 = vmatprep.mubr.msk.f32.mxu0 %vm32_vm0, %v1139_v2  ;;  %v1142_v2 = vld [vmem:[#allocation2 + $0x41] sm:$0xff] }
  0x6b   :  { %9745 = vmatprep.subr.mxu0 %v11938_v58  ;;  %v11964_v50 = vld [vmem:[#allocation2 + $0x140] sm:$0xff]  ;;  %v11966_v4 = vld [vmem:[#allocation2 + $0x148] sm:$0xff] }
  0x6c   :  { %9503 = vmatmul.mubr.msk.f32.gmra.mrb[34].mxu1 %vm32_vm0, %v11947_v12  ;;  %14485 = vst [vmem:[#allocation30_spill] sm:$0xff] %v11964_v50  ;;  %14486 = vst [vmem:[#allocation31_spill] sm:$0xff] %v11966_v4  ;;  %v1145_v12 = vld [vmem:[#allocation2 + $0x59] sm:$0xff] }
  0x6d   :  { %9603 = vmatmul.mubr.msk.f32.gmra.mrb[32].mxu0 %vm32_vm0, %v11945_v9  ;;  %9505 = vmatprep.mubr.msk.f32.mxu1 %vm32_vm0, %v11953_v48  ;;  %v1144_v9 = vld [vmem:[#allocation2 + $0x51] sm:$0xff] }
  0x6e   :  { %9605 = vmatprep.mubr.msk.f32.mxu0 %vm32_vm0, %v11949_v6  ;;  %v11974_v6 = vld [vmem:[#allocation2 + $0x150] sm:$0xff]  ;;  %v11976_v48 = vld [vmem:[#allocation2 + $0x158] sm:$0xff] }
  0x6f   :  { %14487 = vst [vmem:[#allocation32_spill] sm:$0xff] %v11974_v6  ;;  %14488 = vst [vmem:[#allocation33_spill] sm:$0xff] %v11976_v48 }
  0x70   :  { %9506 = vmatmul.mubr.msk.f32.gmra.mrb[36].mxu1 %vm32_vm0, %v11964_v50  ;;  %v1147_v50 = vld [vmem:[#allocation2 + $0x69] sm:$0xff] }
  0x71   :  { %9606 = vmatmul.mubr.msk.f32.gmra.mrb[34].mxu0 %vm32_vm0, %v1142_v2  ;;  %9508 = vmatprep.mubr.msk.f32.mxu1 %vm32_vm0, %v11966_v4  ;;  %v1146_v2 = vld [vmem:[#allocation2 + $0x61] sm:$0xff] }
  0x72   :  { %9608 = vmatprep.mubr.msk.f32.mxu0 %vm32_vm0, %v1143_v13  ;;  %v11984_v13 = vld [vmem:[#allocation2 + $0x160] sm:$0xff]  ;;  %v11986_v4 = vld [vmem:[#allocation2 + $0x168] sm:$0xff] }
  0x73   :  { %14489 = vst [vmem:[#allocation34_spill] sm:$0xff] %v11984_v13  ;;  %14490 = vst [vmem:[#allocation35_spill] sm:$0xff] %v11986_v4 }
  0x74   :  { %9509 = vmatmul.mubr.msk.f32.gmra.mrb[38].mxu1 %vm32_vm0, %v11974_v6  ;;  %v1149_v6 = vld [vmem:[#allocation2 + $0x79] sm:$0xff] }
  0x75   :  { %9609 = vmatmul.mubr.msk.f32.gmra.mrb[6].mxu0 %vm32_vm0, %v1144_v9  ;;  %9511 = vmatprep.mubr.msk.f32.mxu1 %vm32_vm0, %v11976_v48  ;;  %v1148_v9 = vld [vmem:[#allocation2 + $0x71] sm:$0xff] }
  0x76   :  { %9611 = vmatprep.mubr.msk.f32.mxu0 %vm32_vm0, %v1145_v12  ;;  %v11994_v12 = vld [vmem:[#allocation2 + $0x170] sm:$0xff]  ;;  %v11996_v48 = vld [vmem:[#allocation2 + $0x178] sm:$0xff] }
  0x77   :  { %14491 = vst [vmem:[#allocation36_spill] sm:$0xff] %v11994_v12  ;;  %14492 = vst [vmem:[#allocation37_spill] sm:$0xff] %v11996_v48 }
  0x78   :  { %9512 = vmatmul.mubr.msk.f32.gmra.mrb[40].mxu1 %vm32_vm0, %v11984_v13  ;;  %v1151_v13 = vld [vmem:[#allocation2 + $0x89] sm:$0xff] }
  0x79   :  { %9612 = vmatmul.mubr.msk.f32.gmra.mrb[36].mxu0 %vm32_vm0, %v1146_v2  ;;  %9514 = vmatprep.mubr.msk.f32.mxu1 %vm32_vm0, %v11986_v4  ;;  %v1150_v2 = vld [vmem:[#allocation2 + $0x81] sm:$0xff] }
  0x7a   :  { %9614 = vmatprep.mubr.msk.f32.mxu0 %vm32_vm0, %v1147_v50  ;;  %v12004_v50 = vld [vmem:[#allocation2 + $0x180] sm:$0xff]  ;;  %v12006_v4 = vld [vmem:[#allocation2 + $0x188] sm:$0xff] }
  0x7b   :  { %14493 = vst [vmem:[#allocation38_spill] sm:$0xff] %v12004_v50  ;;  %14494 = vst [vmem:[#allocation39_spill] sm:$0xff] %v12006_v4 }
  0x7c   :  { %9515 = vmatmul.mubr.msk.f32.gmra.mrb[42].mxu1 %vm32_vm0, %v11994_v12  ;;  %v1153_v12 = vld [vmem:[#allocation2 + $0x99] sm:$0xff] }
  0x7d   :  { %9615 = vmatmul.mubr.msk.f32.gmra.mrb[38].mxu0 %vm32_vm0, %v1148_v9  ;;  %9517 = vmatprep.mubr.msk.f32.mxu1 %vm32_vm0, %v11996_v48  ;;  %v1152_v9 = vld [vmem:[#allocation2 + $0x91] sm:$0xff] }
  0x7e   :  { %9617 = vmatprep.mubr.msk.f32.mxu0 %vm32_vm0, %v1149_v6  ;;  %v12014_v6 = vld [vmem:[#allocation2 + $0x190] sm:$0xff] }
  0x7f   :  { %14495 = vst [vmem:[#allocation40_spill] sm:$0xff] %v12014_v6  ;;  %v12016_v48 = vld [vmem:[#allocation2 + $0x117] sm:$0xff] }
  0x80   :  { %9518 = vmatmul.mubr.msk.f32.gmra.mrb[44].mxu1 %vm32_vm0, %v12004_v50  ;;  %v1155_v50 = vld [vmem:[#allocation2 + $0xa9] sm:$0xff] }
  0x81   :  { %9618 = vmatmul.mubr.msk.f32.gmra.mrb[12].mxu0 %vm32_vm0, %v1150_v2  ;;  %9520 = vmatprep.mubr.msk.f32.mxu1 %vm32_vm0, %v12006_v4  ;;  %v1154_v2 = vld [vmem:[#allocation2 + $0xa1] sm:$0xff] }
  0x82   :  { %9620 = vmatprep.mubr.msk.f32.mxu0 %vm32_vm0, %v1151_v13  ;;  %v12024_v13 = vld [vmem:[#allocation2 + $0x11f] sm:$0xff]  ;;  %v12026_v4 = vld [vmem:[#allocation2 + $0x127] sm:$0xff] }
  0x84   :  { %9521 = vmatmul.mubr.msk.f32.gmra.mrb[46].mxu1 %vm32_vm0, %v12014_v6  ;;  %v12036_v6 = vld [vmem:[#allocation2 + $0xb9] sm:$0xff] }
  0x85   :  { %9621 = vmatmul.mubr.msk.f32.gmra.mrb[40].mxu0 %vm32_vm0, %v1152_v9  ;;  %9573 = vmatprep.mubr.msk.f32.mxu1 %vm32_vm0, %v12016_v48  ;;  %v1156_v9 = vld [vmem:[#allocation2 + $0xb1] sm:$0xff]  ;;  %14496 = vst [vmem:[#allocation41_spill] sm:$0xff] %v12036_v6 }
  0x86   :  { %9623 = vmatprep.mubr.msk.f32.mxu0 %vm32_vm0, %v1153_v12  ;;  %v12034_v12 = vld [vmem:[#allocation2 + $0x12f] sm:$0xff] }
  0x88   :  { %9574 = vmatmul.mubr.msk.f32.vlgmr.msra.gmra.mrb[48].mxu1 %vm32_vm0, %v12024_v13 }
  0x89   :  { %9624 = vmatmul.mubr.msk.f32.gmra.mrb[42].mxu0 %vm32_vm0, %v1154_v2  ;;  %9576 = vmatprep.mubr.msk.f32.mxu1 %vm32_vm0, %v12026_v4  ;;  %v1158_v2 = vld [vmem:[#allocation2 + $0xc1] sm:$0xff] }
  0x8a   :  { %9626 = vmatprep.mubr.msk.f32.mxu0 %vm32_vm0, %v1155_v50  ;;  %v12047_v50 = vld [vmem:[#allocation2 + $0x13f] sm:$0xff] }
  0x8c   :  { %9577 = vmatmul.mubr.msk.f32.gmra.mrb[50].mxu1 %vm32_vm0, %v12034_v12 }
  0x8d   :  { %9627 = vmatmul.mubr.msk.f32.gmra.mrb[18].mxu0 %vm32_vm0, %v1156_v9  ;;  %9579 = vmatprep.mubr.msk.f32.mxu1 %vm32_vm0, %v12038_v55  ;;  %v12058_v9 = vld [vmem:[#allocation2 + $0xd1] sm:$0xff] }
  0x8e   :  { %9629 = vmatprep.mubr.msk.f32.mxu0 %vm32_vm0, %v12036_v6  ;;  %14498 = vst [vmem:[#allocation43_spill] sm:$0xff] %v12058_v9  ;;  %v12062_v6 = vld [vmem:[#allocation2 + $0x14f] sm:$0xff] }
  0x90   :  { %9580 = vmatmul.mubr.msk.f32.gmra.mrb[36].mxu1 %vm32_vm0, %v12047_v50 }
  0x91   :  { %9630 = vmatmul.mubr.msk.f32.gmra.mrb[44].mxu0 %vm32_vm0, %v1158_v2  ;;  %9582 = vmatprep.mubr.msk.f32.mxu1 %vm32_vm0, %v12051_v24  ;;  %v12074_v2 = vld [vmem:[#allocation2 + $0xe1] sm:$0xff] }
  0x92   :  { %9632 = vmatprep.mubr.msk.f32.mxu0 %vm32_vm0, %v12049_v26  ;;  %14500 = vst [vmem:[#allocation45_spill] sm:$0xff] %v12074_v2  ;;  %v12078_v26 = vld [vmem:[#allocation2 + $0x15f] sm:$0xff] }
  0x94   :  { %9583 = vmatmul.mubr.msk.f32.gmra.mrb[52].mxu1 %vm32_vm0, %v12062_v6 }
  0x95   :  { %9633 = vmatmul.mubr.msk.f32.gmra.mrb[46].mxu0 %vm32_vm0, %v12058_v9  ;;  %9585 = vmatprep.mubr.msk.f32.mxu1 %vm32_vm0, %v12066_v20  ;;  %v12094_v9 = vld [vmem:[#allocation2 + $0x16f] sm:$0xff] }
  0x96   :  { %9635 = vmatprep.mubr.msk.f32.mxu0 %vm32_vm0, %v12064_v22  ;;  %v12090_v22 = vld [vmem:[#allocation2 + $0xf1] sm:$0xff] }
  0x97   :  { %14502 = vst [vmem:[#allocation47_spill] sm:$0xff] %v12090_v22 }
  0x98   :  { %9586 = vmatmul.mubr.msk.f32.gmra.mrb[54].mxu1 %vm32_vm0, %v12078_v26 }
  0x99   :  { %9636 = vmatmul.mubr.msk.f32.gmra.mrb[24].mxu0 %vm32_vm0, %v12074_v2  ;;  %9588 = vmatprep.mubr.msk.f32.mxu1 %vm32_vm0, %v12082_v16  ;;  %v7857_v2 = vld [vmem:[%s14394_s0 + $0xf8] sm:$0xff] }
  0x9a   :  { %9638 = vmatprep.mubr.msk.f32.mxu0 %vm32_vm0, %v12080_v18  ;;  %171 = vst.msk [vmem:[#allocation2 + $0x1a0] sm:$0xff] %vm32_vm0, %v7857_v2  ;;  %v12110_v18 = vld [vmem:[#allocation2 + $0x101] sm:$0xff]  ;;  %v12126_v2 = vld [vmem:[#allocation2 + $0x111] sm:$0xff] }
  0x9b   :  { %14504 = vst [vmem:[#allocation49_spill] sm:$0xff] %v12110_v18  ;;  %14506 = vst [vmem:[#allocation51_spill] sm:$0xff] %v12126_v2 }
  0x9c   :  { %9589 = vmatmul.mubr.msk.f32.gmra.mrb[42].mxu1 %vm32_vm0, %v12094_v9 }
  0x9d   :  { %9639 = vmatmul.mubr.msk.f32.gmra.mrb[48].mxu0 %vm32_vm0, %v12090_v22  ;;  %9591 = vmatprep.mubr.msk.f32.mxu1 %vm32_vm0, %v12098_v10  ;;  %v12132_v22 = vld [vmem:[#allocation2 + $0x119] sm:$0xff] }
  0x9e   :  { %9641 = vmatprep.mubr.msk.f32.mxu0 %vm32_vm0, %v12096_v14  ;;  %v12130_v14 = vld [vmem:[#allocation2 + $0x18f] sm:$0xff]  ;;  %14507 = vst [vmem:[#allocation52_spill] sm:$0xff] %v12132_v22 }
  0xa0   :  { %9592 = vmatmul.mubr.msk.f32.gmra.mrb[56].mxu1 %vm32_vm0, %v12114_v7 }
  0xa1   :  { %9642 = vmatmul.mubr.msk.f32.gmra.mrb[50].mxu0 %vm32_vm0, %v12110_v18  ;;  %9594 = vmatprep.mubr.msk.f32.mxu1 %vm32_vm0, %v12118_v63  ;;  %v12140_v18 = vld [vmem:[#allocation2 + $0x121] sm:$0xff] }
  0xa2   :  { %9644 = vmatprep.mubr.msk.f32.mxu0 %vm32_vm0, %v12116_v1  ;;  %14508 = vst [vmem:[#allocation53_spill] sm:$0xff] %v12140_v18  ;;  %v14509_v1 = vmov 0.0  }
  0xa4   :  { %9595 = vmatmul.mubr.msk.f32.gmra.mrb[58].mxu1 %vm32_vm0, %v12130_v14 }
  0xa5   :  { %9645 = vmatmul.mubr.msk.f32.gmra.mrb[30].mxu0 %vm32_vm0, %v12126_v2  ;;  %10147 = vmatprep.mubr.f32.mxu1 %v14509_v1  ;;  %v12151_v2 = vld [vmem:[#allocation2 + $0x139] sm:$0xff]  ;;  %v12159_v1 = vld [vmem:[#allocation2 + $0x149] sm:$0xff] }
  0xa6   :  { %9647 = vmatprep.mubr.msk.f32.mxu0 %vm32_vm0, %v12132_v22  ;;  %14512 = vst [vmem:[#allocation56_spill] sm:$0xff] %v12151_v2  ;;  %v12157_v22 = vld [vmem:[#allocation2 + $0x141] sm:$0xff]  ;;  %14514 = vst [vmem:[#allocation58_spill] sm:$0xff] %v12159_v1 }
  0xa7   :  { %14513 = vst [vmem:[#allocation57_spill] sm:$0xff] %v12157_v22 }
  0xa9   :  { %9648 = vmatmul.mubr.msk.f32.gmra.mrb[52].mxu0 %vm32_vm0, %v12140_v18  ;;  %v12167_v18 = vld [vmem:[#allocation2 + $0x159] sm:$0xff] }
  0xaa   :  { %9650 = vmatprep.mubr.msk.f32.mxu0 %vm32_vm0, %v12143_v59  ;;  %v12165_v59 = vld [vmem:[#allocation2 + $0x151] sm:$0xff]  ;;  %14516 = vst [vmem:[#allocation60_spill] sm:$0xff] %v12167_v18 }
  0xab   :  { %14515 = vst [vmem:[#allocation59_spill] sm:$0xff] %v12165_v59 }
  0xad   :  { %9651 = vmatmul.mubr.msk.f32.gmra.mrb[54].mxu0 %vm32_vm0, %v12149_v56  ;;  %v12175_v56 = vld [vmem:[#allocation2 + $0x169] sm:$0xff] }
  0xae   :  { %9653 = vmatprep.mubr.msk.f32.mxu0 %vm32_vm0, %v12151_v2  ;;  %v12173_v2 = vld [vmem:[#allocation2 + $0x161] sm:$0xff]  ;;  %14517 = vst [vmem:[#allocation61_spill] sm:$0xff] %v12175_v56 }
  0xb1   :  { %9654 = vmatmul.mubr.msk.f32.gmra.mrb[56].mxu0 %vm32_vm0, %v12157_v22  ;;  %v12183_v22 = vld [vmem:[#allocation2 + $0x179] sm:$0xff] }
  0xb2   :  { %9656 = vmatprep.mubr.msk.f32.mxu0 %vm32_vm0, %v12159_v1  ;;  %v12181_v1 = vld [vmem:[#allocation2 + $0x171] sm:$0xff]  ;;  %14518 = vst [vmem:[#allocation62_spill] sm:$0xff] %v12183_v22 }
  0xb5   :  { %9657 = vmatmul.mubr.msk.f32.gmra.mrb[58].mxu0 %vm32_vm0, %v12165_v59  ;;  %v12191_v59 = vld [vmem:[#allocation2 + $0x189] sm:$0xff] }
  0xb6   :  { %9659 = vmatprep.mubr.msk.f32.mxu0 %vm32_vm0, %v12167_v18  ;;  %v12189_v18 = vld [vmem:[#allocation2 + $0x181] sm:$0xff] }
  0xb9   :  { %9660 = vmatmul.mubr.msk.f32.gmra.mrb[60].mxu0 %vm32_vm0, %v12173_v2 }
  0xba   :  { %9662 = vmatprep.mubr.msk.f32.mxu0 %vm32_vm0, %v12175_v56  ;;  %v12197_v56 = vld [vmem:[#allocation2 + $0x191] sm:$0xff] }
  0xbd   :  { %9663 = vmatmul.mubr.msk.f32.gmra.mrb[62].mxu0 %vm32_vm0, %v12181_v1 }
  0xbe   :  { %9665 = vmatprep.mubr.msk.f32.mxu0 %vm32_vm0, %v12183_v22  ;;  %v12206_v22 = vld [vmem:[%s14393_s1 + $0x28] sm:$0xff] }
  0xc1   :  { %9666 = vmatmul.mubr.msk.f32.gmra.mrb[64].mxu0 %vm32_vm0, %v12189_v18 }
  0xc2   :  { %9668 = vmatprep.mubr.msk.f32.mxu0 %vm32_vm0, %v12191_v59 }
  0xc5   :  { %9669 = vmatmul.mubr.msk.f32.gmra.mrb[66].mxu0 %vm32_vm0, %v12197_v56 }
  0xc6   :  { %9673 = vmatprep.mubr.msk.f32.mxu0 %vm32_vm0, %v11636_v29 }
  0xc9   :  { %9674 = vmatmul.mubr.msk.f32.vlgmr.msra.gmra.mrb[0].mxu0 %vm32_vm0, %v11641_v31 }
  0xca   :  { %9746 = vmatpush3.msra.mxu0 %v11938_v58  ;;  %9676 = vmatprep.mubr.msk.f32.mxu0 %vm32_vm0, %v11654_v33 }
  0xcb   :  { %9819 = vmatprep.subr.mxu0 %v12206_v22 }
  0xcd   :  { %9677 = vmatmul.mubr.msk.f32.gmra.mrb[68].mxu0 %vm32_vm0, %v11658_v35 }
  0xce   :  { %9679 = vmatprep.mubr.msk.f32.mxu0 %vm32_vm0, %v11670_v37 }
  0xd1   :  { %9680 = vmatmul.mubr.msk.f32.gmra.mrb[70].mxu0 %vm32_vm0, %v11674_v39 }
  0xd2   :  { %9682 = vmatprep.mubr.msk.f32.mxu0 %vm32_vm0, %v11686_v41 }
  0xd5   :  { %9683 = vmatmul.mubr.msk.f32.gmra.mrb[6].mxu0 %vm32_vm0, %v11690_v43 }
  0xd6   :  { %9685 = vmatprep.mubr.msk.f32.mxu0 %vm32_vm0, %v11702_v45 }
  0xd9   :  { %9686 = vmatmul.mubr.msk.f32.gmra.mrb[72].mxu0 %vm32_vm0, %v11706_v47 }
  0xda   :  { %9688 = vmatprep.mubr.msk.f32.mxu0 %vm32_vm0, %v11731_v52 }
  0xdd   :  { %9689 = vmatmul.mubr.msk.f32.gmra.mrb[74].mxu0 %vm32_vm0, %v11735_v54 }
  0xde   :  { %9691 = vmatprep.mubr.msk.f32.mxu0 %vm32_vm0, %v11751_v57 }
  0xe0   :  { %v12262_v29 = vpop.f32.mrb[0].mxu1 }
  0xe1   :  { %9692 = vmatmul.mubr.msk.f32.gmra.mrb[12].mxu0 %vm32_vm0, %v11759_v60  ;;  %v12266_v31 = vpop.f32.mrb[1].mxu1 }
  0xe2   :  { %9694 = vmatprep.mubr.msk.f32.mxu0 %vm32_vm0, %v11778_v0 }
  0xe5   :  { %9695 = vmatmul.mubr.msk.f32.gmra.mrb[76].mxu0 %vm32_vm0, %v11784_v3 }
  0xe6   :  { %9697 = vmatprep.mubr.msk.f32.mxu0 %vm32_vm0, %v11807_v8 }
  0xe9   :  { %9698 = vmatmul.mubr.msk.f32.gmra.mrb[78].mxu0 %vm32_vm0, %v11815_v11 }
  0xea   :  { %9700 = vmatprep.mubr.msk.f32.mxu0 %vm32_vm0, %v11836_v15 }
  0xed   :  { %9701 = vmatmul.mubr.msk.f32.gmra.mrb[18].mxu0 %vm32_vm0, %v11840_v17 }
  0xee   :  { %9703 = vmatprep.mubr.msk.f32.mxu0 %vm32_vm0, %v11852_v19 }
  0xf1   :  { %9704 = vmatmul.mubr.msk.f32.gmra.mrb[80].mxu0 %vm32_vm0, %v11856_v21 }
  0xf2   :  { %9706 = vmatprep.mubr.msk.f32.mxu0 %vm32_vm0, %v11868_v23 }
  0xf5   :  { %9707 = vmatmul.mubr.msk.f32.gmra.mrb[82].mxu0 %vm32_vm0, %v11872_v25 }
  0xf6   :  { %9709 = vmatprep.mubr.msk.f32.mxu0 %vm32_vm0, %v11884_v27 }
  0xf9   :  { %9710 = vmatmul.mubr.msk.f32.gmra.mrb[24].mxu0 %vm32_vm0, %v11888_v49 }
  0xfa   :  { %9712 = vmatprep.mubr.msk.f32.mxu0 %vm32_vm0, %v11904_v61 }
  0xfd   :  { %9713 = vmatmul.mubr.msk.f32.gmra.mrb[84].mxu0 %vm32_vm0, %v11906_v62 }
  0xfe   :  { %9715 = vmatprep.mubr.msk.f32.mxu0 %vm32_vm0, %v11916_v5 }
  0xff   :  { %v9456_v33 = vpop.f32.mrb[2].mxu1 }
 0x100   :  { %v9530_v35 = vpop.f32.mrb[2].mxu0  ;;  %v491_v39 = vpop.f32.mrb[3].mxu1 }
 0x101   :  { %v924_v37 = vpop.f32.mrb[3].mxu0  ;;  %9716 = vmatmul.mubr.msk.f32.gmra.mrb[86].mxu0 %vm32_vm0, %v12016_v48  ;;  %v12272_v41 = vadd.f32 %v9530_v35, %v9456_v33 }
 0x102   :  { %9718 = vmatprep.mubr.msk.f32.mxu0 %vm32_vm0, %v12024_v13  ;;  %v12345_v37 = vld [vmem:[%s14393_s1 + $0x30] sm:$0xff] }
 0x103   :  { %v9459_v43 = vpop.f32.mrb[4].mxu1 }
 0x104   :  { %v9533_v45 = vpop.f32.mrb[4].mxu0  ;;  %v500_v47 = vpop.f32.mrb[5].mxu1 }
 0x105   :  { %v933_v52 = vpop.f32.mrb[5].mxu0  ;;  %9719 = vmatmul.mubr.msk.f32.gmra.mrb[30].mxu0 %vm32_vm0, %v12026_v4 }
 0x106   :  { %9721 = vmatprep.mubr.msk.f32.mxu0 %vm32_vm0, %v12034_v12  ;;  %v12280_v54 = vadd.f32 %v933_v52, %v500_v47 }
 0x107   :  { %v12282_v57 = vpop.f32.mrb[6].mxu1 }
 0x108   :  { %v12286_v60 = vpop.f32.mrb[7].mxu1 }
 0x109   :  { %9722 = vmatmul.mubr.msk.f32.gmra.mrb[88].mxu0 %vm32_vm0, %v12038_v55  ;;  %v12322_v55 = vld [vmem:[#allocation2 + $0x197] sm:$0xff] }
 0x10a   :  { %9724 = vmatprep.mubr.msk.f32.mxu0 %vm32_vm0, %v12047_v50 }
 0x10b   :  { %v9465_v0 = vpop.f32.mrb[8].mxu1 }
 0x10c   :  { %v9539_v3 = vpop.f32.mrb[8].mxu0  ;;  %v519_v15 = vpop.f32.mrb[9].mxu1 }
 0x10d   :  { %v12290_v8 = vadd.f32 %v9539_v3, %v9465_v0  ;;  %v952_v11 = vpop.f32.mrb[9].mxu0  ;;  %9725 = vmatmul.mubr.msk.f32.gmra.mrb[90].mxu0 %vm32_vm0, %v12051_v24 }
 0x10e   :  { %9727 = vmatprep.mubr.msk.f32.mxu0 %vm32_vm0, %v12062_v6  ;;  %v12324_v6 = vld [vmem:[#allocation2 + $0x19f] sm:$0xff] }
 0x10f   :  { %v9468_v17 = vpop.f32.mrb[10].mxu1 }
 0x110   :  { %v9542_v19 = vpop.f32.mrb[10].mxu0  ;;  %v528_v21 = vpop.f32.mrb[11].mxu1 }
 0x111   :  { %v961_v23 = vpop.f32.mrb[11].mxu0  ;;  %9728 = vmatmul.mubr.msk.f32.gmra.mrb[56].mxu0 %vm32_vm0, %v12066_v20  ;;  %v14520_v19 = vld [vmem:[#allocation6_spill] sm:$0xff] }
 0x112   :  { %v12298_v25 = vadd.f32 %v961_v23, %v528_v21  ;;  %9730 = vmatprep.mubr.msk.f32.mxu0 %vm32_vm0, %v12078_v26 }
 0x113   :  { %v12302_v27 = vpop.f32.mrb[12].mxu1 }
 0x114   :  { %v12306_v24 = vpop.f32.mrb[13].mxu1 }
 0x115   :  { %9731 = vmatmul.mubr.msk.f32.gmra.mrb[92].mxu0 %vm32_vm0, %v12082_v16 }
 0x116   :  { %9733 = vmatprep.mubr.msk.f32.mxu0 %vm32_vm0, %v12094_v9 }
 0x117   :  { %v9474_v48 = vpop.f32.mrb[14].mxu1 }
 0x118   :  { %v9548_v49 = vpop.f32.mrb[14].mxu0  ;;  %v547_v61 = vpop.f32.mrb[15].mxu1 }
 0x119   :  { %v12310_v58 = vadd.f32 %v9548_v49, %v9474_v48  ;;  %v980_v20 = vpop.f32.mrb[15].mxu0  ;;  %9734 = vmatmul.mubr.msk.f32.gmra.mrb[94].mxu0 %vm32_vm0, %v12098_v10 }
 0x11a   :  { %9736 = vmatprep.mubr.msk.f32.mxu0 %vm32_vm0, %v12114_v7  ;;  %v14522_v20 = vld [vmem:[#allocation8_spill] sm:$0xff] }
 0x11b   :  { %v9477_v26 = vpop.f32.mrb[16].mxu1 }
 0x11c   :  { %v9551_v62 = vpop.f32.mrb[16].mxu0  ;;  %v556_v16 = vpop.f32.mrb[17].mxu1 }
 0x11d   :  { %v989_v4 = vpop.f32.mrb[17].mxu0  ;;  %9737 = vmatmul.mubr.msk.f32.gmra.mrb[62].mxu0 %vm32_vm0, %v12118_v63  ;;  %v12334_v63 = vld [vmem:[#allocation2 + $0x1a7] sm:$0xff] }
 0x11e   :  { %v12318_v5 = vadd.f32 %v989_v4, %v556_v16  ;;  %9739 = vmatprep.mubr.msk.f32.mxu0 %vm32_vm0, %v12130_v14  ;;  %v14524_v62 = vld [vmem:[#allocation10_spill] sm:$0xff]  ;;  %v14525_v16 = vld [vmem:[#allocation11_spill] sm:$0xff] }
 0x11f   :  { %v12326_v10 = vpop.f32.mrb[18].mxu1 }
 0x120   :  { %v12330_v7 = vpop.f32.mrb[19].mxu1 }
 0x121   :  { %9740 = vmatmul.mubr.msk.f32.gmra.mrb[96].mxu0 %vm32_vm0, %v12322_v55 }
 0x122   :  { %9742 = vmatprep.mubr.msk.f32.mxu0 %vm32_vm0, %v12324_v6 }
 0x123   :  { %v9483_v13 = vpop.f32.mrb[20].mxu1 }
 0x124   :  { %v9557_v12 = vpop.f32.mrb[20].mxu0  ;;  %v575_v9 = vpop.f32.mrb[21].mxu1 }
 0x125   :  { %v12336_v50 = vadd.f32 %v9557_v12, %v9483_v13  ;;  %v1008_v14 = vpop.f32.mrb[21].mxu0  ;;  %9743 = vmatmul.mubr.msk.f32.gmra.mrb[98].mxu0 %vm32_vm0, %v12334_v63  ;;  %v14526_v13 = vld [vmem:[#allocation12_spill] sm:$0xff] }
 0x126   :  { %9747 = vmatprep.mubr.msk.f32.mxu0 %vm32_vm0, %v11634_v28 }
 0x127   :  { %v9486_v33 = vpop.f32.mrb[22].mxu1 }
 0x128   :  { %v9560_v35 = vpop.f32.mrb[22].mxu0  ;;  %v584_v39 = vpop.f32.mrb[23].mxu1 }
 0x129   :  { %v1017_v43 = vpop.f32.mrb[23].mxu0  ;;  %9748 = vmatmul.mubr.msk.f32.vlgmr.msra.gmra.mrb[0].mxu0 %vm32_vm0, %v11639_v30  ;;  %v14527_v35 = vld [vmem:[#allocation13_spill] sm:$0xff] }
 0x12a   :  { %v12349_v45 = vadd.f32 %v1017_v43, %v584_v39  ;;  %9820 = vmatpush3.msra.mxu0 %v12206_v22  ;;  %9750 = vmatprep.mubr.msk.f32.mxu0 %vm32_vm0, %v11652_v32  ;;  %v14528_v39 = vld [vmem:[#allocation14_spill] sm:$0xff] }
 0x12b   :  { %9893 = vmatprep.subr.mxu0 %v12345_v37  ;;  %v12355_v28 = vpop.f32.mrb[24].mxu1 }
 0x12c   :  { %v12359_v47 = vpop.f32.mrb[25].mxu1 }
 0x12d   :  { %9751 = vmatmul.mubr.msk.f32.gmra.mrb[100].mxu0 %vm32_vm0, %v11656_v34 }
 0x12e   :  { %9753 = vmatprep.mubr.msk.f32.mxu0 %vm32_vm0, %v11668_v36 }
 0x12f   :  { %v9492_v30 = vpop.f32.mrb[26].mxu1 }
 0x130   :  { %v9566_v52 = vpop.f32.mrb[26].mxu0  ;;  %v603_v32 = vpop.f32.mrb[27].mxu1 }
 0x131   :  { %v12363_v0 = vadd.f32 %v9566_v52, %v9492_v30  ;;  %v1036_v22 = vpop.f32.mrb[27].mxu0  ;;  %9754 = vmatmul.mubr.msk.f32.gmra.mrb[102].mxu0 %vm32_vm0, %v11672_v38  ;;  %v14529_v52 = vld [vmem:[#allocation15_spill] sm:$0xff]  ;;  %v14530_v32 = vld [vmem:[#allocation16_spill] sm:$0xff] }
 0x132   :  { %9756 = vmatprep.mubr.msk.f32.mxu0 %vm32_vm0, %v11684_v40 }
 0x133   :  { %v9495_v3 = vpop.f32.mrb[28].mxu1 }
 0x134   :  { %v9569_v11 = vpop.f32.mrb[28].mxu0  ;;  %v612_v34 = vpop.f32.mrb[29].mxu1  ;;  %v14531_v3 = vld [vmem:[#allocation17_spill] sm:$0xff] }
 0x135   :  { %v1045_v15 = vpop.f32.mrb[29].mxu0  ;;  %9757 = vmatmul.mubr.msk.f32.gmra.mrb[6].mxu0 %vm32_vm0, %v11688_v42 }
 0x136   :  { %v12371_v36 = vadd.f32 %v1045_v15, %v612_v34  ;;  %9759 = vmatprep.mubr.msk.f32.mxu0 %vm32_vm0, %v11700_v44  ;;  %v14532_v34 = vld [vmem:[#allocation18_spill] sm:$0xff] }
 0x137   :  { %v12375_v17 = vpop.f32.mrb[30].mxu1 }
 0x138   :  { %v12379_v38 = vpop.f32.mrb[31].mxu1 }
 0x139   :  { %9760 = vmatmul.mubr.msk.f32.gmra.mrb[104].mxu0 %vm32_vm0, %v11704_v46  ;;  %14519 = vst [vmem:[#allocation63_spill] sm:$0xff] %v12379_v38  ;;  %v14521_v46 = vld [vmem:[#allocation7_spill] sm:$0xff]  ;;  %v14563_v38 = vld [vmem:[#allocation45_spill] sm:$0xff] }
 0x13a   :  { %9762 = vmatprep.mubr.msk.f32.mxu0 %vm32_vm0, %v11729_v51 }
 0x13b   :  { %v9501_v40 = vpop.f32.mrb[32].mxu1 }
 0x13c   :  { %v631_v42 = vpop.f32.mrb[33].mxu1 }
 0x13d   :  { %9763 = vmatmul.mubr.msk.f32.gmra.mrb[106].mxu0 %vm32_vm0, %v11733_v53  ;;  %v14523_v53 = vld [vmem:[#allocation9_spill] sm:$0xff] }
 0x13e   :  { %9765 = vmatprep.mubr.msk.f32.mxu0 %vm32_vm0, %v14520_v19 }
 0x13f   :  { %v9504_v44 = vpop.f32.mrb[34].mxu1 }
 0x140   :  { %v9604_v21 = vpop.f32.mrb[32].mxu0  ;;  %v640_v49 = vpop.f32.mrb[35].mxu1  ;;  %v14533_v44 = vld [vmem:[#allocation19_spill] sm:$0xff] }
 0x141   :  { %v12388_v23 = vadd.f32 %v9604_v21, %v12272_v41  ;;  %v1407_v48 = vpop.f32.mrb[33].mxu0  ;;  %9766 = vmatmul.mubr.msk.f32.gmra.mrb[12].mxu0 %vm32_vm0, %v14521_v46 }
 0x142   :  { %9768 = vmatprep.mubr.msk.f32.mxu0 %vm32_vm0, %v14522_v20  ;;  %v14534_v48 = vld [vmem:[#allocation20_spill] sm:$0xff] }
 0x144   :  { %v9607_v51 = vpop.f32.mrb[34].mxu0 }
 0x145   :  { %v1416_v61 = vpop.f32.mrb[35].mxu0  ;;  %9769 = vmatmul.mubr.msk.f32.gmra.mrb[108].mxu0 %vm32_vm0, %v14523_v53 }
 0x146   :  { %v12397_v26 = vadd.f32 %v1416_v61, %v12280_v54  ;;  %9771 = vmatprep.mubr.msk.f32.mxu0 %vm32_vm0, %v14524_v62  ;;  %v14535_v61 = vld [vmem:[#allocation21_spill] sm:$0xff] }
 0x147   :  { %v9510_v41 = vpop.f32.mrb[38].mxu1 }
 0x148   :  { %v659_v4 = vpop.f32.mrb[39].mxu1 }
 0x149   :  { %9772 = vmatmul.mubr.msk.f32.gmra.mrb[110].mxu0 %vm32_vm0, %v14525_v16 }
 0x14a   :  { %9774 = vmatprep.mubr.msk.f32.mxu0 %vm32_vm0, %v14526_v13  ;;  %v14537_v13 = vld [vmem:[#allocation23_spill] sm:$0xff] }
 0x14b   :  { %v9513_v14 = vpop.f32.mrb[40].mxu1 }
 0x14c   :  { %v9613_v12 = vpop.f32.mrb[36].mxu0  ;;  %v668_v54 = vpop.f32.mrb[41].mxu1  ;;  %v14538_v14 = vld [vmem:[#allocation24_spill] sm:$0xff] }
 0x14d   :  { %v12406_v9 = vadd.f32 %v9613_v12, %v12290_v8  ;;  %v1435_v33 = vpop.f32.mrb[37].mxu0  ;;  %9775 = vmatmul.mubr.msk.f32.gmra.mrb[18].mxu0 %vm32_vm0, %v14527_v35 }
 0x14e   :  { %9777 = vmatprep.mubr.msk.f32.mxu0 %vm32_vm0, %v14528_v39 }
 0x150   :  { %v9616_v43 = vpop.f32.mrb[38].mxu0 }
 0x151   :  { %v1444_v30 = vpop.f32.mrb[39].mxu0  ;;  %9778 = vmatmul.mubr.msk.f32.gmra.mrb[112].mxu0 %vm32_vm0, %v14529_v52  ;;  %v14540_v43 = vld [vmem:[#allocation25_spill] sm:$0xff]  ;;  %v14542_v52 = vld [vmem:[#allocation27_spill] sm:$0xff] }
 0x152   :  { %v12415_v22 = vadd.f32 %v1444_v30, %v12298_v25  ;;  %9780 = vmatprep.mubr.msk.f32.mxu0 %vm32_vm0, %v14530_v32 }
 0x153   :  { %v9519_v8 = vpop.f32.mrb[44].mxu1 }
 0x154   :  { %v687_v11 = vpop.f32.mrb[45].mxu1 }
 0x155   :  { %9781 = vmatmul.mubr.msk.f32.gmra.mrb[114].mxu0 %vm32_vm0, %v14531_v3 }
 0x156   :  { %9783 = vmatprep.mubr.msk.f32.mxu0 %vm32_vm0, %v14532_v34  ;;  %v14543_v34 = vld [vmem:[#allocation29_spill] sm:$0xff] }
 0x157   :  { %v9522_v42 = vpop.f32.mrb[46].mxu1 }
 0x158   :  { %v9622_v15 = vpop.f32.mrb[40].mxu0  ;;  %v696_v25 = vpop.f32.mrb[47].mxu1  ;;  %v14544_v42 = vld [vmem:[#allocation30_spill] sm:$0xff] }
 0x159   :  { %v12424_v19 = vadd.f32 %v9622_v15, %v12310_v58  ;;  %v1463_v21 = vpop.f32.mrb[41].mxu0  ;;  %9784 = vmatmul.mubr.msk.f32.gmra.mrb[24].mxu0 %vm32_vm0, %v14533_v44  ;;  %v14536_v58 = vld [vmem:[#allocation22_spill] sm:$0xff]  ;;  %v14545_v44 = vld [vmem:[#allocation31_spill] sm:$0xff] }
 0x15a   :  { %9786 = vmatprep.mubr.msk.f32.mxu0 %vm32_vm0, %v14534_v48 }
 0x15b   :  { %v9575_v20 = vpop.f32.mrb[48].mxu1 }
 0x15c   :  { %v9625_v46 = vpop.f32.mrb[42].mxu0  ;;  %v1069_v53 = vadd.f32 %v9575_v20, %v9501_v40  ;;  %v1064_v62 = vpop.f32.mrb[49].mxu1 }
 0x15d   :  { %v1472_v51 = vpop.f32.mrb[43].mxu0  ;;  %9787 = vmatmul.mubr.msk.f32.gmra.mrb[116].mxu0 %vm32_vm0, %v14535_v61  ;;  %v14546_v46 = vld [vmem:[#allocation32_spill] sm:$0xff]  ;;  %v14548_v62 = vld [vmem:[#allocation33_spill] sm:$0xff] }
 0x15e   :  { %v12433_v16 = vadd.f32 %v1472_v51, %v12318_v5  ;;  %9789 = vmatprep.mubr.msk.f32.mxu0 %vm32_vm0, %v14536_v58 }
 0x15f   :  { %v9578_v4 = vpop.f32.mrb[50].mxu1 }
 0x160   :  { %v1073_v12 = vpop.f32.mrb[51].mxu1  ;;  %v14550_v4 = vld [vmem:[#allocation34_spill] sm:$0xff] }
 0x161   :  { %9790 = vmatmul.mubr.msk.f32.gmra.mrb[118].mxu0 %vm32_vm0, %v14537_v13  ;;  %v1074_v33 = vadd.f32 %v1073_v12, %v640_v49 }
 0x162   :  { %9792 = vmatprep.mubr.msk.f32.mxu0 %vm32_vm0, %v14538_v14 }
 0x163   :  { %v12441_v39 = vpop.f32.mrb[36].mxu1 }
 0x164   :  { %v9631_v35 = vpop.f32.mrb[44].mxu0  ;;  %14539 = vst [vmem:[#allocation6_spill] sm:$0xff] %v12441_v39  ;;  %v12448_v30 = vpop.f32.mrb[37].mxu1  ;;  %v14562_v39 = vld [vmem:[#allocation44_spill] sm:$0xff] }
 0x165   :  { %v12444_v40 = vadd.f32 %v9631_v35, %v12336_v50  ;;  %v1491_v5 = vpop.f32.mrb[45].mxu0  ;;  %9793 = vmatmul.mubr.msk.f32.gmra.mrb[30].mxu0 %vm32_vm0, %v14540_v43  ;;  %14541 = vst [vmem:[#allocation7_spill] sm:$0xff] %v12448_v30  ;;  %v14551_v35 = vld [vmem:[#allocation35_spill] sm:$0xff]  ;;  %v14552_v43 = vld [vmem:[#allocation36_spill] sm:$0xff] }
 0x166   :  { %9795 = vmatprep.mubr.msk.f32.mxu0 %vm32_vm0, %v14542_v52 }
 0x167   :  { %v9584_v3 = vpop.f32.mrb[52].mxu1 }
 0x168   :  { %v9634_v32 = vpop.f32.mrb[46].mxu0  ;;  %v1097_v49 = vadd.f32 %v9584_v3, %v9510_v41  ;;  %v1092_v15 = vpop.f32.mrb[53].mxu1 }
 0x169   :  { %v1500_v11 = vpop.f32.mrb[47].mxu0  ;;  %9796 = vmatmul.mubr.msk.f32.gmra.mrb[120].mxu0 %vm32_vm0, %v14543_v34  ;;  %v14553_v32 = vld [vmem:[#allocation37_spill] sm:$0xff] }
 0x16a   :  { %v12455_v50 = vadd.f32 %v1500_v11, %v12349_v45  ;;  %9798 = vmatprep.mubr.msk.f32.mxu0 %vm32_vm0, %v14544_v42  ;;  %v14554_v11 = vld [vmem:[#allocation38_spill] sm:$0xff] }
 0x16b   :  { %v9587_v21 = vpop.f32.mrb[54].mxu1 }
 0x16c   :  { %v1101_v48 = vpop.f32.mrb[55].mxu1  ;;  %v14555_v21 = vld [vmem:[#allocation39_spill] sm:$0xff] }
 0x16d   :  { %9799 = vmatmul.mubr.msk.f32.gmra.mrb[122].mxu0 %vm32_vm0, %v14545_v44  ;;  %v1102_v20 = vadd.f32 %v1101_v48, %v668_v54  ;;  %v12491_v44 = vld [vmem:[#allocation2 + $0x198] sm:$0xff]  ;;  %v12493_v48 = vld [vmem:[#allocation2 + $0x1a0] sm:$0xff] }
 0x16e   :  { %9801 = vmatprep.mubr.msk.f32.mxu0 %vm32_vm0, %v14546_v46 }
 0x16f   :  { %v12463_v61 = vpop.f32.mrb[42].mxu1 }
 0x170   :  { %v9640_v51 = vpop.f32.mrb[48].mxu0  ;;  %14547 = vst [vmem:[#allocation8_spill] sm:$0xff] %v12463_v61  ;;  %v12470_v58 = vpop.f32.mrb[43].mxu1  ;;  %v14560_v61 = vld [vmem:[#allocation42_spill] sm:$0xff] }
 0x171   :  { %v12466_v41 = vadd.f32 %v9640_v51, %v12363_v0  ;;  %v1519_v45 = vpop.f32.mrb[49].mxu0  ;;  %9802 = vmatmul.mubr.msk.f32.gmra.mrb[56].mxu0 %vm32_vm0, %v14548_v62  ;;  %14549 = vst [vmem:[#allocation9_spill] sm:$0xff] %v12470_v58  ;;  %v2684_v62 = vld [vmem:[#allocation2 + $0x41] sm:$0xff] }
 0x172   :  { %9804 = vmatprep.mubr.msk.f32.mxu0 %vm32_vm0, %v14550_v4  ;;  %v14557_v45 = vld [vmem:[#allocation26_spill] sm:$0xff] }
 0x173   :  { %v9593_v12 = vpop.f32.mrb[56].mxu1 }
 0x174   :  { %v9643_v13 = vpop.f32.mrb[50].mxu0  ;;  %v1125_v54 = vadd.f32 %v9593_v12, %v9519_v8  ;;  %v1120_v5 = vpop.f32.mrb[57].mxu1 }
 0x175   :  { %v1528_v14 = vpop.f32.mrb[51].mxu0  ;;  %9805 = vmatmul.mubr.msk.f32.gmra.mrb[124].mxu0 %vm32_vm0, %v14551_v35  ;;  %v12510_v13 = vld [vmem:[%s14393_s1 + $0x38] sm:$0xff]  ;;  %v12518_v35 = vld [vmem:[#allocation2 + $0x49] sm:$0xff] }
 0x176   :  { %v12477_v0 = vadd.f32 %v1528_v14, %v12371_v36  ;;  %9807 = vmatprep.mubr.msk.f32.mxu0 %vm32_vm0, %v14552_v43  ;;  %v14556_v36 = vld [vmem:[#allocation40_spill] sm:$0xff] }
 0x177   :  { %v9596_v52 = vpop.f32.mrb[58].mxu1  ;;  %v14558_v14 = vld [vmem:[#allocation28_spill] sm:$0xff] }
 0x178   :  { %v1129_v3 = vpop.f32.mrb[59].mxu1  ;;  %v12520_v5 = vld [vmem:[#allocation2 + $0x51] sm:$0xff] }
 0x179   :  { %9808 = vmatmul.mubr.msk.f32.gmra.mrb[126].mxu0 %vm32_vm0, %v14553_v32  ;;  %v1130_v34 = vadd.f32 %v1129_v3, %v696_v25  ;;  %v12529_v32 = vld [vmem:[#allocation2 + $0x59] sm:$0xff]  ;;  %v12537_v3 = vld [vmem:[#allocation2 + $0x69] sm:$0xff] }
 0x17a   :  { %9810 = vmatprep.mubr.msk.f32.mxu0 %vm32_vm0, %v14554_v11  ;;  %v12539_v11 = vld [vmem:[#allocation2 + $0x71] sm:$0xff] }
 0x17c   :  { %v9649_v15 = vpop.f32.mrb[52].mxu0 }
 0x17d   :  { %v12485_v42 = vadd.f32 %v9649_v15, %v1069_v53  ;;  %v1547_v8 = vpop.f32.mrb[53].mxu0  ;;  %9811 = vmatmul.mubr.msk.f32.gmra.mrb[62].mxu0 %vm32_vm0, %v14555_v21  ;;  %v12501_v53 = vld [vmem:[#allocation2 + $0x1a8] sm:$0xff]  ;;  %v12547_v21 = vld [vmem:[#allocation2 + $0x79] sm:$0xff] }
 0x17e   :  { %9813 = vmatprep.mubr.msk.f32.mxu0 %vm32_vm0, %v14556_v36  ;;  %v12549_v36 = vld [vmem:[#allocation2 + $0x81] sm:$0xff] }
 0x180   :  { %v9652_v46 = vpop.f32.mrb[54].mxu0 }
 0x181   :  { %v1556_v51 = vpop.f32.mrb[55].mxu0  ;;  %9814 = vmatmul.mubr.msk.f32.gmra.mrb[128].mxu0 %vm32_vm0, %v12491_v44 }
 0x182   :  { %v12497_v25 = vadd.f32 %v1556_v51, %v1074_v33  ;;  %9816 = vmatprep.mubr.msk.f32.mxu0 %vm32_vm0, %v12493_v48 }
 0x185   :  { %9817 = vmatmul.mubr.msk.f32.gmra.mrb[130].mxu0 %vm32_vm0, %v12501_v53 }
 0x186   :  { %9821 = vmatprep.mubr.msk.f32.mxu0 %vm32_vm0, %v14557_v45 }
 0x188   :  { %v9658_v4 = vpop.f32.mrb[58].mxu0 }
 0x189   :  { %v12512_v33 = vadd.f32 %v9658_v4, %v1097_v49  ;;  %v1575_v12 = vpop.f32.mrb[59].mxu0  ;;  %9822 = vmatmul.mubr.msk.f32.vlgmr.msra.gmra.mrb[0].mxu0 %vm32_vm0, %v14558_v14  ;;  %v12565_v4 = vld [vmem:[#allocation2 + $0x99] sm:$0xff] }
 0x18a   :  { %9894 = vmatpush3.msra.mxu0 %v12345_v37  ;;  %9824 = vmatprep.mubr.msk.f32.mxu0 %vm32_vm0, %v2684_v62  ;;  %v12531_v37 = vld [vmem:[#allocation2 + $0x61] sm:$0xff]  ;;  %v12559_v62 = vld [vmem:[#allocation2 + $0x91] sm:$0xff] }
 0x18b   :  { %9967 = vmatprep.subr.mxu0 %v12510_v13  ;;  %v12567_v12 = vld [vmem:[#allocation2 + $0xa1] sm:$0xff] }
 0x18c   :  { %v9661_v43 = vpop.f32.mrb[60].mxu0 }
 0x18d   :  { %v1584_v52 = vpop.f32.mrb[61].mxu0  ;;  %9825 = vmatmul.mubr.msk.f32.gmra.mrb[132].mxu0 %vm32_vm0, %v12518_v35 }
 0x18e   :  { %v12525_v49 = vadd.f32 %v1584_v52, %v1102_v20  ;;  %9827 = vmatprep.mubr.msk.f32.mxu0 %vm32_vm0, %v12520_v5  ;;  %v12576_v52 = vld [vmem:[#allocation2 + $0xa9] sm:$0xff] }
 0x191   :  { %9828 = vmatmul.mubr.msk.f32.gmra.mrb[134].mxu0 %vm32_vm0, %v12529_v32 }
 0x192   :  { %9830 = vmatprep.mubr.msk.f32.mxu0 %vm32_vm0, %v12531_v37 }
 0x194   :  { %v9667_v15 = vpop.f32.mrb[64].mxu0 }
 0x195   :  { %v12541_v20 = vadd.f32 %v9667_v15, %v1125_v54  ;;  %v1603_v8 = vpop.f32.mrb[65].mxu0  ;;  %9831 = vmatmul.mubr.msk.f32.gmra.mrb[6].mxu0 %vm32_vm0, %v12537_v3  ;;  %v12557_v54 = vld [vmem:[#allocation2 + $0x89] sm:$0xff]  ;;  %v12578_v15 = vld [vmem:[#allocation2 + $0xb1] sm:$0xff] }
 0x196   :  { %9833 = vmatprep.mubr.msk.f32.mxu0 %vm32_vm0, %v12539_v11 }
 0x198   :  { %v9670_v46 = vpop.f32.mrb[66].mxu0 }
 0x199   :  { %v1612_v51 = vpop.f32.mrb[67].mxu0  ;;  %9834 = vmatmul.mubr.msk.f32.gmra.mrb[136].mxu0 %vm32_vm0, %v12547_v21 }
 0x19a   :  { %v12553_v45 = vadd.f32 %v1612_v51, %v1130_v34  ;;  %9836 = vmatprep.mubr.msk.f32.mxu0 %vm32_vm0, %v12549_v36 }
 0x19d   :  { %9837 = vmatmul.mubr.msk.f32.gmra.mrb[138].mxu0 %vm32_vm0, %v12557_v54 }
 0x19e   :  { %9839 = vmatprep.mubr.msk.f32.mxu0 %vm32_vm0, %v12559_v62 }
 0x1a0   :  { %v9678_v14 = vpop.f32.mrb[68].mxu0 }
 0x1a1   :  { %v12570_v34 = vadd.f32 %v9678_v14, %v12388_v23  ;;  %v1922_v43 = vpop.f32.mrb[69].mxu0  ;;  %9840 = vmatmul.mubr.msk.f32.gmra.mrb[12].mxu0 %vm32_vm0, %v12565_v4  ;;  %v12587_v23 = vld [vmem:[#allocation2 + $0xc1] sm:$0xff]  ;;  %v14559_v14 = vld [vmem:[#allocation41_spill] sm:$0xff] }
 0x1a2   :  { %9842 = vmatprep.mubr.msk.f32.mxu0 %vm32_vm0, %v12567_v12 }
 0x1a4   :  { %v9681_v8 = vpop.f32.mrb[70].mxu0 }
 0x1a5   :  { %v1931_v46 = vpop.f32.mrb[71].mxu0  ;;  %9843 = vmatmul.mubr.msk.f32.gmra.mrb[140].mxu0 %vm32_vm0, %v12576_v52 }
 0x1a6   :  { %v12583_v51 = vadd.f32 %v1931_v46, %v12397_v26  ;;  %9845 = vmatprep.mubr.msk.f32.mxu0 %vm32_vm0, %v12578_v15  ;;  %v14561_v26 = vld [vmem:[#allocation43_spill] sm:$0xff] }
 0x1a9   :  { %9846 = vmatmul.mubr.msk.f32.gmra.mrb[142].mxu0 %vm32_vm0, %v14559_v14 }
 0x1aa   :  { %9848 = vmatprep.mubr.msk.f32.mxu0 %vm32_vm0, %v12587_v23 }
 0x1ac   :  { %v9687_v43 = vpop.f32.mrb[72].mxu0 }
 0x1ad   :  { %v12594_v8 = vadd.f32 %v9687_v43, %v12406_v9  ;;  %v1950_v58 = vpop.f32.mrb[73].mxu0  ;;  %9849 = vmatmul.mubr.msk.f32.gmra.mrb[18].mxu0 %vm32_vm0, %v14560_v61  ;;  %v14564_v9 = vld [vmem:[#allocation46_spill] sm:$0xff] }
 0x1ae   :  { %9851 = vmatprep.mubr.msk.f32.mxu0 %vm32_vm0, %v14561_v26  ;;  %v14565_v58 = vld [vmem:[#allocation47_spill] sm:$0xff] }
 0x1b0   :  { %v9690_v46 = vpop.f32.mrb[74].mxu0 }
 0x1b1   :  { %v1959_v30 = vpop.f32.mrb[75].mxu0  ;;  %9852 = vmatmul.mubr.msk.f32.gmra.mrb[144].mxu0 %vm32_vm0, %v14562_v39  ;;  %v14566_v46 = vld [vmem:[#allocation48_spill] sm:$0xff]  ;;  %v14567_v39 = vld [vmem:[#allocation49_spill] sm:$0xff] }
 0x1b2   :  { %v12603_v14 = vadd.f32 %v1959_v30, %v12415_v22  ;;  %9854 = vmatprep.mubr.msk.f32.mxu0 %vm32_vm0, %v14563_v38  ;;  %v14568_v38 = vld [vmem:[#allocation50_spill] sm:$0xff] }
 0x1b5   :  { %9855 = vmatmul.mubr.msk.f32.gmra.mrb[146].mxu0 %vm32_vm0, %v14564_v9 }
 0x1b6   :  { %9857 = vmatprep.mubr.msk.f32.mxu0 %vm32_vm0, %v14565_v58  ;;  %v14569_v58 = vld [vmem:[#allocation51_spill] sm:$0xff] }
 0x1b8   :  { %v9696_v61 = vpop.f32.mrb[76].mxu0 }
 0x1b9   :  { %v12612_v43 = vadd.f32 %v9696_v61, %v12424_v19  ;;  %v1978_v26 = vpop.f32.mrb[77].mxu0  ;;  %9858 = vmatmul.mubr.msk.f32.gmra.mrb[24].mxu0 %vm32_vm0, %v14566_v46  ;;  %v14570_v19 = vld [vmem:[#allocation52_spill] sm:$0xff]  ;;  %v14571_v61 = vld [vmem:[#allocation53_spill] sm:$0xff] }
 0x1ba   :  { %9860 = vmatprep.mubr.msk.f32.mxu0 %vm32_vm0, %v14567_v39 }
 0x1bc   :  { %v9699_v22 = vpop.f32.mrb[78].mxu0 }
 0x1bd   :  { %v1987_v30 = vpop.f32.mrb[79].mxu0  ;;  %9861 = vmatmul.mubr.msk.f32.gmra.mrb[148].mxu0 %vm32_vm0, %v14568_v38  ;;  %v14572_v22 = vld [vmem:[#allocation54_spill] sm:$0xff]  ;;  %v14573_v38 = vld [vmem:[#allocation55_spill] sm:$0xff] }
 0x1be   :  { %v12621_v9 = vadd.f32 %v1987_v30, %v12433_v16  ;;  %9863 = vmatprep.mubr.msk.f32.mxu0 %vm32_vm0, %v14569_v58  ;;  %v14574_v58 = vld [vmem:[#allocation56_spill] sm:$0xff] }
 0x1c1   :  { %9864 = vmatmul.mubr.msk.f32.gmra.mrb[150].mxu0 %vm32_vm0, %v14570_v19 }
 0x1c2   :  { %9866 = vmatprep.mubr.msk.f32.mxu0 %vm32_vm0, %v14571_v61  ;;  %v14575_v61 = vld [vmem:[#allocation57_spill] sm:$0xff] }
 0x1c4   :  { %v9705_v26 = vpop.f32.mrb[80].mxu0 }
 0x1c5   :  { %v12630_v46 = vadd.f32 %v9705_v26, %v12444_v40  ;;  %v2006_v39 = vpop.f32.mrb[81].mxu0  ;;  %9867 = vmatmul.mubr.msk.f32.gmra.mrb[30].mxu0 %vm32_vm0, %v14572_v22  ;;  %v14576_v40 = vld [vmem:[#allocation58_spill] sm:$0xff]  ;;  %v14577_v26 = vld [vmem:[#allocation59_spill] sm:$0xff] }
 0x1c6   :  { %9869 = vmatprep.mubr.msk.f32.mxu0 %vm32_vm0, %v14573_v38 }
 0x1c8   :  { %v9708_v16 = vpop.f32.mrb[82].mxu0 }
 0x1c9   :  { %v2015_v30 = vpop.f32.mrb[83].mxu0  ;;  %9870 = vmatmul.mubr.msk.f32.gmra.mrb[152].mxu0 %vm32_vm0, %v14574_v58  ;;  %v14578_v16 = vld [vmem:[#allocation60_spill] sm:$0xff]  ;;  %v14579_v58 = vld [vmem:[#allocation61_spill] sm:$0xff] }
 0x1ca   :  { %v12639_v19 = vadd.f32 %v2015_v30, %v12455_v50  ;;  %9872 = vmatprep.mubr.msk.f32.mxu0 %vm32_vm0, %v14575_v61 }
 0x1cd   :  { %9873 = vmatmul.mubr.msk.f32.gmra.mrb[154].mxu0 %vm32_vm0, %v14576_v40 }
 0x1ce   :  { %9875 = vmatprep.mubr.msk.f32.mxu0 %vm32_vm0, %v14577_v26 }
 0x1d0   :  { %v9714_v39 = vpop.f32.mrb[84].mxu0 }
 0x1d1   :  { %v12648_v22 = vadd.f32 %v9714_v39, %v12466_v41  ;;  %v2034_v38 = vpop.f32.mrb[85].mxu0  ;;  %9876 = vmatmul.mubr.msk.f32.gmra.mrb[56].mxu0 %vm32_vm0, %v14578_v16  ;;  %v14580_v41 = vld [vmem:[#allocation62_spill] sm:$0xff]  ;;  %v3199_v16 = vld [vmem:[#allocation2 + $0x57] sm:$0xff] }
 0x1d2   :  { %9878 = vmatprep.mubr.msk.f32.mxu0 %vm32_vm0, %v12173_v2 }
 0x1d4   :  { %v9717_v50 = vpop.f32.mrb[86].mxu0 }
 0x1d5   :  { %v2043_v30 = vpop.f32.mrb[87].mxu0  ;;  %9879 = vmatmul.mubr.msk.f32.gmra.mrb[156].mxu0 %vm32_vm0, %v14579_v58 }
 0x1d6   :  { %v12657_v61 = vadd.f32 %v2043_v30, %v12477_v0  ;;  %9881 = vmatprep.mubr.msk.f32.mxu0 %vm32_vm0, %v12181_v1  ;;  %v12672_v0 = vld [vmem:[#allocation2 + $0x199] sm:$0xff]  ;;  %v12674_v1 = vld [vmem:[#allocation2 + $0x1a1] sm:$0xff] }
 0x1d7   :  { %v12691_v30 = vld [vmem:[%s14393_s1 + $0x40] sm:$0xff] }
 0x1d9   :  { %9882 = vmatmul.mubr.msk.f32.gmra.mrb[158].mxu0 %vm32_vm0, %v14580_v41  ;;  %v3200_v41 = vld [vmem:[#allocation2 + $0x5f] sm:$0xff] }
 0x1da   :  { %9884 = vmatprep.mubr.msk.f32.mxu0 %vm32_vm0, %v12189_v18 }
 0x1dc   :  { %v9723_v40 = vpop.f32.mrb[88].mxu0 }
 0x1dd   :  { %v12666_v2 = vadd.f32 %v9723_v40, %v12485_v42  ;;  %v2062_v26 = vpop.f32.mrb[89].mxu0  ;;  %9885 = vmatmul.mubr.msk.f32.gmra.mrb[62].mxu0 %vm32_vm0, %v12191_v59  ;;  %v12683_v42 = vld [vmem:[#allocation2 + $0x1a9] sm:$0xff] }
 0x1de   :  { %9887 = vmatprep.mubr.msk.f32.mxu0 %vm32_vm0, %v12197_v56  ;;  %v3197_v59 = vld [vmem:[#allocation2 + $0x47] sm:$0xff]  ;;  %v3198_v56 = vld [vmem:[#allocation2 + $0x4f] sm:$0xff] }
 0x1df   :  { %v3201_v40 = vld [vmem:[#allocation2 + $0x67] sm:$0xff] }
 0x1e0   :  { %v9726_v39 = vpop.f32.mrb[90].mxu0 }
 0x1e1   :  { %v2071_v38 = vpop.f32.mrb[91].mxu0  ;;  %9888 = vmatmul.mubr.msk.f32.gmra.mrb[160].mxu0 %vm32_vm0, %v12672_v0 }
 0x1e2   :  { %v12679_v18 = vadd.f32 %v2071_v38, %v12497_v25  ;;  %9890 = vmatprep.mubr.msk.f32.mxu0 %vm32_vm0, %v12674_v1 }
 0x1e5   :  { %9891 = vmatmul.mubr.msk.f32.gmra.mrb[162].mxu0 %vm32_vm0, %v12683_v42 }
 0x1e6   :  { %9895 = vmatprep.mubr.msk.f32.mxu0 %vm32_vm0, %v3197_v59  ;;  %v3203_v59 = vld [vmem:[#allocation2 + $0x77] sm:$0xff] }
 0x1e8   :  { %v9732_v50 = vpop.f32.mrb[92].mxu0 }
 0x1e9   :  { %v12694_v25 = vadd.f32 %v9732_v50, %v12512_v33  ;;  %v2090_v58 = vpop.f32.mrb[93].mxu0  ;;  %9896 = vmatmul.mubr.msk.f32.vlgmr.msra.gmra.mrb[0].mxu0 %vm32_vm0, %v3198_v56  ;;  %v3202_v33 = vld [vmem:[#allocation2 + $0x6f] sm:$0xff]  ;;  %v3205_v56 = vld [vmem:[#allocation2 + $0x87] sm:$0xff] }
 0x1ea   :  { %9968 = vmatpush3.msra.mxu0 %v12510_v13  ;;  %9898 = vmatprep.mubr.msk.f32.mxu0 %vm32_vm0, %v3199_v16  ;;  %v3204_v13 = vld [vmem:[#allocation2 + $0x7f] sm:$0xff] }
 0x1eb   :  { %10041 = vmatprep.subr.mxu0 %v12691_v30 }
 0x1ec   :  { %v9735_v26 = vpop.f32.mrb[94].mxu0 }
 0x1ed   :  { %v2099_v39 = vpop.f32.mrb[95].mxu0  ;;  %9899 = vmatmul.mubr.msk.f32.gmra.mrb[164].mxu0 %vm32_vm0, %v3200_v41  ;;  %v3207_v41 = vld [vmem:[#allocation2 + $0x97] sm:$0xff] }
 0x1ee   :  { %v12702_v38 = vadd.f32 %v2099_v39, %v12525_v49  ;;  %9901 = vmatprep.mubr.msk.f32.mxu0 %vm32_vm0, %v3201_v40  ;;  %v3206_v49 = vld [vmem:[#allocation2 + $0x8f] sm:$0xff] }
 0x1f1   :  { %9902 = vmatmul.mubr.msk.f32.gmra.mrb[166].mxu0 %vm32_vm0, %v3202_v33  ;;  %v3208_v33 = vld [vmem:[#allocation2 + $0x9f] sm:$0xff] }
 0x1f2   :  { %9904 = vmatprep.mubr.msk.f32.mxu0 %vm32_vm0, %v3203_v59  ;;  %v3209_v59 = vld [vmem:[#allocation2 + $0xa7] sm:$0xff] }
 0x1f4   :  { %v9741_v16 = vpop.f32.mrb[96].mxu0 }
 0x1f5   :  { %v12708_v50 = vadd.f32 %v9741_v16, %v12541_v20  ;;  %v2118_v58 = vpop.f32.mrb[97].mxu0  ;;  %9905 = vmatmul.mubr.msk.f32.gmra.mrb[6].mxu0 %vm32_vm0, %v3204_v13  ;;  %v3210_v20 = vld [vmem:[#allocation2 + $0xaf] sm:$0xff]  ;;  %v3211_v13 = vld [vmem:[#allocation2 + $0xb7] sm:$0xff] }
 0x1f6   :  { %9907 = vmatprep.mubr.msk.f32.mxu0 %vm32_vm0, %v3205_v56 }
 0x1f8   :  { %v9744_v40 = vpop.f32.mrb[98].mxu0 }
 0x1f9   :  { %v2127_v26 = vpop.f32.mrb[99].mxu0  ;;  %9908 = vmatmul.mubr.msk.f32.gmra.mrb[168].mxu0 %vm32_vm0, %v3206_v49  ;;  %v3213_v49 = vld [vmem:[#allocation2 + $0xc7] sm:$0xff] }
 0x1fa   :  { %v12714_v39 = vadd.f32 %v2127_v26, %v12553_v45  ;;  %9910 = vmatprep.mubr.msk.f32.mxu0 %vm32_vm0, %v3207_v41  ;;  %v3212_v45 = vld [vmem:[#allocation2 + $0xbf] sm:$0xff] }
 0x1fd   :  { %9911 = vmatmul.mubr.msk.f32.gmra.mrb[170].mxu0 %vm32_vm0, %v3208_v33  ;;  %v3214_v33 = vld [vmem:[#allocation2 + $0xcf] sm:$0xff] }
 0x1fe   :  { %9913 = vmatprep.mubr.msk.f32.mxu0 %vm32_vm0, %v3209_v59  ;;  %v3215_v59 = vld [vmem:[#allocation2 + $0xd7] sm:$0xff] }
 0x200   :  { %v9752_v56 = vpop.f32.mrb[100].mxu0 }
 0x201   :  { %v12720_v16 = vadd.f32 %v9752_v56, %v12570_v34  ;;  %v2437_v58 = vpop.f32.mrb[101].mxu0  ;;  %9914 = vmatmul.mubr.msk.f32.gmra.mrb[12].mxu0 %vm32_vm0, %v3210_v20  ;;  %v3216_v34 = vld [vmem:[#allocation2 + $0xdf] sm:$0xff]  ;;  %v3217_v20 = vld [vmem:[#allocation2 + $0xe7] sm:$0xff] }
 0x202   :  { %9916 = vmatprep.mubr.msk.f32.mxu0 %vm32_vm0, %v3211_v13 }
 0x204   :  { %v9755_v41 = vpop.f32.mrb[102].mxu0 }
 0x205   :  { %v2446_v40 = vpop.f32.mrb[103].mxu0  ;;  %9917 = vmatmul.mubr.msk.f32.gmra.mrb[172].mxu0 %vm32_vm0, %v3212_v45  ;;  %v3219_v45 = vld [vmem:[#allocation2 + $0xf7] sm:$0xff] }
 0x206   :  { %v12726_v26 = vadd.f32 %v2446_v40, %v12583_v51  ;;  %9919 = vmatprep.mubr.msk.f32.mxu0 %vm32_vm0, %v3213_v49  ;;  %v3218_v51 = vld [vmem:[#allocation2 + $0xef] sm:$0xff] }
 0x209   :  { %9920 = vmatmul.mubr.msk.f32.gmra.mrb[174].mxu0 %vm32_vm0, %v3214_v33  ;;  %v3220_v33 = vld [vmem:[#allocation2 + $0xff] sm:$0xff] }
 0x20a   :  { %9922 = vmatprep.mubr.msk.f32.mxu0 %vm32_vm0, %v3215_v59  ;;  %v3221_v59 = vld [vmem:[#allocation2 + $0x107] sm:$0xff] }
 0x20c   :  { %v9761_v13 = vpop.f32.mrb[104].mxu0 }
 0x20d   :  { %v12732_v56 = vadd.f32 %v9761_v13, %v12594_v8  ;;  %v2465_v58 = vpop.f32.mrb[105].mxu0  ;;  %9923 = vmatmul.mubr.msk.f32.gmra.mrb[18].mxu0 %vm32_vm0, %v3216_v34  ;;  %v3222_v8 = vld [vmem:[#allocation2 + $0x10f] sm:$0xff]  ;;  %v3223_v34 = vld [vmem:[#allocation2 + $0x117] sm:$0xff] }
 0x20e   :  { %9925 = vmatprep.mubr.msk.f32.mxu0 %vm32_vm0, %v3217_v20 }
 0x210   :  { %v9764_v49 = vpop.f32.mrb[106].mxu0 }
 0x211   :  { %v2474_v41 = vpop.f32.mrb[107].mxu0  ;;  %9926 = vmatmul.mubr.msk.f32.gmra.mrb[176].mxu0 %vm32_vm0, %v3218_v51  ;;  %v3225_v51 = vld [vmem:[#allocation2 + $0x127] sm:$0xff] }
 0x212   :  { %v12738_v40 = vadd.f32 %v2474_v41, %v12603_v14  ;;  %9928 = vmatprep.mubr.msk.f32.mxu0 %vm32_vm0, %v3219_v45  ;;  %v3224_v14 = vld [vmem:[#allocation2 + $0x11f] sm:$0xff] }
 0x215   :  { %9929 = vmatmul.mubr.msk.f32.gmra.mrb[178].mxu0 %vm32_vm0, %v3220_v33  ;;  %v3226_v33 = vld [vmem:[#allocation2 + $0x12f] sm:$0xff] }
 0x216   :  { %9931 = vmatprep.mubr.msk.f32.mxu0 %vm32_vm0, %v3221_v59  ;;  %v3227_v59 = vld [vmem:[#allocation2 + $0x137] sm:$0xff] }
 0x218   :  { %v9770_v20 = vpop.f32.mrb[108].mxu0 }
 0x219   :  { %v12744_v13 = vadd.f32 %v9770_v20, %v12612_v43  ;;  %v2493_v58 = vpop.f32.mrb[109].mxu0  ;;  %9932 = vmatmul.mubr.msk.f32.gmra.mrb[24].mxu0 %vm32_vm0, %v3222_v8  ;;  %v3228_v43 = vld [vmem:[#allocation2 + $0x13f] sm:$0xff]  ;;  %v3229_v8 = vld [vmem:[#allocation2 + $0x147] sm:$0xff] }
 0x21a   :  { %9934 = vmatprep.mubr.msk.f32.mxu0 %vm32_vm0, %v3223_v34 }
 0x21c   :  { %v9773_v45 = vpop.f32.mrb[110].mxu0 }
 0x21d   :  { %v2502_v49 = vpop.f32.mrb[111].mxu0  ;;  %9935 = vmatmul.mubr.msk.f32.gmra.mrb[180].mxu0 %vm32_vm0, %v3224_v14  ;;  %v3231_v14 = vld [vmem:[#allocation2 + $0x157] sm:$0xff] }
 0x21e   :  { %v12750_v41 = vadd.f32 %v2502_v49, %v12621_v9  ;;  %9937 = vmatprep.mubr.msk.f32.mxu0 %vm32_vm0, %v3225_v51  ;;  %v3230_v9 = vld [vmem:[#allocation2 + $0x14f] sm:$0xff] }
 0x221   :  { %9938 = vmatmul.mubr.msk.f32.gmra.mrb[182].mxu0 %vm32_vm0, %v3226_v33  ;;  %v3232_v33 = vld [vmem:[#allocation2 + $0x15f] sm:$0xff] }
 0x222   :  { %9940 = vmatprep.mubr.msk.f32.mxu0 %vm32_vm0, %v3227_v59  ;;  %v3233_v59 = vld [vmem:[#allocation2 + $0x167] sm:$0xff] }
 0x224   :  { %v9779_v34 = vpop.f32.mrb[112].mxu0 }
 0x225   :  { %v12756_v20 = vadd.f32 %v9779_v34, %v12630_v46  ;;  %v2521_v58 = vpop.f32.mrb[113].mxu0  ;;  %9941 = vmatmul.mubr.msk.f32.gmra.mrb[30].mxu0 %vm32_vm0, %v3228_v43  ;;  %v3234_v46 = vld [vmem:[#allocation2 + $0x16f] sm:$0xff]  ;;  %v3235_v43 = vld [vmem:[#allocation2 + $0x177] sm:$0xff] }
 0x226   :  { %9943 = vmatprep.mubr.msk.f32.mxu0 %vm32_vm0, %v3229_v8 }
 0x228   :  { %v9782_v51 = vpop.f32.mrb[114].mxu0 }
 0x229   :  { %v2530_v45 = vpop.f32.mrb[115].mxu0  ;;  %9944 = vmatmul.mubr.msk.f32.gmra.mrb[184].mxu0 %vm32_vm0, %v3230_v9  ;;  %v3237_v9 = vld [vmem:[#allocation2 + $0x187] sm:$0xff] }
 0x22a   :  { %v12762_v49 = vadd.f32 %v2530_v45, %v12639_v19  ;;  %9946 = vmatprep.mubr.msk.f32.mxu0 %vm32_vm0, %v3231_v14  ;;  %v3236_v19 = vld [vmem:[#allocation2 + $0x17f] sm:$0xff] }
 0x22d   :  { %9947 = vmatmul.mubr.msk.f32.gmra.mrb[186].mxu0 %vm32_vm0, %v3232_v33  ;;  %v3238_v33 = vld [vmem:[#allocation2 + $0x18f] sm:$0xff] }
 0x22e   :  { %9949 = vmatprep.mubr.msk.f32.mxu0 %vm32_vm0, %v3233_v59 }
 0x230   :  { %v9788_v8 = vpop.f32.mrb[116].mxu0 }
 0x231   :  { %v12768_v34 = vadd.f32 %v9788_v8, %v12648_v22  ;;  %v2549_v58 = vpop.f32.mrb[117].mxu0  ;;  %9950 = vmatmul.mubr.msk.f32.gmra.mrb[56].mxu0 %vm32_vm0, %v3234_v46 }
 0x232   :  { %9952 = vmatprep.mubr.msk.f32.mxu0 %vm32_vm0, %v3235_v43  ;;  %v3243_v43 = vld [vmem:[#allocation2 + $0x1b7] sm:$0xff] }
 0x234   :  { %v9791_v14 = vpop.f32.mrb[118].mxu0 }
 0x235   :  { %v2558_v51 = vpop.f32.mrb[119].mxu0  ;;  %9953 = vmatmul.mubr.msk.f32.gmra.mrb[188].mxu0 %vm32_vm0, %v3236_v19 }
 0x236   :  { %v12774_v45 = vadd.f32 %v2558_v51, %v12657_v61  ;;  %9955 = vmatprep.mubr.msk.f32.mxu0 %vm32_vm0, %v3237_v9  ;;  %v3242_v61 = vld [vmem:[#allocation2 + $0x1af] sm:$0xff]  ;;  %v3714_v9 = vld [vmem:[#allocation2 + $0x58] sm:$0xff] }
 0x239   :  { %9956 = vmatmul.mubr.msk.f32.gmra.mrb[190].mxu0 %vm32_vm0, %v3238_v33  ;;  %v3716_v33 = vld [vmem:[#allocation2 + $0x68] sm:$0xff] }
 0x23a   :  { %9958 = vmatprep.mubr.msk.f32.mxu0 %vm32_vm0, %v12322_v55  ;;  %v3244_v55 = vld [vmem:[#allocation2 + $0x1bf] sm:$0xff] }
 0x23c   :  { %v9797_v22 = vpop.f32.mrb[120].mxu0 }
 0x23d   :  { %v12781_v59 = vadd.f32 %v9797_v22, %v12666_v2  ;;  %v2577_v46 = vpop.f32.mrb[121].mxu0  ;;  %9959 = vmatmul.mubr.msk.f32.gmra.mrb[62].mxu0 %vm32_vm0, %v12324_v6  ;;  %v3712_v2 = vld [vmem:[#allocation2 + $0x48] sm:$0xff]  ;;  %v3713_v6 = vld [vmem:[#allocation2 + $0x50] sm:$0xff] }
 0x23e   :  { %9961 = vmatprep.mubr.msk.f32.mxu0 %vm32_vm0, %v12334_v63 }
 0x240   :  { %v9800_v8 = vpop.f32.mrb[122].mxu0 }
 0x241   :  { %v2586_v58 = vpop.f32.mrb[123].mxu0  ;;  %9962 = vmatmul.mubr.msk.f32.gmra.mrb[192].mxu0 %vm32_vm0, %v3242_v61  ;;  %v3720_v8 = vld [vmem:[#allocation2 + $0x88] sm:$0xff] }
 0x242   :  { %v12789_v19 = vadd.f32 %v2586_v58, %v12679_v18  ;;  %9964 = vmatprep.mubr.msk.f32.mxu0 %vm32_vm0, %v3243_v43  ;;  %v3715_v18 = vld [vmem:[#allocation2 + $0x60] sm:$0xff]  ;;  %v3718_v43 = vld [vmem:[#allocation2 + $0x78] sm:$0xff] }
 0x245   :  { %9965 = vmatmul.mubr.msk.f32.gmra.mrb[194].mxu0 %vm32_vm0, %v3244_v55 }
 0x246   :  { %9969 = vmatprep.mubr.msk.f32.mxu0 %vm32_vm0, %v3712_v2 }
 0x248   :  { %v9806_v63 = vpop.f32.mrb[124].mxu0 }
 0x249   :  { %v12795_v14 = vadd.f32 %v9806_v63, %v12694_v25  ;;  %v2605_v51 = vpop.f32.mrb[125].mxu0  ;;  %9970 = vmatmul.mubr.msk.f32.vlgmr.msra.gmra.mrb[0].mxu0 %vm32_vm0, %v3713_v6  ;;  %v3717_v25 = vld [vmem:[#allocation2 + $0x70] sm:$0xff]  ;;  %v3722_v6 = vld [vmem:[#allocation2 + $0x98] sm:$0xff] }
 0x24a   :  { %10042 = vmatpush3.msra.mxu0 %v12691_v30  ;;  %9972 = vmatprep.mubr.msk.f32.mxu0 %vm32_vm0, %v3714_v9  ;;  %v3719_v30 = vld [vmem:[#allocation2 + $0x80] sm:$0xff] }
 0x24c   :  { %v9809_v22 = vpop.f32.mrb[126].mxu0 }
 0x24d   :  { %v2614_v46 = vpop.f32.mrb[127].mxu0  ;;  %9973 = vmatmul.mubr.msk.f32.gmra.mrb[196].mxu0 %vm32_vm0, %v3715_v18  ;;  %v3723_v18 = vld [vmem:[#allocation2 + $0xa0] sm:$0xff]  ;;  %v3726_v22 = vld [vmem:[#allocation2 + $0xb8] sm:$0xff] }
 0x24e   :  { %v12802_v61 = vadd.f32 %v2614_v46, %v12702_v38  ;;  %9975 = vmatprep.mubr.msk.f32.mxu0 %vm32_vm0, %v3716_v33  ;;  %v3721_v38 = vld [vmem:[#allocation2 + $0x90] sm:$0xff]  ;;  %v3724_v33 = vld [vmem:[#allocation2 + $0xa8] sm:$0xff] }
 0x251   :  { %9976 = vmatmul.mubr.msk.f32.gmra.mrb[198].mxu0 %vm32_vm0, %v3717_v25 }
 0x252   :  { %9978 = vmatprep.mubr.msk.f32.mxu0 %vm32_vm0, %v3718_v43 }
 0x254   :  { %v9815_v58 = vpop.f32.mrb[128].mxu0 }
 0x255   :  { %v12808_v55 = vadd.f32 %v9815_v58, %v12708_v50  ;;  %v2633_v2 = vpop.f32.mrb[129].mxu0  ;;  %9979 = vmatmul.mubr.msk.f32.gmra.mrb[6].mxu0 %vm32_vm0, %v3719_v30  ;;  %v3725_v50 = vld [vmem:[#allocation2 + $0xb0] sm:$0xff]  ;;  %v3728_v30 = vld [vmem:[#allocation2 + $0xc8] sm:$0xff] }
 0x256   :  { %9981 = vmatprep.mubr.msk.f32.mxu0 %vm32_vm0, %v3720_v8 }
 0x258   :  { %v9818_v9 = vpop.f32.mrb[130].mxu0 }
 0x259   :  { %v2642_v63 = vpop.f32.mrb[131].mxu0  ;;  %9982 = vmatmul.mubr.msk.f32.gmra.mrb[200].mxu0 %vm32_vm0, %v3721_v38  ;;  %v3729_v38 = vld [vmem:[#allocation2 + $0xd0] sm:$0xff]  ;;  %v3732_v9 = vld [vmem:[#allocation2 + $0xe8] sm:$0xff] }
 0x25a   :  { %v12814_v51 = vadd.f32 %v2642_v63, %v12714_v39  ;;  %9984 = vmatprep.mubr.msk.f32.mxu0 %vm32_vm0, %v3722_v6  ;;  %v3727_v39 = vld [vmem:[#allocation2 + $0xc0] sm:$0xff]  ;;  %v3730_v6 = vld [vmem:[#allocation2 + $0xd8] sm:$0xff] }
 0x25d   :  { %9985 = vmatmul.mubr.msk.f32.gmra.mrb[202].mxu0 %vm32_vm0, %v3723_v18 }
 0x25e   :  { %9987 = vmatprep.mubr.msk.f32.mxu0 %vm32_vm0, %v3724_v33 }
 0x260   :  { %v9826_v46 = vpop.f32.mrb[132].mxu0 }
 0x261   :  { %v12820_v25 = vadd.f32 %v9826_v46, %v12720_v16  ;;  %v2952_v43 = vpop.f32.mrb[133].mxu0  ;;  %9988 = vmatmul.mubr.msk.f32.gmra.mrb[12].mxu0 %vm32_vm0, %v3725_v50  ;;  %v3731_v16 = vld [vmem:[#allocation2 + $0xe0] sm:$0xff]  ;;  %v3734_v50 = vld [vmem:[#allocation2 + $0xf8] sm:$0xff] }
 0x262   :  { %9990 = vmatprep.mubr.msk.f32.mxu0 %vm32_vm0, %v3726_v22 }
 0x264   :  { %v9829_v8 = vpop.f32.mrb[134].mxu0 }
 0x265   :  { %v2961_v58 = vpop.f32.mrb[135].mxu0  ;;  %9991 = vmatmul.mubr.msk.f32.gmra.mrb[204].mxu0 %vm32_vm0, %v3727_v39  ;;  %v3735_v39 = vld [vmem:[#allocation2 + $0x100] sm:$0xff]  ;;  %v3738_v8 = vld [vmem:[#allocation2 + $0x118] sm:$0xff] }
 0x266   :  { %v12826_v2 = vadd.f32 %v2961_v58, %v12726_v26  ;;  %9993 = vmatprep.mubr.msk.f32.mxu0 %vm32_vm0, %v3728_v30  ;;  %v3733_v26 = vld [vmem:[#allocation2 + $0xf0] sm:$0xff]  ;;  %v3736_v30 = vld [vmem:[#allocation2 + $0x108] sm:$0xff] }
 0x269   :  { %9994 = vmatmul.mubr.msk.f32.gmra.mrb[206].mxu0 %vm32_vm0, %v3729_v38 }
 0x26a   :  { %9996 = vmatprep.mubr.msk.f32.mxu0 %vm32_vm0, %v3730_v6 }
 0x26c   :  { %v9835_v63 = vpop.f32.mrb[136].mxu0 }
 0x26d   :  { %v12832_v18 = vadd.f32 %v9835_v63, %v12732_v56  ;;  %v2980_v33 = vpop.f32.mrb[137].mxu0  ;;  %9997 = vmatmul.mubr.msk.f32.gmra.mrb[18].mxu0 %vm32_vm0, %v3731_v16  ;;  %v3737_v56 = vld [vmem:[#allocation2 + $0x110] sm:$0xff]  ;;  %v3740_v16 = vld [vmem:[#allocation2 + $0x128] sm:$0xff] }
 0x26e   :  { %9999 = vmatprep.mubr.msk.f32.mxu0 %vm32_vm0, %v3732_v9 }
 0x270   :  { %v9838_v22 = vpop.f32.mrb[138].mxu0 }
 0x271   :  { %v2989_v46 = vpop.f32.mrb[139].mxu0  ;;  %10000 = vmatmul.mubr.msk.f32.gmra.mrb[208].mxu0 %vm32_vm0, %v3733_v26  ;;  %v3741_v26 = vld [vmem:[#allocation2 + $0x130] sm:$0xff]  ;;  %v3744_v22 = vld [vmem:[#allocation2 + $0x148] sm:$0xff] }
 0x272   :  { %v12838_v43 = vadd.f32 %v2989_v46, %v12738_v40  ;;  %10002 = vmatprep.mubr.msk.f32.mxu0 %vm32_vm0, %v3734_v50  ;;  %v3739_v40 = vld [vmem:[#allocation2 + $0x120] sm:$0xff]  ;;  %v3742_v50 = vld [vmem:[#allocation2 + $0x138] sm:$0xff] }
 0x275   :  { %10003 = vmatmul.mubr.msk.f32.gmra.mrb[210].mxu0 %vm32_vm0, %v3735_v39 }
 0x276   :  { %10005 = vmatprep.mubr.msk.f32.mxu0 %vm32_vm0, %v3736_v30 }
 0x278   :  { %v9844_v58 = vpop.f32.mrb[140].mxu0 }
 0x279   :  { %v12844_v38 = vadd.f32 %v9844_v58, %v12744_v13  ;;  %v3008_v6 = vpop.f32.mrb[141].mxu0  ;;  %10006 = vmatmul.mubr.msk.f32.gmra.mrb[24].mxu0 %vm32_vm0, %v3737_v56  ;;  %v3743_v13 = vld [vmem:[#allocation2 + $0x140] sm:$0xff]  ;;  %v3746_v56 = vld [vmem:[#allocation2 + $0x158] sm:$0xff] }
 0x27a   :  { %10008 = vmatprep.mubr.msk.f32.mxu0 %vm32_vm0, %v3738_v8 }
 0x27c   :  { %v9847_v9 = vpop.f32.mrb[142].mxu0 }
 0x27d   :  { %v3017_v63 = vpop.f32.mrb[143].mxu0  ;;  %10009 = vmatmul.mubr.msk.f32.gmra.mrb[212].mxu0 %vm32_vm0, %v3739_v40  ;;  %v3747_v40 = vld [vmem:[#allocation2 + $0x160] sm:$0xff]  ;;  %v3750_v9 = vld [vmem:[#allocation2 + $0x178] sm:$0xff] }
 0x27e   :  { %v12850_v33 = vadd.f32 %v3017_v63, %v12750_v41  ;;  %10011 = vmatprep.mubr.msk.f32.mxu0 %vm32_vm0, %v3740_v16  ;;  %v3745_v41 = vld [vmem:[#allocation2 + $0x150] sm:$0xff]  ;;  %v3748_v16 = vld [vmem:[#allocation2 + $0x168] sm:$0xff] }
 0x281   :  { %10012 = vmatmul.mubr.msk.f32.gmra.mrb[214].mxu0 %vm32_vm0, %v3741_v26 }
 0x282   :  { %10014 = vmatprep.mubr.msk.f32.mxu0 %vm32_vm0, %v3742_v50 }
 0x284   :  { %v9853_v46 = vpop.f32.mrb[144].mxu0 }
 0x285   :  { %v12856_v39 = vadd.f32 %v9853_v46, %v12756_v20  ;;  %v3036_v30 = vpop.f32.mrb[145].mxu0  ;;  %10015 = vmatmul.mubr.msk.f32.gmra.mrb[30].mxu0 %vm32_vm0, %v3743_v13  ;;  %v3749_v20 = vld [vmem:[#allocation2 + $0x170] sm:$0xff]  ;;  %v3752_v13 = vld [vmem:[#allocation2 + $0x188] sm:$0xff] }
 0x286   :  { %10017 = vmatprep.mubr.msk.f32.mxu0 %vm32_vm0, %v3744_v22 }
 0x288   :  { %v9856_v8 = vpop.f32.mrb[146].mxu0 }
 0x289   :  { %v3045_v58 = vpop.f32.mrb[147].mxu0  ;;  %10018 = vmatmul.mubr.msk.f32.gmra.mrb[216].mxu0 %vm32_vm0, %v3745_v41  ;;  %v3753_v41 = vld [vmem:[#allocation2 + $0x190] sm:$0xff] }
 0x28a   :  { %v12862_v6 = vadd.f32 %v3045_v58, %v12762_v49  ;;  %10020 = vmatprep.mubr.msk.f32.mxu0 %vm32_vm0, %v3746_v56  ;;  %v3751_v49 = vld [vmem:[#allocation2 + $0x180] sm:$0xff]  ;;  %v3758_v58 = vld [vmem:[#allocation2 + $0x1b8] sm:$0xff] }
 0x28d   :  { %10021 = vmatmul.mubr.msk.f32.gmra.mrb[218].mxu0 %vm32_vm0, %v3747_v40 }
 0x28e   :  { %10023 = vmatprep.mubr.msk.f32.mxu0 %vm32_vm0, %v3748_v16 }
 0x290   :  { %v9862_v63 = vpop.f32.mrb[148].mxu0 }
 0x291   :  { %v12868_v26 = vadd.f32 %v9862_v63, %v12768_v34  ;;  %v3064_v50 = vpop.f32.mrb[149].mxu0  ;;  %10024 = vmatmul.mubr.msk.f32.gmra.mrb[56].mxu0 %vm32_vm0, %v3749_v20 }
 0x292   :  { %10026 = vmatprep.mubr.msk.f32.mxu0 %vm32_vm0, %v3750_v9 }
 0x294   :  { %v9865_v22 = vpop.f32.mrb[150].mxu0 }
 0x295   :  { %v3073_v46 = vpop.f32.mrb[151].mxu0  ;;  %10027 = vmatmul.mubr.msk.f32.gmra.mrb[220].mxu0 %vm32_vm0, %v3751_v49 }
 0x296   :  { %v12874_v30 = vadd.f32 %v3073_v46, %v12774_v45  ;;  %10029 = vmatprep.mubr.msk.f32.mxu0 %vm32_vm0, %v3752_v13  ;;  %v3757_v45 = vld [vmem:[#allocation2 + $0x1b0] sm:$0xff] }
 0x299   :  { %10030 = vmatmul.mubr.msk.f32.gmra.mrb[222].mxu0 %vm32_vm0, %v3753_v41  ;;  %v4250_v41 = vld [vmem:[#allocation2 + $0x101] sm:$0xff] }
 0x29a   :  { %10032 = vmatprep.mubr.msk.f32.mxu0 %vm32_vm0, %v12491_v44  ;;  %v3759_v44 = vld [vmem:[#allocation2 + $0x1c0] sm:$0xff] }
 0x29c   :  { %v9871_v34 = vpop.f32.mrb[152].mxu0 }
 0x29d   :  { %v12881_v56 = vadd.f32 %v9871_v34, %v12781_v59  ;;  %v3092_v8 = vpop.f32.mrb[153].mxu0  ;;  %10033 = vmatmul.mubr.msk.f32.gmra.mrb[62].mxu0 %vm32_vm0, %v12493_v48  ;;  %v4251_v34 = vld [vmem:[#allocation2 + $0x109] sm:$0xff] }
 0x29e   :  { %10035 = vmatprep.mubr.msk.f32.mxu0 %vm32_vm0, %v12501_v53  ;;  %v4253_v8 = vld [vmem:[#allocation2 + $0x119] sm:$0xff] }
 0x2a0   :  { %v9874_v40 = vpop.f32.mrb[154].mxu0 }
 0x2a1   :  { %v3101_v16 = vpop.f32.mrb[155].mxu0  ;;  %10036 = vmatmul.mubr.msk.f32.gmra.mrb[224].mxu0 %vm32_vm0, %v3757_v45 }
 0x2a2   :  { %v12889_v20 = vadd.f32 %v3101_v16, %v12789_v19  ;;  %10038 = vmatprep.mubr.msk.f32.mxu0 %vm32_vm0, %v3758_v58  ;;  %v4255_v16 = vld [vmem:[#allocation2 + $0x129] sm:$0xff] }
 0x2a5   :  { %10039 = vmatmul.mubr.msk.f32.gmra.mrb[226].mxu0 %vm32_vm0, %v3759_v44 }
 0x2a6   :  { %10043 = vmatprep.mubr.msk.f32.mxu0 %vm32_vm0, %v12518_v35 }
 0x2a8   :  { %v9880_v48 = vpop.f32.mrb[156].mxu0 }
 0x2a9   :  { %v12896_v53 = vadd.f32 %v9880_v48, %v12795_v14  ;;  %v3120_v59 = vpop.f32.mrb[157].mxu0  ;;  %10044 = vmatmul.mubr.msk.f32.vlgmr.msra.gmra.mrb[0].mxu0 %vm32_vm0, %v12520_v5 }
 0x2aa   :  { %10046 = vmatprep.mubr.msk.f32.mxu0 %vm32_vm0, %v12529_v32 }
 0x2ac   :  { %v9883_v19 = vpop.f32.mrb[158].mxu0 }
 0x2ad   :  { %v3129_v9 = vpop.f32.mrb[159].mxu0  ;;  %10047 = vmatmul.mubr.msk.f32.gmra.mrb[228].mxu0 %vm32_vm0, %v12531_v37  ;;  %v4256_v19 = vld [vmem:[#allocation2 + $0x131] sm:$0xff] }
 0x2ae   :  { %v12905_v63 = vadd.f32 %v3129_v9, %v12802_v61  ;;  %10049 = vmatprep.mubr.msk.f32.mxu0 %vm32_vm0, %v12537_v3  ;;  %v4257_v9 = vld [vmem:[#allocation2 + $0x139] sm:$0xff] }
 0x2b1   :  { %10050 = vmatmul.mubr.msk.f32.gmra.mrb[230].mxu0 %vm32_vm0, %v12539_v11  ;;  %v4241_v11 = vld [vmem:[#allocation2 + $0xb9] sm:$0xff] }
 0x2b2   :  { %10052 = vmatprep.mubr.msk.f32.mxu0 %vm32_vm0, %v12547_v21 }
 0x2b4   :  { %v9889_v35 = vpop.f32.mrb[160].mxu0 }
 0x2b5   :  { %v12914_v5 = vadd.f32 %v9889_v35, %v12808_v55  ;;  %v3148_v32 = vpop.f32.mrb[161].mxu0  ;;  %10053 = vmatmul.mubr.msk.f32.gmra.mrb[6].mxu0 %vm32_vm0, %v12549_v36  ;;  %v4245_v55 = vld [vmem:[#allocation2 + $0xd9] sm:$0xff]  ;;  %v4259_v35 = vld [vmem:[#allocation2 + $0x149] sm:$0xff] }
 0x2b6   :  { %10055 = vmatprep.mubr.msk.f32.mxu0 %vm32_vm0, %v12557_v54 }
 0x2b8   :  { %v9892_v37 = vpop.f32.mrb[162].mxu0 }
 0x2b9   :  { %v3157_v14 = vpop.f32.mrb[163].mxu0  ;;  %10056 = vmatmul.mubr.msk.f32.gmra.mrb[232].mxu0 %vm32_vm0, %v12559_v62  ;;  %v4243_v62 = vld [vmem:[#allocation2 + $0xc9] sm:$0xff] }
 0x2ba   :  { %v12923_v3 = vadd.f32 %v3157_v14, %v12814_v51  ;;  %10058 = vmatprep.mubr.msk.f32.mxu0 %vm32_vm0, %v12565_v4  ;;  %v4247_v51 = vld [vmem:[#allocation2 + $0xe9] sm:$0xff] }
 0x2bd   :  { %10059 = vmatmul.mubr.msk.f32.gmra.mrb[234].mxu0 %vm32_vm0, %v12567_v12 }
 0x2be   :  { %10061 = vmatprep.mubr.msk.f32.mxu0 %vm32_vm0, %v12576_v52  ;;  %v4244_v52 = vld [vmem:[#allocation2 + $0xd1] sm:$0xff] }
 0x2c0   :  { %v9900_v21 = vpop.f32.mrb[164].mxu0 }
 0x2c1   :  { %v12932_v36 = vadd.f32 %v9900_v21, %v12820_v25  ;;  %v3467_v54 = vpop.f32.mrb[165].mxu0  ;;  %10062 = vmatmul.mubr.msk.f32.gmra.mrb[12].mxu0 %vm32_vm0, %v12578_v15  ;;  %v4246_v15 = vld [vmem:[#allocation2 + $0xe1] sm:$0xff] }
 0x2c2   :  { %10064 = vmatprep.mubr.msk.f32.mxu0 %vm32_vm0, %v4241_v11  ;;  %v4261_v11 = vld [vmem:[#allocation2 + $0x159] sm:$0xff] }
 0x2c4   :  { %v9903_v61 = vpop.f32.mrb[166].mxu0 }
 0x2c5   :  { %v3476_v4 = vpop.f32.mrb[167].mxu0  ;;  %10065 = vmatmul.mubr.msk.f32.gmra.mrb[236].mxu0 %vm32_vm0, %v12587_v23  ;;  %v4248_v23 = vld [vmem:[#allocation2 + $0xf1] sm:$0xff]  ;;  %v4262_v61 = vld [vmem:[#allocation2 + $0x161] sm:$0xff] }
 0x2c6   :  { %v12940_v12 = vadd.f32 %v3476_v4, %v12826_v2  ;;  %10067 = vmatprep.mubr.msk.f32.mxu0 %vm32_vm0, %v4243_v62  ;;  %v4249_v2 = vld [vmem:[#allocation2 + $0xf9] sm:$0xff]  ;;  %v4263_v4 = vld [vmem:[#allocation2 + $0x169] sm:$0xff] }
 0x2c9   :  { %10068 = vmatmul.mubr.msk.f32.gmra.mrb[238].mxu0 %vm32_vm0, %v4244_v52  ;;  %v4265_v52 = vld [vmem:[#allocation2 + $0x179] sm:$0xff] }
 0x2ca   :  { %10070 = vmatprep.mubr.msk.f32.mxu0 %vm32_vm0, %v4245_v55 }
 0x2cc   :  { %v9909_v25 = vpop.f32.mrb[168].mxu0 }
 0x2cd   :  { %v12946_v50 = vadd.f32 %v9909_v25, %v12832_v18  ;;  %v3495_v49 = vpop.f32.mrb[169].mxu0  ;;  %10071 = vmatmul.mubr.msk.f32.gmra.mrb[18].mxu0 %vm32_vm0, %v4246_v15  ;;  %v4252_v18 = vld [vmem:[#allocation2 + $0x111] sm:$0xff]  ;;  %v4267_v25 = vld [vmem:[#allocation2 + $0x189] sm:$0xff] }
 0x2ce   :  { %10073 = vmatprep.mubr.msk.f32.mxu0 %vm32_vm0, %v4247_v51 }
 0x2d0   :  { %v9912_v13 = vpop.f32.mrb[170].mxu0 }
 0x2d1   :  { %v3504_v22 = vpop.f32.mrb[171].mxu0  ;;  %10074 = vmatmul.mubr.msk.f32.gmra.mrb[240].mxu0 %vm32_vm0, %v4248_v23  ;;  %v8299_v23 = vld [vmem:[%s14395_s3 + $0x80] sm:$0xff] }
 0x2d2   :  { %v12952_v46 = vadd.f32 %v3504_v22, %v12838_v43  ;;  %10076 = vmatprep.mubr.msk.f32.mxu0 %vm32_vm0, %v4249_v2  ;;  %v4254_v43 = vld [vmem:[#allocation2 + $0x121] sm:$0xff] }
 0x2d3   :  { %v8300_v2 = vld [vmem:[%s14395_s3 + $0x88] sm:$0xff] }
 0x2d5   :  { %10077 = vmatmul.mubr.msk.f32.gmra.mrb[242].mxu0 %vm32_vm0, %v4250_v41  ;;  %v4268_v41 = vld [vmem:[#allocation2 + $0x191] sm:$0xff] }
 0x2d6   :  { %10079 = vmatprep.mubr.msk.f32.mxu0 %vm32_vm0, %v4251_v34  ;;  %v8301_v34 = vld [vmem:[%s14395_s3 + $0x90] sm:$0xff] }
 0x2d8   :  { %v9918_v45 = vpop.f32.mrb[172].mxu0 }
 0x2d9   :  { %v12958_v58 = vadd.f32 %v9918_v45, %v12844_v38  ;;  %v3523_v40 = vpop.f32.mrb[173].mxu0  ;;  %10080 = vmatmul.mubr.msk.f32.gmra.mrb[24].mxu0 %vm32_vm0, %v4252_v18  ;;  %v4258_v38 = vld [vmem:[#allocation2 + $0x141] sm:$0xff]  ;;  %v8302_v18 = vld [vmem:[%s14395_s3 + $0x98] sm:$0xff] }
 0x2da   :  { %10082 = vmatprep.mubr.msk.f32.mxu0 %vm32_vm0, %v4253_v8  ;;  %v10623_v8 = vpack.c.bf16 %v8302_v18, %v8301_v34  ;;  %v8303_v45 = vld [vmem:[%s14395_s3 + $0xa0] sm:$0xff]  ;;  %v8304_v40 = vld [vmem:[%s14395_s3 + $0xa8] sm:$0xff] }
 0x2dc   :  { %v9921_v44 = vpop.f32.mrb[174].mxu0 }
 0x2dd   :  { %v3532_v48 = vpop.f32.mrb[175].mxu0  ;;  %10083 = vmatmul.mubr.msk.f32.gmra.mrb[244].mxu0 %vm32_vm0, %v4254_v43  ;;  %v10627_v44 = vpack.c.bf16 %v8304_v40, %v8303_v45 }
 0x2de   :  { %v12964_v59 = vadd.f32 %v3532_v48, %v12850_v33  ;;  %10085 = vmatprep.mubr.msk.f32.mxu0 %vm32_vm0, %v4255_v16  ;;  %v4260_v33 = vld [vmem:[#allocation2 + $0x151] sm:$0xff]  ;;  %v4273_v48 = vld [vmem:[#allocation2 + $0x1b9] sm:$0xff] }
 0x2e1   :  { %10086 = vmatmul.mubr.msk.f32.gmra.mrb[246].mxu0 %vm32_vm0, %v4256_v19 }
 0x2e2   :  { %10088 = vmatprep.mubr.msk.f32.mxu0 %vm32_vm0, %v4257_v9  ;;  %v8305_v9 = vld [vmem:[%s14395_s3 + $0xb0] sm:$0xff] }
 0x2e4   :  { %v9927_v32 = vpop.f32.mrb[176].mxu0 }
 0x2e5   :  { %v12970_v37 = vadd.f32 %v9927_v32, %v12856_v39  ;;  %v3551_v14 = vpop.f32.mrb[177].mxu0  ;;  %10089 = vmatmul.mubr.msk.f32.gmra.mrb[30].mxu0 %vm32_vm0, %v4258_v38  ;;  %v4264_v39 = vld [vmem:[#allocation2 + $0x171] sm:$0xff]  ;;  %v8307_v32 = vld [vmem:[%s14395_s3 + $0xc0] sm:$0xff] }
 0x2e6   :  { %10091 = vmatprep.mubr.msk.f32.mxu0 %vm32_vm0, %v4259_v35  ;;  %v8308_v14 = vld [vmem:[%s14395_s3 + $0xc8] sm:$0xff] }
 0x2e8   :  { %v9930_v21 = vpop.f32.mrb[178].mxu0 }
 0x2e9   :  { %v3560_v54 = vpop.f32.mrb[179].mxu0  ;;  %10092 = vmatmul.mubr.msk.f32.gmra.mrb[248].mxu0 %vm32_vm0, %v4260_v33  ;;  %v10635_v33 = vpack.c.bf16 %v8308_v14, %v8307_v32  ;;  %v8310_v21 = vld [vmem:[%s14395_s3 + $0xd8] sm:$0xff]  ;;  %v4933_v32 = vld [vmem:[%s14395_s3 + $0x8] sm:$0xff] }
 0x2ea   :  { %v12976_v62 = vadd.f32 %v3560_v54, %v12862_v6  ;;  %10094 = vmatprep.mubr.msk.f32.mxu0 %vm32_vm0, %v4261_v11  ;;  %v4266_v6 = vld [vmem:[#allocation2 + $0x181] sm:$0xff] }
 0x2ed   :  { %10095 = vmatmul.mubr.msk.f32.gmra.mrb[250].mxu0 %vm32_vm0, %v4262_v61 }
 0x2ee   :  { %10097 = vmatprep.mubr.msk.f32.mxu0 %vm32_vm0, %v4263_v4 }
 0x2f0   :  { %v9936_v55 = vpop.f32.mrb[180].mxu0 }
 0x2f1   :  { %v12982_v15 = vadd.f32 %v9936_v55, %v12868_v26  ;;  %v3579_v51 = vpop.f32.mrb[181].mxu0  ;;  %10098 = vmatmul.mubr.msk.f32.gmra.mrb[56].mxu0 %vm32_vm0, %v4264_v39  ;;  %v10619_v26 = vpack.c.bf16 %v8300_v2, %v8299_v23  ;;  %v8312_v55 = vld [vmem:[%s14395_s3 + $0xe8] sm:$0xff] }
 0x2f2   :  { %10100 = vmatprep.mubr.msk.f32.mxu0 %vm32_vm0, %v4265_v52  ;;  %v8311_v52 = vld [vmem:[%s14395_s3 + $0xe0] sm:$0xff] }
 0x2f3   :  { %10620 = vmatprep.subr.bf16.mxu1 %v10619_v26 }
 0x2f4   :  { %v9939_v49 = vpop.f32.mrb[182].mxu0  ;;  %10622 = vmatpush3.bf16.msra.mxu1 %v10619_v26 }
 0x2f5   :  { %v3588_v13 = vpop.f32.mrb[183].mxu0  ;;  %10101 = vmatmul.mubr.msk.f32.gmra.mrb[252].mxu0 %vm32_vm0, %v4266_v6  ;;  %10624 = vmatprep.subr.bf16.mxu1 %v10623_v8  ;;  %v10643_v6 = vpack.c.bf16 %v8312_v55, %v8311_v52  ;;  %v8314_v49 = vld [vmem:[%s14395_s3 + $0xf8] sm:$0xff]  ;;  %v4938_v55 = vld [vmem:[%s14395_s3 + $0x30] sm:$0xff] }
 0x2f6   :  { %v12994_v22 = vadd.f32 %v3588_v13, %v12874_v30  ;;  %10103 = vmatprep.mubr.msk.f32.mxu0 %vm32_vm0, %v4267_v25 }
 0x2f8   :  { %10626 = vmatpush3.bf16.msra.mxu1 %v10623_v8 }
 0x2f9   :  { %10104 = vmatmul.mubr.msk.f32.gmra.mrb[254].mxu0 %vm32_vm0, %v4268_v41  ;;  %10628 = vmatprep.subr.bf16.mxu1 %v10627_v44 }
 0x2fa   :  { %10106 = vmatprep.mubr.msk.f32.mxu0 %vm32_vm0, %v12672_v0  ;;  %v4272_v0 = vld [vmem:[#allocation2 + $0x1b1] sm:$0xff] }
 0x2fc   :  { %v9945_v30 = vpop.f32.mrb[184].mxu0  ;;  %10630 = vmatpush3.bf16.msra.mxu1 %v10627_v44 }
 0x2fd   :  { %v13013_v43 = vadd.f32 %v9945_v30, %v12881_v56  ;;  %v3607_v16 = vpop.f32.mrb[185].mxu0  ;;  %10107 = vmatmul.mubr.msk.f32.gmra.mrb[62].mxu0 %vm32_vm0, %v12674_v1  ;;  %v8306_v56 = vld [vmem:[%s14395_s3 + $0xb8] sm:$0xff] }
 0x2fe   :  { %10109 = vmatprep.mubr.msk.f32.mxu0 %vm32_vm0, %v12683_v42  ;;  %v10631_v1 = vpack.c.bf16 %v8306_v56, %v8305_v9  ;;  %v4274_v42 = vld [vmem:[#allocation2 + $0x1c1] sm:$0xff] }
 0x300   :  { %v9948_v19 = vpop.f32.mrb[186].mxu0  ;;  %10632 = vmatprep.subr.bf16.mxu1 %v10631_v1 }
 0x301   :  { %v3616_v38 = vpop.f32.mrb[187].mxu0  ;;  %10110 = vmatmul.mubr.msk.f32.gmra.mrb[2].mxu0 %vm32_vm0, %v4272_v0  ;;  %10634 = vmatpush3.bf16.msra.mxu1 %v10631_v1 }
 0x302   :  { %v13027_v35 = vadd.f32 %v3616_v38, %v12889_v20  ;;  %10112 = vmatprep.mubr.msk.f32.mxu0 %vm32_vm0, %v4273_v48  ;;  %10636 = vmatprep.subr.bf16.mxu1 %v10635_v33  ;;  %v8309_v20 = vld [vmem:[%s14395_s3 + $0xd0] sm:$0xff] }
 0x303   :  { %v10639_v4 = vpack.c.bf16 %v8310_v21, %v8309_v20 }
 0x305   :  { %10113 = vmatmul.mubr.msk.f32.gmra.mrb[4].mxu0 %vm32_vm0, %v4274_v42  ;;  %10638 = vmatpush3.bf16.msra.mxu1 %v10635_v33 }
 0x306   :  { %10640 = vmatprep.subr.bf16.mxu1 %v10639_v4 }
 0x308   :  { %v9954_v11 = vpop.f32.mrb[188].mxu0 }
 0x309   :  { %v13044_v54 = vadd.f32 %v9954_v11, %v12896_v53  ;;  %v3635_v61 = vpop.f32.mrb[189].mxu0  ;;  %10642 = vmatpush3.bf16.msra.mxu1 %v10639_v4  ;;  %v8313_v53 = vld [vmem:[%s14395_s3 + $0xf0] sm:$0xff]  ;;  %v4935_v11 = vld [vmem:[%s14395_s3 + $0x18] sm:$0xff] }
 0x30a   :  { %10644 = vmatprep.subr.bf16.mxu1 %v10643_v6  ;;  %v10647_v23 = vpack.c.bf16 %v8314_v49, %v8313_v53 }
 0x30c   :  { %v9957_v39 = vpop.f32.mrb[190].mxu0 }
 0x30d   :  { %v3644_v51 = vpop.f32.mrb[191].mxu0  ;;  %10646 = vmatpush3.bf16.msra.mxu1 %v10643_v6  ;;  %v4937_v39 = vld [vmem:[%s14395_s3 + $0x28] sm:$0xff] }
 0x30e   :  { %v13053_v25 = vadd.f32 %v3644_v51, %v12905_v63  ;;  %10648 = vmatprep.subr.bf16.mxu1 %v10647_v23  ;;  %v13064_v63 = vld [vmem:[#allocation3] sm:$0xff] }
 0x311   :  { %10650 = vmatpush3.bf16.msra.mxu1 %v10647_v23  ;;  %v4940_v23 = vld [vmem:[%s14395_s3 + $0x40] sm:$0xff] }
 0x314   :  { %v9963_v2 = vpop.f32.mrb[192].mxu0  ;;  %10148 = vmatmul.mubr.f32.vlgmr.msra.gmra.mrb[60].mxu1 %v13064_v63 }
 0x315   :  { %v13062_v13 = vadd.f32 %v9963_v2, %v12914_v5  ;;  %v3663_v26 = vpop.f32.mrb[193].mxu0  ;;  %v4941_v2 = vld [vmem:[%s14395_s3 + $0x48] sm:$0xff] }
 0x316   :  { %v10667_v26 = vpack.c.bf16 %v4941_v2, %v4940_v23 }
 0x318   :  { %v9966_v41 = vpop.f32.mrb[194].mxu0 }
 0x319   :  { %v3672_v34 = vpop.f32.mrb[195].mxu0 }
 0x31a   :  { %v13068_v18 = vadd.f32 %v3672_v34, %v12923_v3 }
 0x320   :  { %v9974_v8 = vpop.f32.mrb[196].mxu0 }
 0x321   :  { %v13071_v30 = vadd.f32 %v9974_v8, %v12932_v36  ;;  %v3982_v45 = vpop.f32.mrb[197].mxu0 }
 0x322   :  { %v4943_v45 = vld [vmem:[%s14395_s3 + $0x58] sm:$0xff] }
 0x324   :  { %v9977_v40 = vpop.f32.mrb[198].mxu0 }
 0x325   :  { %v3991_v16 = vpop.f32.mrb[199].mxu0 }
 0x326   :  { %v13074_v5 = vadd.f32 %v3991_v16, %v12940_v12  ;;  %v4944_v16 = vld [vmem:[%s14395_s3 + $0x60] sm:$0xff] }
 0x32c   :  { %v9983_v44 = vpop.f32.mrb[200].mxu0 }
 0x32d   :  { %v13077_v0 = vadd.f32 %v9983_v44, %v12946_v50  ;;  %v4010_v48 = vpop.f32.mrb[201].mxu0  ;;  %v4932_v50 = vld [vmem:[%s14395_s3] sm:$0xff] }
 0x330   :  { %v9986_v19 = vpop.f32.mrb[202].mxu0 }
 0x331   :  { %v4019_v9 = vpop.f32.mrb[203].mxu0 }
 0x332   :  { %v13080_v3 = vadd.f32 %v4019_v9, %v12952_v46  ;;  %v10651_v46 = vpack.c.bf16 %v4933_v32, %v4932_v50 }
 0x334   :  { %10652 = vmatprep.subr.bf16.mxu1 %v10651_v46 }
 0x335   :  { %10654 = vmatpush3.bf16.msra.mxu1 %v10651_v46  ;;  %v8316_v46 = vld [vmem:[%s14395_s3 + $0x108] sm:$0xff] }
 0x338   :  { %v9992_v56 = vpop.f32.mrb[204].mxu0 }
 0x339   :  { %v13083_v36 = vadd.f32 %v9992_v56, %v12958_v58  ;;  %v4038_v38 = vpop.f32.mrb[205].mxu0  ;;  %v4946_v56 = vld [vmem:[%s14395_s3 + $0x70] sm:$0xff] }
 0x33a   :  { %v4947_v38 = vld [vmem:[%s14395_s3 + $0x78] sm:$0xff] }
 0x33c   :  { %v9995_v1 = vpop.f32.mrb[206].mxu0 }
 0x33d   :  { %v4047_v42 = vpop.f32.mrb[207].mxu0  ;;  %v10679_v1 = vpack.c.bf16 %v4947_v38, %v4946_v56 }
 0x33e   :  { %v13086_v12 = vadd.f32 %v4047_v42, %v12964_v59  ;;  %v4934_v59 = vld [vmem:[%s14395_s3 + $0x10] sm:$0xff] }
 0x33f   :  { %v10655_v20 = vpack.c.bf16 %v4935_v11, %v4934_v59 }
 0x341   :  { %10656 = vmatprep.subr.bf16.mxu1 %v10655_v20 }
 0x342   :  { %10658 = vmatpush3.bf16.msra.mxu1 %v10655_v20 }
 0x344   :  { %v10001_v14 = vpop.f32.mrb[208].mxu0 }
 0x345   :  { %v13095_v33 = vadd.f32 %v10001_v14, %v12970_v37  ;;  %v4066_v58 = vpop.f32.mrb[209].mxu0  ;;  %v4936_v37 = vld [vmem:[%s14395_s3 + $0x20] sm:$0xff] }
 0x346   :  { %v10659_v52 = vpack.c.bf16 %v4937_v39, %v4936_v37 }
 0x348   :  { %v10004_v21 = vpop.f32.mrb[210].mxu0  ;;  %10660 = vmatprep.subr.bf16.mxu1 %v10659_v52 }
 0x349   :  { %v4075_v61 = vpop.f32.mrb[211].mxu0  ;;  %10662 = vmatpush3.bf16.msra.mxu1 %v10659_v52 }
 0x34a   :  { %v13104_v4 = vadd.f32 %v4075_v61, %v12976_v62  ;;  %v4939_v62 = vld [vmem:[%s14395_s3 + $0x38] sm:$0xff] }
 0x34b   :  { %v10663_v51 = vpack.c.bf16 %v4939_v62, %v4938_v55 }
 0x34d   :  { %10664 = vmatprep.subr.bf16.mxu1 %v10663_v51 }
 0x34e   :  { %10666 = vmatpush3.bf16.msra.mxu1 %v10663_v51 }
 0x34f   :  { %10668 = vmatprep.subr.bf16.mxu1 %v10667_v26 }
 0x350   :  { %v10010_v6 = vpop.f32.mrb[212].mxu0 }
 0x351   :  { %v13119_v53 = vadd.f32 %v10010_v6, %v12982_v15  ;;  %v4094_v49 = vpop.f32.mrb[213].mxu0  ;;  %v4942_v15 = vld [vmem:[%s14395_s3 + $0x50] sm:$0xff] }
 0x352   :  { %10670 = vmatpush3.bf16.msra.mxu1 %v10667_v26  ;;  %v10671_v40 = vpack.c.bf16 %v4943_v45, %v4942_v15  ;;  %v13179_v49 = vld [vmem:[%s14396_s2] ss:$0 sm:$0xff] }
 0x354   :  { %v10013_v41 = vpop.f32.mrb[214].mxu0  ;;  %10672 = vmatprep.subr.bf16.mxu1 %v10671_v40 }
 0x355   :  { %v4103_v34 = vpop.f32.mrb[215].mxu0 }
 0x356   :  { %v13128_v8 = vadd.f32 %v4103_v34, %v12994_v22  ;;  %10674 = vmatpush3.bf16.msra.mxu1 %v10671_v40  ;;  %v4945_v22 = vld [vmem:[%s14395_s3 + $0x68] sm:$0xff] }
 0x357   :  { %v10675_v44 = vpack.c.bf16 %v4945_v22, %v4944_v16 }
 0x359   :  { %10676 = vmatprep.subr.bf16.mxu1 %v10675_v44 }
 0x35a   :  { %10678 = vmatpush3.bf16.msra.mxu1 %v10675_v44 }
 0x35b   :  { %10680 = vmatprep.subr.bf16.mxu1 %v10679_v1 }
 0x35c   :  { %v10019_v48 = vpop.f32.mrb[216].mxu0 }
 0x35d   :  { %v13143_v19 = vadd.f32 %v10019_v48, %v13013_v43  ;;  %v4122_v9 = vpop.f32.mrb[217].mxu0  ;;  %v8315_v43 = vld [vmem:[%s14395_s3 + $0x100] sm:$0xff] }
 0x35e   :  { %10682 = vmatpush3.bf16.msra.mxu1 %v10679_v1  ;;  %v13160_v14 = vpack.c.bf16 %v8316_v46, %v8315_v43 }
 0x360   :  { %v10022_v42 = vpop.f32.mrb[218].mxu0  ;;  %10684 = vmatprep.subr.bf16.mxu1 %v13160_v14 }
 0x361   :  { %v4131_v50 = vpop.f32.mrb[219].mxu0 }
 0x362   :  { %v13152_v32 = vadd.f32 %v4131_v50, %v13027_v35 }
 0x368   :  { %v10028_v58 = vpop.f32.mrb[220].mxu0 }
 0x369   :  { %v13164_v59 = vadd.f32 %v10028_v58, %v13044_v54  ;;  %v4150_v11 = vpop.f32.mrb[221].mxu0 }
 0x36c   :  { %v10031_v35 = vpop.f32.mrb[222].mxu0 }
 0x36d   :  { %v4159_v20 = vpop.f32.mrb[223].mxu0 }
 0x36e   :  { %v13167_v21 = vadd.f32 %v4159_v20, %v13053_v25 }
 0x374   :  { %v10037_v61 = vpop.f32.mrb[224].mxu0 }
 0x375   :  { %v13170_v37 = vadd.f32 %v10037_v61, %v13062_v13  ;;  %v4178_v39 = vpop.f32.mrb[225].mxu0 }
 0x378   :  { %v10040_v52 = vpop.f32.mrb[226].mxu0 }
 0x379   :  { %v4187_v55 = vpop.f32.mrb[227].mxu0 }
 0x37a   :  { %v13173_v62 = vadd.f32 %v4187_v55, %v13068_v18 }
 0x37c   :  { %v10045_v51 = vpop.f32.mrb[0].mxu0 }
 0x37d   :  { %v11229_v54 = vadd.f32 %v10045_v51, %v12262_v29  ;;  %v4487_v6 = vpop.f32.mrb[1].mxu0 }
 0x37e   :  { %v11230_v25 = vadd.f32 %v4487_v6, %v12266_v31 }
 0x37f   :  { %v4750_v45 = vadd.f32 %v11229_v54, %v13179_v49 }
 0x380   :  { %v10048_v23 = vpop.f32.mrb[228].mxu0  ;;  %v4749_v13 = vadd.f32 %v11230_v25, %v13179_v49 }
 0x381   :  { %v4712_v2 = vadd.f32 %v10048_v23, %v13071_v30  ;;  %v4497_v26 = vpop.f32.mrb[229].mxu0  ;;  %v4782_v30 = vmax.f32 %v4750_v45, 0.0 }
 0x382   :  { %v4781_v34 = vmax.f32 %v4749_v13, 0.0 }
 0x383   :  { %v4751_v18 = vadd.f32 %v13179_v49, %v4712_v2 }
 0x384   :  { %v10051_v41 = vpop.f32.mrb[230].mxu0 }
 0x385   :  { %v4783_v15 = vmax.f32 %v4751_v18, 0.0  ;;  %v4506_v29 = vpop.f32.mrb[231].mxu0 }
 0x386   :  { %v4713_v40 = vadd.f32 %v4506_v29, %v13074_v5 }
 0x387   :  { %v4813_v16 = vmax.f32 %v4781_v34, %v4783_v15 }
 0x388   :  { %v4752_v22 = vadd.f32 %v13179_v49, %v4713_v40  ;;  %v10054_v31 = vpop.f32.mrb[6].mxu0 }
 0x389   :  { %4829 = vst [vmem:[#allocation4] sm:$0xff] %v4813_v16  ;;  %v11231_v44 = vadd.f32 %v10054_v31, %v12282_v57  ;;  %v4515_v48 = vpop.f32.mrb[7].mxu0 }
 0x38a   :  { %v4784_v9 = vmax.f32 %v4752_v22, 0.0  ;;  %v11232_v56 = vadd.f32 %v4515_v48, %v12286_v60 }
 0x38b   :  { %v4754_v57 = vadd.f32 %v11231_v44, %v13179_v49 }
 0x38c   :  { %v4814_v38 = vmax.f32 %v4782_v30, %v4784_v9  ;;  %v10057_v1 = vpop.f32.mrb[232].mxu0  ;;  %v4753_v42 = vadd.f32 %v11232_v56, %v13179_v49 }
 0x38d   :  { %v4716_v50 = vadd.f32 %v10057_v1, %v13077_v0  ;;  %v4525_v43 = vpop.f32.mrb[233].mxu0  ;;  %v4786_v54 = vmax.f32 %v4754_v57, 0.0 }
 0x38e   :  { %4830 = vst [vmem:[#allocation4 + $0x8] sm:$0xff] %v4814_v38  ;;  %v4785_v58 = vmax.f32 %v4753_v42, 0.0 }
 0x38f   :  { %v4755_v5 = vadd.f32 %v13179_v49, %v4716_v50 }
 0x390   :  { %v10060_v46 = vpop.f32.mrb[234].mxu0 }
 0x391   :  { %v4787_v11 = vmax.f32 %v4755_v5, 0.0  ;;  %v4534_v35 = vpop.f32.mrb[235].mxu0 }
 0x392   :  { %v4717_v20 = vadd.f32 %v4534_v35, %v13080_v3 }
 0x393   :  { %v4815_v61 = vmax.f32 %v4785_v58, %v4787_v11 }
 0x394   :  { %v4756_v60 = vadd.f32 %v13179_v49, %v4717_v20  ;;  %v10063_v39 = vpop.f32.mrb[12].mxu0 }
 0x395   :  { %4831 = vst [vmem:[#allocation4 + $0x10] sm:$0xff] %v4815_v61  ;;  %v11233_v52 = vadd.f32 %v10063_v39, %v12302_v27  ;;  %v4543_v0 = vpop.f32.mrb[13].mxu0  ;;  %v4845_v55 = vld [vmem:[#allocation4] ss:$2 sm:$0xff]  ;;  %v4861_v51 = vld [vmem:[#allocation4 + $0x1] ss:$2 sm:$0xff] }
 0x396   :  { %v4788_v6 = vmax.f32 %v4756_v60, 0.0  ;;  %v11234_v25 = vadd.f32 %v4543_v0, %v12306_v24  ;;  %v13198_v23 = vmax.f32 %v4845_v55, %v4861_v51 }
 0x397   :  { %v4758_v29 = vadd.f32 %v11233_v52, %v13179_v49 }
 0x398   :  { %v4816_v13 = vmax.f32 %v4786_v54, %v4788_v6  ;;  %v10066_v2 = vpop.f32.mrb[236].mxu0  ;;  %4908 = vst [vmem:[#allocation3 + $0x20] sm:$0xff] %v13198_v23  ;;  %10150 = vmatprep.mubr.f32.mxu1 %v13198_v23  ;;  %v4757_v3 = vadd.f32 %v11234_v25, %v13179_v49 }
 0x399   :  { %v4720_v26 = vadd.f32 %v10066_v2, %v13083_v36  ;;  %v4553_v27 = vpop.f32.mrb[237].mxu0  ;;  %10151 = vmatmul.mubr.f32.gmra.mrb[62].mxu1 %v13064_v63  ;;  %v4790_v30 = vmax.f32 %v4758_v29, 0.0 }
 0x39a   :  { %4832 = vst [vmem:[#allocation4 + $0x18] sm:$0xff] %v4816_v13  ;;  %v4789_v24 = vmax.f32 %v4757_v3, 0.0 }
 0x39b   :  { %v4759_v18 = vadd.f32 %v13179_v49, %v4720_v26 }
 0x39c   :  { %v10069_v41 = vpop.f32.mrb[238].mxu0 }
 0x39d   :  { %v4791_v34 = vmax.f32 %v4759_v18, 0.0  ;;  %v4562_v15 = vpop.f32.mrb[239].mxu0 }
 0x39e   :  { %v4721_v45 = vadd.f32 %v4562_v15, %v13086_v12 }
 0x39f   :  { %v4817_v40 = vmax.f32 %v4789_v24, %v4791_v34 }
 0x3a0   :  { %v4760_v16 = vadd.f32 %v13179_v49, %v4721_v45  ;;  %v10072_v22 = vpop.f32.mrb[18].mxu0 }
 0x3a1   :  { %4833 = vst [vmem:[#allocation4 + $0x20] sm:$0xff] %v4817_v40  ;;  %v11235_v36 = vadd.f32 %v10072_v22, %v12326_v10  ;;  %v4571_v31 = vpop.f32.mrb[19].mxu0  ;;  %v4847_v44 = vld [vmem:[#allocation4 + $0x10] ss:$2 sm:$0xff]  ;;  %v4863_v48 = vld [vmem:[#allocation4 + $0x11] ss:$2 sm:$0xff] }
 0x3a2   :  { %v4792_v9 = vmax.f32 %v4760_v16, 0.0  ;;  %v11236_v56 = vadd.f32 %v4571_v31, %v12330_v7  ;;  %v13211_v38 = vmax.f32 %v4847_v44, %v4863_v48 }
 0x3a3   :  { %v4762_v11 = vadd.f32 %v11235_v36, %v13179_v49  ;;  %v14581_v36 = vld [vmem:[#allocation63_spill] sm:$0xff] }
 0x3a4   :  { %v4818_v1 = vmax.f32 %v4790_v30, %v4792_v9  ;;  %v10075_v42 = vpop.f32.mrb[240].mxu0  ;;  %4909 = vst [vmem:[#allocation3 + $0x30] sm:$0xff] %v13211_v38  ;;  %10153 = vmatprep.mubr.f32.mxu1 %v13211_v38  ;;  %v4761_v12 = vadd.f32 %v11236_v56, %v13179_v49 }
 0x3a5   :  { %v4724_v50 = vadd.f32 %v10075_v42, %v13095_v33  ;;  %v4581_v10 = vpop.f32.mrb[241].mxu0  ;;  %10154 = vmatmul.mubr.f32.gmra.mrb[64].mxu1 %v13064_v63  ;;  %v4794_v0 = vmax.f32 %v4762_v11, 0.0 }
 0x3a6   :  { %4834 = vst [vmem:[#allocation4 + $0x28] sm:$0xff] %v4818_v1  ;;  %v4793_v7 = vmax.f32 %v4761_v12, 0.0 }
 0x3a7   :  { %v4763_v43 = vadd.f32 %v13179_v49, %v4724_v50 }
 0x3a8   :  { %v10078_v5 = vpop.f32.mrb[242].mxu0 }
 0x3a9   :  { %v4795_v46 = vmax.f32 %v4763_v43, 0.0  ;;  %v4590_v58 = vpop.f32.mrb[243].mxu0 }
 0x3aa   :  { %v4725_v35 = vadd.f32 %v4590_v58, %v13104_v4 }
 0x3ab   :  { %v4819_v57 = vmax.f32 %v4793_v7, %v4795_v46 }
 0x3ac   :  { %v4764_v20 = vadd.f32 %v13179_v49, %v4725_v35  ;;  %v10081_v61 = vpop.f32.mrb[24].mxu0 }
 0x3ad   :  { %4835 = vst [vmem:[#allocation4 + $0x30] sm:$0xff] %v4819_v57  ;;  %v11237_v33 = vadd.f32 %v10081_v61, %v12355_v28  ;;  %v4599_v60 = vpop.f32.mrb[25].mxu0  ;;  %v4849_v39 = vld [vmem:[#allocation4 + $0x20] ss:$2 sm:$0xff]  ;;  %v4865_v52 = vld [vmem:[#allocation4 + $0x21] ss:$2 sm:$0xff] }
 0x3ae   :  { %v4796_v55 = vmax.f32 %v4764_v20, 0.0  ;;  %v11238_v51 = vadd.f32 %v4599_v60, %v12359_v47  ;;  %v13224_v54 = vmax.f32 %v4849_v39, %v4865_v52 }
 0x3af   :  { %v4766_v18 = vadd.f32 %v11237_v33, %v13179_v49  ;;  %v14583_v33 = vld [vmem:[#allocation7_spill] sm:$0xff] }
 0x3b0   :  { %v4820_v6 = vmax.f32 %v4794_v0, %v4796_v55  ;;  %v10084_v25 = vpop.f32.mrb[244].mxu0  ;;  %4910 = vst [vmem:[#allocation3 + $0x40] sm:$0xff] %v13224_v54  ;;  %10156 = vmatprep.mubr.f32.mxu1 %v13224_v54  ;;  %v4765_v4 = vadd.f32 %v11238_v51, %v13179_v49 }
 0x3b1   :  { %v4728_v13 = vadd.f32 %v10084_v25, %v13119_v53  ;;  %v4609_v28 = vpop.f32.mrb[245].mxu0  ;;  %10157 = vmatmul.mubr.f32.gmra.mrb[66].mxu1 %v13064_v63  ;;  %v4798_v16 = vmax.f32 %v4766_v18, 0.0 }
 0x3b2   :  { %4836 = vst [vmem:[#allocation4 + $0x38] sm:$0xff] %v4820_v6  ;;  %v4797_v47 = vmax.f32 %v4765_v4, 0.0 }
 0x3b3   :  { %v4767_v2 = vadd.f32 %v13179_v49, %v4728_v13 }
 0x3b4   :  { %v10087_v3 = vpop.f32.mrb[246].mxu0 }
 0x3b5   :  { %v4799_v26 = vmax.f32 %v4767_v2, 0.0  ;;  %v4618_v27 = vpop.f32.mrb[247].mxu0 }
 0x3b6   :  { %v4729_v41 = vadd.f32 %v4618_v27, %v13128_v8 }
 0x3b7   :  { %v4821_v24 = vmax.f32 %v4797_v47, %v4799_v26 }
 0x3b8   :  { %v4768_v34 = vadd.f32 %v13179_v49, %v4729_v41  ;;  %v10090_v15 = vpop.f32.mrb[30].mxu0 }
 0x3b9   :  { %4837 = vst [vmem:[#allocation4 + $0x40] sm:$0xff] %v4821_v24  ;;  %v11239_v53 = vadd.f32 %v10090_v15, %v12375_v17  ;;  %v4627_v29 = vpop.f32.mrb[31].mxu0  ;;  %v4851_v45 = vld [vmem:[#allocation4 + $0x30] ss:$2 sm:$0xff]  ;;  %v4867_v40 = vld [vmem:[#allocation4 + $0x31] ss:$2 sm:$0xff] }
 0x3ba   :  { %v4800_v22 = vmax.f32 %v4768_v34, 0.0  ;;  %v11240_v31 = vadd.f32 %v4627_v29, %v14581_v36  ;;  %v13237_v44 = vmax.f32 %v4851_v45, %v4867_v40  ;;  %v14585_v29 = vld [vmem:[#allocation9_spill] sm:$0xff] }
 0x3bb   :  { %v4770_v10 = vadd.f32 %v11239_v53, %v13179_v49 }
 0x3bc   :  { %v4822_v48 = vmax.f32 %v4798_v16, %v4800_v22  ;;  %v10093_v30 = vpop.f32.mrb[248].mxu0  ;;  %4911 = vst [vmem:[#allocation3 + $0x50] sm:$0xff] %v13237_v44  ;;  %10159 = vmatprep.mubr.f32.mxu1 %v13237_v44  ;;  %v4769_v8 = vadd.f32 %v11240_v31, %v13179_v49 }
 0x3bd   :  { %v4732_v9 = vadd.f32 %v10093_v30, %v13143_v19  ;;  %v4637_v17 = vpop.f32.mrb[249].mxu0  ;;  %10160 = vmatmul.mubr.f32.gmra.mrb[68].mxu1 %v13064_v63  ;;  %v14582_v19 = vld [vmem:[#allocation6_spill] sm:$0xff]  ;;  %v4802_v20 = vmax.f32 %v4770_v10, 0.0 }
 0x3be   :  { %4838 = vst [vmem:[#allocation4 + $0x48] sm:$0xff] %v4822_v48  ;;  %v4801_v42 = vmax.f32 %v4769_v8, 0.0 }
 0x3bf   :  { %v4771_v56 = vadd.f32 %v13179_v49, %v4732_v9 }
 0x3c0   :  { %v10096_v1 = vpop.f32.mrb[250].mxu0 }
 0x3c1   :  { %v4803_v12 = vmax.f32 %v4771_v56, 0.0  ;;  %v4646_v50 = vpop.f32.mrb[251].mxu0 }
 0x3c2   :  { %v4733_v43 = vadd.f32 %v4646_v50, %v13152_v32 }
 0x3c3   :  { %v4823_v5 = vmax.f32 %v4801_v42, %v4803_v12 }
 0x3c4   :  { %v4772_v7 = vadd.f32 %v13179_v49, %v4733_v43  ;;  %v10099_v46 = vpop.f32.mrb[56].mxu0 }
 0x3c5   :  { %4839 = vst [vmem:[#allocation4 + $0x50] sm:$0xff] %v4823_v5  ;;  %v11241_v58 = vadd.f32 %v10099_v46, %v14582_v19  ;;  %v4655_v11 = vpop.f32.mrb[57].mxu0  ;;  %v4853_v35 = vld [vmem:[#allocation4 + $0x40] ss:$2 sm:$0xff]  ;;  %v4869_v57 = vld [vmem:[#allocation4 + $0x41] ss:$2 sm:$0xff] }
 0x3c6   :  { %v4804_v61 = vmax.f32 %v4772_v7, 0.0  ;;  %v11242_v60 = vadd.f32 %v4655_v11, %v14583_v33  ;;  %v13250_v39 = vmax.f32 %v4853_v35, %v4869_v57  ;;  %v4916_v7 = vld [vmem:[#allocation3 + $0xf] sm:$0xff]  ;;  %v4917_v19 = vld [vmem:[#allocation3 + $0x17] sm:$0xff]  ;;  %v8319_v11 = vld [vmem:[%s14395_s3 + $0x120] sm:$0xff] }
 0x3c7   :  { %v4774_v2 = vadd.f32 %v11241_v58, %v13179_v49  ;;  %v8320_v35 = vld [vmem:[%s14395_s3 + $0x128] sm:$0xff]  ;;  %v13291_v57 = vld [vmem:[#allocation3 + $0x1f] sm:$0xff] }
 0x3c8   :  { %v4824_v52 = vmax.f32 %v4802_v20, %v4804_v61  ;;  %v10102_v0 = vpop.f32.mrb[252].mxu0  ;;  %4912 = vst [vmem:[#allocation3 + $0x60] sm:$0xff] %v13250_v39  ;;  %10162 = vmatprep.mubr.f32.mxu1 %v13250_v39  ;;  %v4773_v32 = vadd.f32 %v11242_v60, %v13179_v49  ;;  %v13295_v20 = vld [vmem:[#allocation3 + $0x27] sm:$0xff]  ;;  %v8321_v61 = vld [vmem:[%s14395_s3 + $0x130] sm:$0xff]  ;;  %v8322_v33 = vld [vmem:[%s14395_s3 + $0x138] sm:$0xff] }
 0x3c9   :  { %v4736_v55 = vadd.f32 %v10102_v0, %v13164_v59  ;;  %v4665_v51 = vpop.f32.mrb[253].mxu0  ;;  %10163 = vmatmul.mubr.f32.gmra.mrb[70].mxu1 %v13064_v63  ;;  %v14584_v59 = vld [vmem:[#allocation8_spill] sm:$0xff]  ;;  %v4806_v15 = vmax.f32 %v4774_v2, 0.0 }
 0x3ca   :  { %4840 = vst [vmem:[#allocation4 + $0x58] sm:$0xff] %v4824_v52  ;;  %v4805_v4 = vmax.f32 %v4773_v32, 0.0  ;;  %v13304_v60 = vld [vmem:[#allocation3 + $0x2f] sm:$0xff]  ;;  %v13309_v51 = vld [vmem:[#allocation3 + $0x37] sm:$0xff] }
 0x3cb   :  { %v4775_v6 = vadd.f32 %v13179_v49, %v4736_v55  ;;  %v10695_v55 = vpack.c.bf16 %v8322_v33, %v8321_v61  ;;  %v8325_v2 = vld [vmem:[%s14395_s3 + $0x150] sm:$0xff]  ;;  %v8342_v61 = vld [vmem:[%s14395_s3 + $0x1d8] sm:$0xff] }
 0x3cc   :  { %v10105_v25 = vpop.f32.mrb[254].mxu0  ;;  %v13421_v33 = vld [vmem:[#allocation3 + $0x51] sm:$0xff] }
 0x3cd   :  { %v4807_v13 = vmax.f32 %v4775_v6, 0.0  ;;  %v4674_v28 = vpop.f32.mrb[255].mxu0  ;;  %v8323_v6 = vld [vmem:[%s14395_s3 + $0x140] sm:$0xff]  ;;  %v8324_v25 = vld [vmem:[%s14395_s3 + $0x148] sm:$0xff] }
 0x3ce   :  { %v4737_v3 = vadd.f32 %v4674_v28, %v13167_v21  ;;  %v13322_v28 = vld [vmem:[#allocation3 + $0x47] sm:$0xff] }
 0x3cf   :  { %v4825_v47 = vmax.f32 %v4805_v4, %v4807_v13  ;;  %v13319_v4 = vld [vmem:[#allocation3 + $0x3f] sm:$0xff]  ;;  %v10699_v13 = vpack.c.bf16 %v8324_v25, %v8323_v6 }
 0x3d0   :  { %v4776_v26 = vadd.f32 %v13179_v49, %v4737_v3  ;;  %v10108_v27 = vpop.f32.mrb[62].mxu0  ;;  %v8326_v3 = vld [vmem:[%s14395_s3 + $0x158] sm:$0xff]  ;;  %v13433_v6 = vld [vmem:[#allocation3 + $0x61] sm:$0xff] }
 0x3d1   :  { %4841 = vst [vmem:[#allocation4 + $0x60] sm:$0xff] %v4825_v47  ;;  %v11243_v18 = vadd.f32 %v10108_v27, %v14584_v59  ;;  %v4683_v41 = vpop.f32.mrb[63].mxu0  ;;  %v4855_v24 = vld [vmem:[#allocation4 + $0x50] ss:$2 sm:$0xff]  ;;  %v4871_v34 = vld [vmem:[#allocation4 + $0x51] ss:$2 sm:$0xff] }
 0x3d2   :  { %v4808_v53 = vmax.f32 %v4776_v26, 0.0  ;;  %v11244_v45 = vadd.f32 %v4683_v41, %v14585_v29  ;;  %v13263_v40 = vmax.f32 %v4855_v24, %v4871_v34  ;;  %v13331_v47 = vld [vmem:[#allocation3 + $0x4f] sm:$0xff]  ;;  %v10703_v26 = vpack.c.bf16 %v8326_v3, %v8325_v2  ;;  %v13334_v27 = vld [vmem:[#allocation3 + $0x57] sm:$0xff]  ;;  %v8327_v59 = vld [vmem:[%s14395_s3 + $0x160] sm:$0xff] }
 0x3d3   :  { %v4778_v56 = vadd.f32 %v11243_v18, %v13179_v49  ;;  %v8328_v18 = vld [vmem:[%s14395_s3 + $0x168] sm:$0xff]  ;;  %v13343_v41 = vld [vmem:[#allocation3 + $0x5f] sm:$0xff]  ;;  %v8345_v3 = vld [vmem:[%s14395_s3 + $0x1f0] sm:$0xff] }
 0x3d4   :  { %v4826_v16 = vmax.f32 %v4806_v15, %v4808_v53  ;;  %v10111_v22 = vpop.f32.mrb[2].mxu0  ;;  %4913 = vst [vmem:[#allocation3 + $0x70] sm:$0xff] %v13263_v40  ;;  %10165 = vmatprep.mubr.f32.mxu1 %v13263_v40  ;;  %v4777_v21 = vadd.f32 %v11244_v45, %v13179_v49  ;;  %v10707_v24 = vpack.c.bf16 %v8328_v18, %v8327_v59  ;;  %v13346_v34 = vld [vmem:[#allocation3 + $0x67] sm:$0xff]  ;;  %v8329_v15 = vld [vmem:[%s14395_s3 + $0x170] sm:$0xff]  ;;  %v8330_v53 = vld [vmem:[%s14395_s3 + $0x178] sm:$0xff] }
 0x3d5   :  { %v4740_v36 = vadd.f32 %v10111_v22, %v13170_v37  ;;  %v4693_v31 = vpop.f32.mrb[3].mxu0  ;;  %10166 = vmatmul.mubr.f32.gmra.mrb[72].mxu1 %v13064_v63  ;;  %v4810_v10 = vmax.f32 %v4778_v56, 0.0  ;;  %v10711_v45 = vpack.c.bf16 %v8330_v53, %v8329_v15  ;;  %v8331_v22 = vld [vmem:[%s14395_s3 + $0x180] sm:$0xff]  ;;  %v8348_v53 = vld [vmem:[%s14395_s3 + $0x208] sm:$0xff] }
 0x3d6   :  { %4842 = vst [vmem:[#allocation4 + $0x68] sm:$0xff] %v4826_v16  ;;  %v4809_v8 = vmax.f32 %v4777_v21, 0.0  ;;  %v8332_v21 = vld [vmem:[%s14395_s3 + $0x188] sm:$0xff]  ;;  %v5255_v31 = vld [vmem:[#allocation3 + $0x11] sm:$0xff]  ;;  %v5256_v56 = vld [vmem:[#allocation3 + $0x19] sm:$0xff] }
 0x3d7   :  { %v4779_v48 = vadd.f32 %v13179_v49, %v4740_v36  ;;  %v8347_v15 = vld [vmem:[%s14395_s3 + $0x200] sm:$0xff] }
 0x3d8   :  { %v10114_v30 = vpop.f32.mrb[4].mxu0 }
 0x3d9   :  { %v4811_v9 = vmax.f32 %v4779_v48, 0.0  ;;  %v4702_v17 = vpop.f32.mrb[5].mxu0  ;;  %v10715_v48 = vpack.c.bf16 %v8332_v21, %v8331_v22  ;;  %v10747_v22 = vpack.c.bf16 %v8348_v53, %v8347_v15  ;;  %v8365_v15 = vld [vmem:[%s14395_s3 + $0x290] sm:$0xff]  ;;  %v8366_v53 = vld [vmem:[%s14395_s3 + $0x298] sm:$0xff] }
 0x3da   :  { %v4741_v1 = vadd.f32 %v4702_v17, %v13173_v62  ;;  %v8317_v62 = vld [vmem:[%s14395_s3 + $0x110] sm:$0xff] }
 0x3db   :  { %v4827_v42 = vmax.f32 %v4809_v8, %v4811_v9  ;;  %v13355_v29 = vld [vmem:[#allocation3 + $0x6f] sm:$0xff]  ;;  %v13358_v16 = vld [vmem:[#allocation3 + $0x77] sm:$0xff] }
 0x3dc   :  { %v4780_v12 = vadd.f32 %v13179_v49, %v4741_v1  ;;  %v8318_v49 = vld [vmem:[%s14395_s3 + $0x118] sm:$0xff]  ;;  %v8333_v8 = vld [vmem:[%s14395_s3 + $0x190] sm:$0xff]  ;;  %v8335_v1 = vld [vmem:[%s14395_s3 + $0x1a0] sm:$0xff] }
 0x3dd   :  { %4843 = vst [vmem:[#allocation4 + $0x70] sm:$0xff] %v4827_v42  ;;  %v4857_v50 = vld [vmem:[#allocation4 + $0x60] ss:$2 sm:$0xff]  ;;  %v4873_v37 = vld [vmem:[#allocation4 + $0x61] ss:$2 sm:$0xff]  ;;  %v10687_v58 = vpack.c.bf16 %v8318_v49, %v8317_v62  ;;  %v8334_v9 = vld [vmem:[%s14395_s3 + $0x198] sm:$0xff] }
 0x3de   :  { %v4812_v43 = vmax.f32 %v4780_v12, 0.0  ;;  %v13274_v5 = vmax.f32 %v4857_v50, %v4873_v37  ;;  %v10719_v17 = vpack.c.bf16 %v8334_v9, %v8333_v8  ;;  %v8336_v42 = vld [vmem:[%s14395_s3 + $0x1a8] sm:$0xff]  ;;  %v13400_v62 = vld [vmem:[#allocation3 + $0x39] sm:$0xff]  ;;  %v13447_v59 = vld [vmem:[#allocation3 + $0x71] sm:$0xff] }
 0x3df   :  { %v13385_v12 = vld [vmem:[#allocation3 + $0x21] sm:$0xff]  ;;  %v10723_v50 = vpack.c.bf16 %v8336_v42, %v8335_v1  ;;  %v13388_v37 = vld [vmem:[#allocation3 + $0x29] sm:$0xff]  ;;  %v8354_v1 = vld [vmem:[%s14395_s3 + $0x238] sm:$0xff] }
 0x3e0   :  { %v4828_v46 = vmax.f32 %v4810_v10, %v4812_v43  ;;  %4914 = vst [vmem:[#allocation3 + $0x80] sm:$0xff] %v13274_v5  ;;  %10168 = vmatprep.mubr.f32.mxu1 %v13274_v5  ;;  %v8337_v10 = vld [vmem:[%s14395_s3 + $0x1b0] sm:$0xff]  ;;  %v8338_v43 = vld [vmem:[%s14395_s3 + $0x1b8] sm:$0xff]  ;;  %v8339_v49 = vld [vmem:[%s14395_s3 + $0x1c0] sm:$0xff] }
 0x3e1   :  { %10169 = vmatmul.mubr.f32.gmra.mrb[74].mxu1 %v13064_v63  ;;  %v10691_v63 = vpack.c.bf16 %v8320_v35, %v8319_v11  ;;  %v13412_v35 = vld [vmem:[#allocation3 + $0x49] sm:$0xff]  ;;  %v8351_v9 = vld [vmem:[%s14395_s3 + $0x220] sm:$0xff] }
 0x3e2   :  { %4844 = vst [vmem:[#allocation4 + $0x78] sm:$0xff] %v4828_v46  ;;  %10203 = vmatprep.mubr.f32.mxu1 %v4916_v7  ;;  %v13397_v7 = vld [vmem:[#allocation3 + $0x31] sm:$0xff]  ;;  %v10727_v46 = vpack.c.bf16 %v8338_v43, %v8337_v10  ;;  %v13438_v2 = vld [vmem:[#allocation3 + $0x69] sm:$0xff]  ;;  %v8355_v42 = vld [vmem:[%s14395_s3 + $0x240] sm:$0xff] }
 0x3e3   :  { %v8357_v43 = vld [vmem:[%s14395_s3 + $0x250] sm:$0xff] }
 0x3e5   :  { %10204 = vmatmul.mubr.f32.vlgmr.msra.gmra.mrb[76].mxu1 %v4917_v19  ;;  %v8340_v19 = vld [vmem:[%s14395_s3 + $0x1c8] sm:$0xff] }
 0x3e6   :  { %10686 = vmatpush3.bf16.msra.mxu1 %v13160_v14  ;;  %10206 = vmatprep.mubr.f32.mxu1 %v13291_v57  ;;  %v10731_v11 = vpack.c.bf16 %v8340_v19, %v8339_v49  ;;  %v8359_v19 = vld [vmem:[%s14395_s3 + $0x260] sm:$0xff] }
 0x3e7   :  { %10688 = vmatprep.subr.bf16.mxu1 %v10687_v58  ;;  %v10149_v32 = vpop.f32.mrb[60].mxu1  ;;  %v13367_v36 = vld [vmem:[#allocation3 + $0x7f] sm:$0xff]  ;;  %v13370_v30 = vld [vmem:[#allocation3 + $0x87] sm:$0xff] }
 0x3e8   :  { %v8343_v32 = vld [vmem:[%s14395_s3 + $0x1e0] sm:$0xff]  ;;  %v13436_v25 = vpop.f32.mrb[61].mxu1 }
 0x3e9   :  { %10207 = vmatmul.mubr.f32.gmra.mrb[78].mxu1 %v13295_v20  ;;  %v4859_v52 = vld [vmem:[#allocation4 + $0x70] ss:$2 sm:$0xff]  ;;  %v4875_v14 = vld [vmem:[#allocation4 + $0x71] ss:$2 sm:$0xff] }
 0x3ea   :  { %10690 = vmatpush3.bf16.msra.mxu1 %v10687_v58  ;;  %10209 = vmatprep.mubr.f32.mxu1 %v13304_v60  ;;  %v13307_v0 = vmax.f32 %v4859_v52, %v4875_v14  ;;  %v13409_v58 = vld [vmem:[#allocation3 + $0x41] sm:$0xff]  ;;  %v13424_v14 = vld [vmem:[#allocation3 + $0x59] sm:$0xff] }
 0x3eb   :  { %10692 = vmatprep.subr.bf16.mxu1 %v10691_v63 }
 0x3ec   :  { %4915 = vst [vmem:[#allocation3 + $0x90] sm:$0xff] %v13307_v0 }
 0x3ed   :  { %10210 = vmatmul.mubr.f32.gmra.mrb[80].mxu1 %v13309_v51 }
 0x3ee   :  { %10694 = vmatpush3.bf16.msra.mxu1 %v10691_v63  ;;  %10212 = vmatprep.mubr.f32.mxu1 %v13319_v4  ;;  %v8341_v63 = vld [vmem:[%s14395_s3 + $0x1d0] sm:$0xff] }
 0x3ef   :  { %10696 = vmatprep.subr.bf16.mxu1 %v10695_v55  ;;  %v10735_v52 = vpack.c.bf16 %v8342_v61, %v8341_v63  ;;  %v8361_v61 = vld [vmem:[%s14395_s3 + $0x270] sm:$0xff] }
 0x3f1   :  { %10213 = vmatmul.mubr.f32.gmra.mrb[82].mxu1 %v13322_v28 }
 0x3f2   :  { %10698 = vmatpush3.bf16.msra.mxu1 %v10695_v55  ;;  %10215 = vmatprep.mubr.f32.mxu1 %v13331_v47  ;;  %v8344_v55 = vld [vmem:[%s14395_s3 + $0x1e8] sm:$0xff] }
 0x3f3   :  { %10700 = vmatprep.subr.bf16.mxu1 %v10699_v13  ;;  %v13462_v21 = vld [vmem:[#allocation3 + $0x89] sm:$0xff] }
 0x3f5   :  { %10216 = vmatmul.mubr.f32.gmra.mrb[84].mxu1 %v13334_v27 }
 0x3f6   :  { %10702 = vmatpush3.bf16.msra.mxu1 %v10699_v13  ;;  %10218 = vmatprep.mubr.f32.mxu1 %v13343_v41  ;;  %v10739_v13 = vpack.c.bf16 %v8344_v55, %v8343_v32  ;;  %v8363_v55 = vld [vmem:[%s14395_s3 + $0x280] sm:$0xff] }
 0x3f7   :  { %10704 = vmatprep.subr.bf16.mxu1 %v10703_v26 }
 0x3f9   :  { %10219 = vmatmul.mubr.f32.gmra.mrb[86].mxu1 %v13346_v34 }
 0x3fa   :  { %10706 = vmatpush3.bf16.msra.mxu1 %v10703_v26  ;;  %10221 = vmatprep.mubr.f32.mxu1 %v13355_v29  ;;  %v8346_v26 = vld [vmem:[%s14395_s3 + $0x1f8] sm:$0xff] }
 0x3fb   :  { %10708 = vmatprep.subr.bf16.mxu1 %v10707_v24  ;;  %v10743_v18 = vpack.c.bf16 %v8346_v26, %v8345_v3  ;;  %v13527_v3 = vld [vmem:[#allocation3 + $0x8f] sm:$0xff] }
 0x3fd   :  { %10222 = vmatmul.mubr.f32.gmra.mrb[88].mxu1 %v13358_v16 }
 0x3fe   :  { %10710 = vmatpush3.bf16.msra.mxu1 %v10707_v24  ;;  %10224 = vmatprep.mubr.f32.mxu1 %v13367_v36  ;;  %v13450_v24 = vld [vmem:[#allocation3 + $0x79] sm:$0xff] }
 0x3ff   :  { %10712 = vmatprep.subr.bf16.mxu1 %v10711_v45 }
 0x401   :  { %10225 = vmatmul.mubr.f32.gmra.mrb[90].mxu1 %v13370_v30 }
 0x402   :  { %10714 = vmatpush3.bf16.msra.mxu1 %v10711_v45  ;;  %10259 = vmatprep.mubr.f32.mxu1 %v5255_v31  ;;  %v13459_v45 = vld [vmem:[#allocation3 + $0x81] sm:$0xff]  ;;  %v8349_v31 = vld [vmem:[%s14395_s3 + $0x210] sm:$0xff] }
 0x403   :  { %10716 = vmatprep.subr.bf16.mxu1 %v10715_v48 }
 0x405   :  { %10260 = vmatmul.mubr.f32.vlgmr.msra.gmra.mrb[92].mxu1 %v5256_v56 }
 0x406   :  { %10718 = vmatpush3.bf16.msra.mxu1 %v10715_v48  ;;  %10262 = vmatprep.mubr.f32.mxu1 %v13385_v12  ;;  %v8350_v48 = vld [vmem:[%s14395_s3 + $0x218] sm:$0xff] }
 0x407   :  { %10720 = vmatprep.subr.bf16.mxu1 %v10719_v17  ;;  %v10751_v8 = vpack.c.bf16 %v8350_v48, %v8349_v31  ;;  %v8367_v31 = vld [vmem:[%s14395_s3 + $0x2a0] sm:$0xff]  ;;  %v8368_v48 = vld [vmem:[%s14395_s3 + $0x2a8] sm:$0xff] }
 0x409   :  { %10263 = vmatmul.mubr.f32.gmra.mrb[94].mxu1 %v13388_v37 }
 0x40a   :  { %10722 = vmatpush3.bf16.msra.mxu1 %v10719_v17  ;;  %10265 = vmatprep.mubr.f32.mxu1 %v13397_v7  ;;  %v8352_v17 = vld [vmem:[%s14395_s3 + $0x228] sm:$0xff] }
 0x40b   :  { %10724 = vmatprep.subr.bf16.mxu1 %v10723_v50  ;;  %v10755_v56 = vpack.c.bf16 %v8352_v17, %v8351_v9  ;;  %v10787_v9 = vpack.c.bf16 %v8368_v48, %v8367_v31  ;;  %v8370_v17 = vld [vmem:[%s14395_s3 + $0x2b8] sm:$0xff]  ;;  %v8389_v48 = vld [vmem:[%s14395_s3 + $0x350] sm:$0xff] }
 0x40d   :  { %10266 = vmatmul.mubr.f32.gmra.mrb[96].mxu1 %v13400_v62 }
 0x40e   :  { %10726 = vmatpush3.bf16.msra.mxu1 %v10723_v50  ;;  %10268 = vmatprep.mubr.f32.mxu1 %v13409_v58  ;;  %v8356_v50 = vld [vmem:[%s14395_s3 + $0x248] sm:$0xff] }
 0x40f   :  { %10728 = vmatprep.subr.bf16.mxu1 %v10727_v46  ;;  %v10763_v10 = vpack.c.bf16 %v8356_v50, %v8355_v42  ;;  %v8376_v50 = vld [vmem:[%s14395_s3 + $0x2e8] sm:$0xff] }
 0x411   :  { %10269 = vmatmul.mubr.f32.gmra.mrb[98].mxu1 %v13412_v35 }
 0x412   :  { %10730 = vmatpush3.bf16.msra.mxu1 %v10727_v46  ;;  %10271 = vmatprep.mubr.f32.mxu1 %v13421_v33  ;;  %v8358_v46 = vld [vmem:[%s14395_s3 + $0x258] sm:$0xff] }
 0x413   :  { %10732 = vmatprep.subr.bf16.mxu1 %v10731_v11  ;;  %v10767_v49 = vpack.c.bf16 %v8358_v46, %v8357_v43  ;;  %v8378_v43 = vld [vmem:[%s14395_s3 + $0x2f8] sm:$0xff] }
 0x415   :  { %10272 = vmatmul.mubr.f32.gmra.mrb[100].mxu1 %v13424_v14 }
 0x416   :  { %10734 = vmatpush3.bf16.msra.mxu1 %v10731_v11  ;;  %10274 = vmatprep.mubr.f32.mxu1 %v13433_v6  ;;  %v8360_v11 = vld [vmem:[%s14395_s3 + $0x268] sm:$0xff] }
 0x417   :  { %10736 = vmatprep.subr.bf16.mxu1 %v10735_v52  ;;  %v10771_v63 = vpack.c.bf16 %v8360_v11, %v8359_v19  ;;  %v8381_v11 = vld [vmem:[%s14395_s3 + $0x310] sm:$0xff] }
 0x419   :  { %10275 = vmatmul.mubr.f32.gmra.mrb[102].mxu1 %v13438_v2 }
 0x41a   :  { %10738 = vmatpush3.bf16.msra.mxu1 %v10735_v52  ;;  %10277 = vmatprep.mubr.f32.mxu1 %v13447_v59  ;;  %v8362_v52 = vld [vmem:[%s14395_s3 + $0x278] sm:$0xff] }
 0x41b   :  { %10740 = vmatprep.subr.bf16.mxu1 %v10739_v13  ;;  %v10775_v32 = vpack.c.bf16 %v8362_v52, %v8361_v61  ;;  %v8383_v52 = vld [vmem:[%s14395_s3 + $0x320] sm:$0xff] }
 0x41d   :  { %10278 = vmatmul.mubr.f32.gmra.mrb[104].mxu1 %v13450_v24 }
 0x41e   :  { %10742 = vmatpush3.bf16.msra.mxu1 %v10739_v13  ;;  %10280 = vmatprep.mubr.f32.mxu1 %v13459_v45  ;;  %v8364_v13 = vld [vmem:[%s14395_s3 + $0x288] sm:$0xff] }
 0x41f   :  { %10744 = vmatprep.subr.bf16.mxu1 %v10743_v18  ;;  %v10779_v26 = vpack.c.bf16 %v8364_v13, %v8363_v55  ;;  %v8386_v13 = vld [vmem:[%s14395_s3 + $0x338] sm:$0xff] }
 0x421   :  { %10281 = vmatmul.mubr.f32.gmra.mrb[106].mxu1 %v13462_v21 }
 0x422   :  { %10746 = vmatpush3.bf16.msra.mxu1 %v10743_v18  ;;  %10315 = vmatprep.mubr.f32.mxu1 %v13291_v57  ;;  %v8353_v57 = vld [vmem:[%s14395_s3 + $0x230] sm:$0xff] }
 0x423   :  { %10748 = vmatprep.subr.bf16.mxu1 %v10747_v22  ;;  %v13530_v18 = vld [vmem:[#allocation3 + $0x97] sm:$0xff] }
 0x425   :  { %10316 = vmatmul.mubr.f32.vlgmr.msra.gmra.mrb[108].mxu1 %v13295_v20  ;;  %v10759_v20 = vpack.c.bf16 %v8354_v1, %v8353_v57  ;;  %v8372_v57 = vld [vmem:[%s14395_s3 + $0x2c8] sm:$0xff] }
 0x426   :  { %10750 = vmatpush3.bf16.msra.mxu1 %v10747_v22  ;;  %10318 = vmatprep.mubr.f32.mxu1 %v13304_v60  ;;  %v10783_v22 = vpack.c.bf16 %v8366_v53, %v8365_v15  ;;  %v8388_v15 = vld [vmem:[%s14395_s3 + $0x348] sm:$0xff] }
 0x427   :  { %10752 = vmatprep.subr.bf16.mxu1 %v10751_v8 }
 0x429   :  { %10319 = vmatmul.mubr.f32.gmra.mrb[110].mxu1 %v13309_v51 }
 0x42a   :  { %10754 = vmatpush3.bf16.msra.mxu1 %v10751_v8  ;;  %10321 = vmatprep.mubr.f32.mxu1 %v13319_v4  ;;  %v13546_v8 = vld [vmem:[#allocation3] sm:$0xff] }
 0x42b   :  { %10756 = vmatprep.subr.bf16.mxu1 %v10755_v56 }
 0x42d   :  { %10322 = vmatmul.mubr.f32.gmra.mrb[112].mxu1 %v13322_v28 }
 0x42e   :  { %10758 = vmatpush3.bf16.msra.mxu1 %v10755_v56  ;;  %10324 = vmatprep.mubr.f32.mxu1 %v13331_v47 }
 0x42f   :  { %10760 = vmatprep.subr.bf16.mxu1 %v10759_v20 }
 0x431   :  { %10325 = vmatmul.mubr.f32.gmra.mrb[114].mxu1 %v13334_v27 }
 0x432   :  { %10762 = vmatpush3.bf16.msra.mxu1 %v10759_v20  ;;  %10327 = vmatprep.mubr.f32.mxu1 %v13343_v41  ;;  %v8374_v20 = vld [vmem:[%s14395_s3 + $0x2d8] sm:$0xff] }
 0x433   :  { %10764 = vmatprep.subr.bf16.mxu1 %v10763_v10 }
 0x435   :  { %10328 = vmatmul.mubr.f32.gmra.mrb[116].mxu1 %v13346_v34 }
 0x436   :  { %10766 = vmatpush3.bf16.msra.mxu1 %v10763_v10  ;;  %10330 = vmatprep.mubr.f32.mxu1 %v13355_v29 }
 0x437   :  { %10768 = vmatprep.subr.bf16.mxu1 %v10767_v49 }
 0x439   :  { %10331 = vmatmul.mubr.f32.gmra.mrb[118].mxu1 %v13358_v16 }
 0x43a   :  { %10770 = vmatpush3.bf16.msra.mxu1 %v10767_v49  ;;  %10333 = vmatprep.mubr.f32.mxu1 %v13367_v36  ;;  %v8380_v49 = vld [vmem:[%s14395_s3 + $0x308] sm:$0xff] }
 0x43b   :  { %10772 = vmatprep.subr.bf16.mxu1 %v10771_v63 }
 0x43d   :  { %10334 = vmatmul.mubr.f32.gmra.mrb[120].mxu1 %v13370_v30 }
 0x43e   :  { %10774 = vmatpush3.bf16.msra.mxu1 %v10771_v63  ;;  %10336 = vmatprep.mubr.f32.mxu1 %v13527_v3  ;;  %v8382_v63 = vld [vmem:[%s14395_s3 + $0x318] sm:$0xff] }
 0x43f   :  { %10776 = vmatprep.subr.bf16.mxu1 %v10775_v32  ;;  %v10815_v61 = vpack.c.bf16 %v8382_v63, %v8381_v11  ;;  %v8400_v11 = vld [vmem:[%s14395_s3 + $0x3a8] sm:$0xff] }
 0x441   :  { %10337 = vmatmul.mubr.f32.gmra.mrb[122].mxu1 %v13530_v18 }
 0x442   :  { %10778 = vmatpush3.bf16.msra.mxu1 %v10775_v32  ;;  %10371 = vmatprep.mubr.f32.mxu1 %v13198_v23  ;;  %v8369_v23 = vld [vmem:[%s14395_s3 + $0x2b0] sm:$0xff]  ;;  %v8384_v32 = vld [vmem:[%s14395_s3 + $0x328] sm:$0xff] }
 0x443   :  { %10780 = vmatprep.subr.bf16.mxu1 %v10779_v26  ;;  %v10791_v56 = vpack.c.bf16 %v8370_v17, %v8369_v23  ;;  %v10819_v55 = vpack.c.bf16 %v8384_v32, %v8383_v52  ;;  %v8391_v17 = vld [vmem:[%s14395_s3 + $0x360] sm:$0xff]  ;;  %v8401_v52 = vld [vmem:[%s14395_s3 + $0x3b0] sm:$0xff]  ;;  %v8402_v32 = vld [vmem:[%s14395_s3 + $0x3b8] sm:$0xff] }
 0x445   :  { %10372 = vmatmul.mubr.f32.vlgmr.msra.gmra.mrb[124].mxu1 %v13546_v8 }
 0x446   :  { %10782 = vmatpush3.bf16.msra.mxu1 %v10779_v26  ;;  %10374 = vmatprep.mubr.f32.mxu1 %v13211_v38  ;;  %v8371_v38 = vld [vmem:[%s14395_s3 + $0x2c0] sm:$0xff] }
 0x447   :  { %10784 = vmatprep.subr.bf16.mxu1 %v10783_v22  ;;  %v10795_v1 = vpack.c.bf16 %v8372_v57, %v8371_v38  ;;  %v8387_v26 = vld [vmem:[%s14395_s3 + $0x340] sm:$0xff]  ;;  %v8393_v57 = vld [vmem:[%s14395_s3 + $0x370] sm:$0xff] }
 0x448   :  { %v10827_v31 = vpack.c.bf16 %v8388_v15, %v8387_v26  ;;  %v8408_v26 = vld [vmem:[%s14395_s3 + $0x3e8] sm:$0xff]  ;;  %v8410_v15 = vld [vmem:[%s14395_s3 + $0x3f8] sm:$0xff] }
 0x449   :  { %10375 = vmatmul.mubr.f32.gmra.mrb[126].mxu1 %v13546_v8 }
 0x44a   :  { %10786 = vmatpush3.bf16.msra.mxu1 %v10783_v22  ;;  %10377 = vmatprep.mubr.f32.mxu1 %v13224_v54  ;;  %v8373_v54 = vld [vmem:[%s14395_s3 + $0x2d0] sm:$0xff] }
 0x44b   :  { %10788 = vmatprep.subr.bf16.mxu1 %v10787_v9  ;;  %v10799_v42 = vpack.c.bf16 %v8374_v20, %v8373_v54 }
 0x44d   :  { %10378 = vmatmul.mubr.f32.gmra.mrb[128].mxu1 %v13546_v8 }
 0x44e   :  { %10790 = vmatpush3.bf16.msra.mxu1 %v10787_v9  ;;  %10380 = vmatprep.mubr.f32.mxu1 %v13237_v44  ;;  %v8375_v44 = vld [vmem:[%s14395_s3 + $0x2e0] sm:$0xff]  ;;  %v8390_v9 = vld [vmem:[%s14395_s3 + $0x358] sm:$0xff] }
 0x44f   :  { %10792 = vmatprep.subr.bf16.mxu1 %v10791_v56  ;;  %v10803_v10 = vpack.c.bf16 %v8376_v50, %v8375_v44  ;;  %v10831_v23 = vpack.c.bf16 %v8390_v9, %v8389_v48  ;;  %v8395_v44 = vld [vmem:[%s14395_s3 + $0x380] sm:$0xff]  ;;  %v8396_v50 = vld [vmem:[%s14395_s3 + $0x388] sm:$0xff] }
 0x451   :  { %10381 = vmatmul.mubr.f32.gmra.mrb[130].mxu1 %v13546_v8 }
 0x452   :  { %10794 = vmatpush3.bf16.msra.mxu1 %v10791_v56  ;;  %10383 = vmatprep.mubr.f32.mxu1 %v13250_v39  ;;  %v8377_v39 = vld [vmem:[%s14395_s3 + $0x2f0] sm:$0xff]  ;;  %v8392_v56 = vld [vmem:[%s14395_s3 + $0x368] sm:$0xff] }
 0x453   :  { %10796 = vmatprep.subr.bf16.mxu1 %v10795_v1  ;;  %v10807_v46 = vpack.c.bf16 %v8378_v43, %v8377_v39  ;;  %v10835_v38 = vpack.c.bf16 %v8392_v56, %v8391_v17  ;;  %v13668_v39 = vld [vmem:[#allocation3 + $0x99] sm:$0xff]  ;;  %v10843_v43 = vpack.c.bf16 %v8396_v50, %v8395_v44  ;;  %v6145_v56 = vld [vmem:[#allocation3 + $0x30] sm:$0xff] }
 0x454   :  { %v8414_v17 = vld [vmem:[%s14395_s3 + $0x418] sm:$0xff]  ;;  %v8417_v44 = vld [vmem:[%s14395_s3 + $0x430] sm:$0xff] }
 0x455   :  { %10384 = vmatmul.mubr.f32.gmra.mrb[132].mxu1 %v13546_v8  ;;  %v8418_v50 = vld [vmem:[%s14395_s3 + $0x438] sm:$0xff] }
 0x456   :  { %10798 = vmatpush3.bf16.msra.mxu1 %v10795_v1  ;;  %10386 = vmatprep.mubr.f32.mxu1 %v13263_v40  ;;  %v8379_v40 = vld [vmem:[%s14395_s3 + $0x300] sm:$0xff]  ;;  %v8394_v1 = vld [vmem:[%s14395_s3 + $0x378] sm:$0xff] }
 0x457   :  { %10800 = vmatprep.subr.bf16.mxu1 %v10799_v42  ;;  %v10811_v19 = vpack.c.bf16 %v8380_v49, %v8379_v40  ;;  %v8398_v40 = vld [vmem:[%s14395_s3 + $0x398] sm:$0xff] }
 0x459   :  { %10387 = vmatmul.mubr.f32.gmra.mrb[134].mxu1 %v13546_v8 }
 0x45a   :  { %10802 = vmatpush3.bf16.msra.mxu1 %v10799_v42  ;;  %10389 = vmatprep.mubr.f32.mxu1 %v13274_v5  ;;  %v10839_v42 = vpack.c.bf16 %v8394_v1, %v8393_v57  ;;  %v8416_v57 = vld [vmem:[%s14395_s3 + $0x428] sm:$0xff]  ;;  %v6147_v1 = vld [vmem:[#allocation3 + $0x40] sm:$0xff] }
 0x45b   :  { %10804 = vmatprep.subr.bf16.mxu1 %v10803_v10 }
 0x45d   :  { %10390 = vmatmul.mubr.f32.gmra.mrb[136].mxu1 %v13546_v8 }
 0x45e   :  { %10806 = vmatpush3.bf16.msra.mxu1 %v10803_v10  ;;  %10392 = vmatprep.mubr.f32.mxu1 %v13307_v0  ;;  %v13665_v10 = vld [vmem:[#allocation3 + $0x91] sm:$0xff] }
 0x45f   :  { %10808 = vmatprep.subr.bf16.mxu1 %v10807_v46 }
 0x461   :  { %10393 = vmatmul.mubr.f32.gmra.mrb[138].mxu1 %v13546_v8 }
 0x462   :  { %10810 = vmatpush3.bf16.msra.mxu1 %v10807_v46  ;;  %10427 = vmatprep.mubr.f32.mxu1 %v13385_v12  ;;  %v8385_v12 = vld [vmem:[%s14395_s3 + $0x330] sm:$0xff] }
 0x463   :  { %10812 = vmatprep.subr.bf16.mxu1 %v10811_v19  ;;  %v8397_v46 = vld [vmem:[%s14395_s3 + $0x390] sm:$0xff] }
 0x464   :  { %v10847_v49 = vpack.c.bf16 %v8398_v40, %v8397_v46  ;;  %v10887_v40 = vpack.c.bf16 %v8418_v50, %v8417_v44 }
 0x465   :  { %10428 = vmatmul.mubr.f32.vlgmr.msra.gmra.mrb[140].mxu1 %v13388_v37  ;;  %v10823_v37 = vpack.c.bf16 %v8386_v13, %v8385_v12  ;;  %v8406_v12 = vld [vmem:[%s14395_s3 + $0x3d8] sm:$0xff] }
 0x466   :  { %10814 = vmatpush3.bf16.msra.mxu1 %v10811_v19  ;;  %10430 = vmatprep.mubr.f32.mxu1 %v13397_v7  ;;  %v8399_v19 = vld [vmem:[%s14395_s3 + $0x3a0] sm:$0xff] }
 0x467   :  { %10816 = vmatprep.subr.bf16.mxu1 %v10815_v61 }
 0x469   :  { %10431 = vmatmul.mubr.f32.gmra.mrb[142].mxu1 %v13400_v62 }
 0x46a   :  { %10818 = vmatpush3.bf16.msra.mxu1 %v10815_v61  ;;  %10433 = vmatprep.mubr.f32.mxu1 %v13409_v58 }
 0x46b   :  { %10820 = vmatprep.subr.bf16.mxu1 %v10819_v55 }
 0x46c   :  { %v10152_v53 = vpop.f32.mrb[62].mxu1 }
 0x46d   :  { %10434 = vmatmul.mubr.f32.gmra.mrb[144].mxu1 %v13412_v35  ;;  %v13629_v22 = vpop.f32.mrb[63].mxu1 }
 0x46e   :  { %10822 = vmatpush3.bf16.msra.mxu1 %v10819_v55  ;;  %10436 = vmatprep.mubr.f32.mxu1 %v13421_v33  ;;  %v8404_v55 = vld [vmem:[%s14395_s3 + $0x3c8] sm:$0xff] }
 0x46f   :  { %10824 = vmatprep.subr.bf16.mxu1 %v10823_v37 }
 0x471   :  { %10437 = vmatmul.mubr.f32.gmra.mrb[146].mxu1 %v13424_v14 }
 0x472   :  { %10826 = vmatpush3.bf16.msra.mxu1 %v10823_v37  ;;  %10439 = vmatprep.mubr.f32.mxu1 %v13433_v6 }
 0x473   :  { %10828 = vmatprep.subr.bf16.mxu1 %v10827_v31 }
 0x475   :  { %10440 = vmatmul.mubr.f32.gmra.mrb[148].mxu1 %v13438_v2 }
 0x476   :  { %10830 = vmatpush3.bf16.msra.mxu1 %v10827_v31  ;;  %10442 = vmatprep.mubr.f32.mxu1 %v13447_v59  ;;  %v8412_v31 = vld [vmem:[%s14395_s3 + $0x408] sm:$0xff] }
 0x477   :  { %10832 = vmatprep.subr.bf16.mxu1 %v10831_v23 }
 0x478   :  { %v10155_v54 = vpop.f32.mrb[64].mxu1 }
 0x479   :  { %10443 = vmatmul.mubr.f32.gmra.mrb[150].mxu1 %v13450_v24  ;;  %v13655_v20 = vpop.f32.mrb[65].mxu1 }
 0x47a   :  { %10834 = vmatpush3.bf16.msra.mxu1 %v10831_v23  ;;  %10445 = vmatprep.mubr.f32.mxu1 %v13459_v45  ;;  %v8413_v23 = vld [vmem:[%s14395_s3 + $0x410] sm:$0xff] }
 0x47b   :  { %10836 = vmatprep.subr.bf16.mxu1 %v10835_v38 }
 0x47d   :  { %10446 = vmatmul.mubr.f32.gmra.mrb[152].mxu1 %v13462_v21 }
 0x47e   :  { %10838 = vmatpush3.bf16.msra.mxu1 %v10835_v38  ;;  %10448 = vmatprep.mubr.f32.mxu1 %v13665_v10  ;;  %v8415_v38 = vld [vmem:[%s14395_s3 + $0x420] sm:$0xff] }
 0x47f   :  { %10840 = vmatprep.subr.bf16.mxu1 %v10839_v42  ;;  %v10883_v54 = vpack.c.bf16 %v8416_v57, %v8415_v38 }
 0x481   :  { %10449 = vmatmul.mubr.f32.gmra.mrb[154].mxu1 %v13668_v39 }
 0x482   :  { %10842 = vmatpush3.bf16.msra.mxu1 %v10839_v42  ;;  %10483 = vmatprep.mubr.f32.mxu1 %v13304_v60  ;;  %v10851_v60 = vpack.c.bf16 %v8400_v11, %v8399_v19  ;;  %v8420_v19 = vld [vmem:[%s14395_s3 + $0x448] sm:$0xff]  ;;  %v6151_v11 = vld [vmem:[#allocation3 + $0x60] sm:$0xff] }
 0x483   :  { %10844 = vmatprep.subr.bf16.mxu1 %v10843_v43 }
 0x484   :  { %v10158_v63 = vpop.f32.mrb[66].mxu1 }
 0x485   :  { %10484 = vmatmul.mubr.f32.vlgmr.msra.gmra.mrb[156].mxu1 %v13309_v51  ;;  %v13685_v61 = vpop.f32.mrb[67].mxu1  ;;  %v10855_v51 = vpack.c.bf16 %v8402_v32, %v8401_v52  ;;  %v8422_v52 = vld [vmem:[%s14395_s3 + $0x458] sm:$0xff]  ;;  %v6153_v32 = vld [vmem:[#allocation3 + $0x70] sm:$0xff] }
 0x486   :  { %10846 = vmatpush3.bf16.msra.mxu1 %v10843_v43  ;;  %10486 = vmatprep.mubr.f32.mxu1 %v13319_v4  ;;  %v8403_v4 = vld [vmem:[%s14395_s3 + $0x3c0] sm:$0xff]  ;;  %v6149_v43 = vld [vmem:[#allocation3 + $0x50] sm:$0xff] }
 0x487   :  { %10848 = vmatprep.subr.bf16.mxu1 %v10847_v49 }
 0x489   :  { %10487 = vmatmul.mubr.f32.gmra.mrb[158].mxu1 %v13322_v28  ;;  %v10859_v28 = vpack.c.bf16 %v8404_v55, %v8403_v4  ;;  %v8423_v55 = vld [vmem:[%s14395_s3 + $0x460] sm:$0xff] }
 0x48a   :  { %10850 = vmatpush3.bf16.msra.mxu1 %v10847_v49  ;;  %10489 = vmatprep.mubr.f32.mxu1 %v13331_v47  ;;  %v8405_v47 = vld [vmem:[%s14395_s3 + $0x3d0] sm:$0xff]  ;;  %v8419_v49 = vld [vmem:[%s14395_s3 + $0x440] sm:$0xff] }
 0x48b   :  { %10852 = vmatprep.subr.bf16.mxu1 %v10851_v60  ;;  %v10891_v63 = vpack.c.bf16 %v8420_v19, %v8419_v49 }
 0x48d   :  { %10490 = vmatmul.mubr.f32.gmra.mrb[160].mxu1 %v13334_v27  ;;  %v10863_v27 = vpack.c.bf16 %v8406_v12, %v8405_v47 }
 0x48e   :  { %10854 = vmatpush3.bf16.msra.mxu1 %v10851_v60  ;;  %10492 = vmatprep.mubr.f32.mxu1 %v13343_v41  ;;  %v8407_v41 = vld [vmem:[%s14395_s3 + $0x3e0] sm:$0xff]  ;;  %v8421_v60 = vld [vmem:[%s14395_s3 + $0x450] sm:$0xff] }
 0x48f   :  { %10856 = vmatprep.subr.bf16.mxu1 %v10855_v51 }
 0x490   :  { %v10161_v13 = vpop.f32.mrb[68].mxu1 }
 0x491   :  { %10493 = vmatmul.mubr.f32.gmra.mrb[162].mxu1 %v13346_v34  ;;  %v13711_v37 = vpop.f32.mrb[69].mxu1  ;;  %v10867_v34 = vpack.c.bf16 %v8408_v26, %v8407_v41  ;;  %v8426_v41 = vld [vmem:[%s14395_s3 + $0x478] sm:$0xff] }
 0x492   :  { %10858 = vmatpush3.bf16.msra.mxu1 %v10855_v51  ;;  %10495 = vmatprep.mubr.f32.mxu1 %v13355_v29  ;;  %v8409_v29 = vld [vmem:[%s14395_s3 + $0x3f0] sm:$0xff]  ;;  %v10895_v51 = vpack.c.bf16 %v8422_v52, %v8421_v60 }
 0x493   :  { %10860 = vmatprep.subr.bf16.mxu1 %v10859_v28  ;;  %v10871_v53 = vpack.c.bf16 %v8410_v15, %v8409_v29 }
 0x495   :  { %10496 = vmatmul.mubr.f32.gmra.mrb[164].mxu1 %v13358_v16  ;;  %v5981_v16 = vld [vmem:[#allocation3 + $0x9f] sm:$0xff] }
 0x496   :  { %10862 = vmatpush3.bf16.msra.mxu1 %v10859_v28  ;;  %10498 = vmatprep.mubr.f32.mxu1 %v13367_v36  ;;  %v8411_v36 = vld [vmem:[%s14395_s3 + $0x400] sm:$0xff]  ;;  %v8424_v28 = vld [vmem:[%s14395_s3 + $0x468] sm:$0xff] }
 0x497   :  { %10864 = vmatprep.subr.bf16.mxu1 %v10863_v27  ;;  %v10899_v12 = vpack.c.bf16 %v8424_v28, %v8423_v55 }
 0x499   :  { %10499 = vmatmul.mubr.f32.gmra.mrb[166].mxu1 %v13370_v30  ;;  %v5982_v30 = vld [vmem:[#allocation3 + $0xa7] sm:$0xff] }
 0x49a   :  { %10866 = vmatpush3.bf16.msra.mxu1 %v10863_v27  ;;  %10501 = vmatprep.mubr.f32.mxu1 %v13527_v3  ;;  %v10875_v3 = vpack.c.bf16 %v8412_v31, %v8411_v36  ;;  %v8425_v27 = vld [vmem:[%s14395_s3 + $0x470] sm:$0xff] }
 0x49b   :  { %10868 = vmatprep.subr.bf16.mxu1 %v10867_v34 }
 0x49c   :  { %v10164_v48 = vpop.f32.mrb[70].mxu1 }
 0x49d   :  { %10502 = vmatmul.mubr.f32.gmra.mrb[168].mxu1 %v13530_v18  ;;  %v13737_v9 = vpop.f32.mrb[71].mxu1  ;;  %v10879_v18 = vpack.c.bf16 %v8414_v17, %v8413_v23 }
 0x49e   :  { %10870 = vmatpush3.bf16.msra.mxu1 %v10867_v34  ;;  %10504 = vmatprep.mubr.f32.mxu1 %v5981_v16 }
 0x49f   :  { %10872 = vmatprep.subr.bf16.mxu1 %v10871_v53 }
 0x4a1   :  { %10505 = vmatmul.mubr.f32.gmra.mrb[170].mxu1 %v5982_v30 }
 0x4a2   :  { %10874 = vmatpush3.bf16.msra.mxu1 %v10871_v53  ;;  %10539 = vmatprep.mubr.f32.mxu1 %v6145_v56 }
 0x4a3   :  { %10876 = vmatprep.subr.bf16.mxu1 %v10875_v3 }
 0x4a5   :  { %10540 = vmatmul.mubr.f32.vlgmr.msra.gmra.mrb[172].mxu1 %v13546_v8 }
 0x4a6   :  { %10878 = vmatpush3.bf16.msra.mxu1 %v10875_v3  ;;  %10542 = vmatprep.mubr.f32.mxu1 %v6147_v1 }
 0x4a7   :  { %10880 = vmatprep.subr.bf16.mxu1 %v10879_v18 }
 0x4a8   :  { %v10167_v42 = vpop.f32.mrb[72].mxu1 }
 0x4a9   :  { %10543 = vmatmul.mubr.f32.gmra.mrb[174].mxu1 %v13546_v8  ;;  %v13759_v46 = vpop.f32.mrb[73].mxu1 }
 0x4aa   :  { %10882 = vmatpush3.bf16.msra.mxu1 %v10879_v18  ;;  %10545 = vmatprep.mubr.f32.mxu1 %v6149_v43  ;;  %v6338_v18 = vld [vmem:[#allocation3 + $0xa9] sm:$0xff] }
 0x4ab   :  { %10884 = vmatprep.subr.bf16.mxu1 %v10883_v54 }
 0x4ad   :  { %10546 = vmatmul.mubr.f32.gmra.mrb[176].mxu1 %v13546_v8 }
 0x4ae   :  { %10886 = vmatpush3.bf16.msra.mxu1 %v10883_v54  ;;  %10548 = vmatprep.mubr.f32.mxu1 %v6151_v11 }
 0x4af   :  { %10888 = vmatprep.subr.bf16.mxu1 %v10887_v40 }
 0x4b1   :  { %10549 = vmatmul.mubr.f32.gmra.mrb[178].mxu1 %v13546_v8 }
 0x4b2   :  { %10890 = vmatpush3.bf16.msra.mxu1 %v10887_v40  ;;  %10551 = vmatprep.mubr.f32.mxu1 %v6153_v32 }
 0x4b3   :  { %10892 = vmatprep.subr.bf16.mxu1 %v10891_v63 }
 0x4b4   :  { %v10170_v4 = vpop.f32.mrb[74].mxu1 }
 0x4b5   :  { %v5110_v47 = vpop.f32.mrb[75].mxu1  ;;  %10552 = vmatmul.mubr.f32.gmra.mrb[180].mxu1 %v13546_v8 }
 0x4b6   :  { %10894 = vmatpush3.bf16.msra.mxu1 %v10891_v63  ;;  %10554 = vmatprep.mubr.f32.mxu1 %v13274_v5  ;;  %v10903_v5 = vpack.c.bf16 %v8426_v41, %v8425_v27 }
 0x4b7   :  { %10896 = vmatprep.subr.bf16.mxu1 %v10895_v51 }
 0x4b8   :  { %v10205_v13 = vpop.f32.mrb[76].mxu1 }
 0x4b9   :  { %v5184_v26 = vpop.f32.mrb[77].mxu1  ;;  %10555 = vmatmul.mubr.f32.gmra.mrb[182].mxu1 %v13546_v8 }
 0x4ba   :  { %v5185_v34 = vadd.f32 %v5184_v26, %v13436_v25  ;;  %10898 = vmatpush3.bf16.msra.mxu1 %v10895_v51  ;;  %10557 = vmatprep.mubr.f32.mxu1 %v13307_v0 }
 0x4bb   :  { %10900 = vmatprep.subr.bf16.mxu1 %v10899_v12 }
 0x4bc   :  { %v10208_v29 = vpop.f32.mrb[78].mxu1 }
 0x4bd   :  { %v5193_v15 = vpop.f32.mrb[79].mxu1  ;;  %10558 = vmatmul.mubr.f32.gmra.mrb[184].mxu1 %v13546_v8 }
 0x4be   :  { %v5194_v16 = vadd.f32 %v5193_v15, %v13629_v22  ;;  %10902 = vmatpush3.bf16.msra.mxu1 %v10899_v12  ;;  %10560 = vmatprep.mubr.f32.mxu1 %v13546_v8 }
 0x4bf   :  { %10904 = vmatprep.subr.bf16.mxu1 %v10903_v5 }
 0x4c0   :  { %v10211_v53 = vpop.f32.mrb[80].mxu1 }
 0x4c1   :  { %v5202_v36 = vpop.f32.mrb[81].mxu1  ;;  %10561 = vmatmul.mubr.f32.gmra.mrb[186].mxu1 %v13546_v8  ;;  %v6557_v53 = vld [vmem:[%s14397_s5 + $0x28] sm:$0xff] }
 0x4c2   :  { %v5203_v25 = vadd.f32 %v5202_v36, %v13655_v20  ;;  %10906 = vmatpush3.bf16.msra.mxu1 %v10903_v5  ;;  %10595 = vmatprep.mubr.f32.mxu1 %v13397_v7 }
 0x4c4   :  { %v10214_v0 = vpop.f32.mrb[82].mxu1 }
 0x4c5   :  { %v5211_v31 = vpop.f32.mrb[83].mxu1  ;;  %10596 = vmatmul.mubr.f32.vlgmr.msra.gmra.mrb[188].mxu1 %v13400_v62  ;;  %v6552_v0 = vld [vmem:[%s14397_s5] sm:$0xff] }
 0x4c6   :  { %v5212_v48 = vadd.f32 %v5211_v31, %v13685_v61  ;;  %10598 = vmatprep.mubr.f32.mxu1 %v13409_v58  ;;  %v6556_v31 = vld [vmem:[%s14397_s5 + $0x20] sm:$0xff] }
 0x4c8   :  { %v10217_v22 = vpop.f32.mrb[84].mxu1 }
 0x4c9   :  { %v5220_v30 = vpop.f32.mrb[85].mxu1  ;;  %10599 = vmatmul.mubr.f32.gmra.mrb[190].mxu1 %v13412_v35  ;;  %v13830_v22 = vpack.c.bf16 %v6556_v31, %v6552_v0 }
 0x4ca   :  { %v5221_v3 = vadd.f32 %v5220_v30, %v13711_v37  ;;  %10601 = vmatprep.mubr.f32.mxu1 %v13421_v33 }
 0x4cc   :  { %v10220_v20 = vpop.f32.mrb[86].mxu1 }
 0x4cd   :  { %v5229_v23 = vpop.f32.mrb[87].mxu1  ;;  %10602 = vmatmul.mubr.f32.gmra.mrb[192].mxu1 %v13424_v14 }
 0x4ce   :  { %v5230_v7 = vadd.f32 %v5229_v23, %v13737_v9  ;;  %10604 = vmatprep.mubr.f32.mxu1 %v13433_v6  ;;  %v6337_v9 = vld [vmem:[#allocation3 + $0xa1] sm:$0xff] }
 0x4d0   :  { %v10223_v62 = vpop.f32.mrb[88].mxu1 }
 0x4d1   :  { %v5238_v61 = vpop.f32.mrb[89].mxu1  ;;  %10605 = vmatmul.mubr.f32.gmra.mrb[194].mxu1 %v13438_v2 }
 0x4d2   :  { %v5239_v58 = vadd.f32 %v5238_v61, %v13759_v46  ;;  %10607 = vmatprep.mubr.f32.mxu1 %v13447_v59 }
 0x4d4   :  { %v10226_v35 = vpop.f32.mrb[90].mxu1 }
 0x4d5   :  { %v5247_v37 = vpop.f32.mrb[91].mxu1  ;;  %10608 = vmatmul.mubr.f32.gmra.mrb[196].mxu1 %v13450_v24 }
 0x4d6   :  { %v5248_v33 = vadd.f32 %v5247_v37, %v5110_v47  ;;  %10610 = vmatprep.mubr.f32.mxu1 %v13459_v45 }
 0x4d8   :  { %v10261_v14 = vpop.f32.mrb[92].mxu1 }
 0x4d9   :  { %v5354_v17 = vpop.f32.mrb[93].mxu1  ;;  %10611 = vmatmul.mubr.f32.gmra.mrb[198].mxu1 %v13462_v21 }
 0x4da   :  { %v5425_v6 = vadd.f32 %v5354_v17, %v5185_v34  ;;  %10613 = vmatprep.mubr.f32.mxu1 %v13665_v10 }
 0x4dc   :  { %v10264_v2 = vpop.f32.mrb[94].mxu1 }
 0x4dd   :  { %v5363_v56 = vpop.f32.mrb[95].mxu1  ;;  %10614 = vmatmul.mubr.f32.gmra.mrb[200].mxu1 %v13668_v39 }
 0x4de   :  { %v5426_v59 = vadd.f32 %v5363_v56, %v5194_v16  ;;  %10616 = vmatprep.mubr.f32.mxu1 %v6337_v9  ;;  %v6553_v16 = vld [vmem:[%s14397_s5 + $0x8] sm:$0xff] }
 0x4df   :  { %v6561_v56 = vld [vmem:[%s14397_s5 + $0x48] sm:$0xff] }
 0x4e0   :  { %v10267_v38 = vpop.f32.mrb[96].mxu1 }
 0x4e1   :  { %v5372_v24 = vpop.f32.mrb[97].mxu1  ;;  %10617 = vmatmul.mubr.f32.gmra.mrb[202].mxu1 %v6338_v18  ;;  %v6560_v18 = vld [vmem:[%s14397_s5 + $0x40] sm:$0xff] }
 0x4e2   :  { %v5427_v57 = vadd.f32 %v5372_v24, %v5203_v25  ;;  %6722 = vmatprep.mubr.f32.mxu1 %v13546_v8  ;;  %v13822_v25 = vpack.c.bf16 %v6557_v53, %v6553_v16  ;;  %v6564_v24 = vld [vmem:[%s14397_s5 + $0x60] sm:$0xff] }
 0x4e4   :  { %v10270_v45 = vpop.f32.mrb[98].mxu1  ;;  %10908 = vmatprep.subr.bf16.mxu1 %v13822_v25 }
 0x4e5   :  { %v5381_v1 = vpop.f32.mrb[99].mxu1  ;;  %10910 = vmatpush1.bf16.msra.mxu1 %v13830_v22  ;;  %v13848_v45 = vpack.c.bf16 %v6564_v24, %v6560_v18 }
 0x4e6   :  { %v5428_v21 = vadd.f32 %v5381_v1, %v5212_v48 }
 0x4e8   :  { %v10273_v54 = vpop.f32.mrb[100].mxu1 }
 0x4e9   :  { %v5390_v42 = vpop.f32.mrb[101].mxu1 }
 0x4ea   :  { %v5429_v10 = vadd.f32 %v5390_v42, %v5221_v3 }
 0x4ec   :  { %v10276_v44 = vpop.f32.mrb[102].mxu1 }
 0x4ed   :  { %v5399_v50 = vpop.f32.mrb[103].mxu1  ;;  %v6559_v44 = vld [vmem:[%s14397_s5 + $0x38] sm:$0xff] }
 0x4ee   :  { %v5430_v43 = vadd.f32 %v5399_v50, %v5230_v7 }
 0x4f0   :  { %v10279_v46 = vpop.f32.mrb[104].mxu1 }
 0x4f1   :  { %v5408_v39 = vpop.f32.mrb[105].mxu1 }
 0x4f2   :  { %v5431_v40 = vadd.f32 %v5408_v39, %v5239_v58 }
 0x4f4   :  { %v10282_v49 = vpop.f32.mrb[106].mxu1 }
 0x4f5   :  { %v5417_v19 = vpop.f32.mrb[107].mxu1 }
 0x4f6   :  { %v5432_v11 = vadd.f32 %v5417_v19, %v5248_v33 }
 0x4f8   :  { %v10317_v63 = vpop.f32.mrb[108].mxu1 }
 0x4f9   :  { %v5532_v60 = vpop.f32.mrb[109].mxu1 }
 0x4fa   :  { %v5603_v52 = vadd.f32 %v5532_v60, %v5425_v6 }
 0x4fc   :  { %v10320_v32 = vpop.f32.mrb[110].mxu1 }
 0x4fd   :  { %v5541_v51 = vpop.f32.mrb[111].mxu1 }
 0x4fe   :  { %v5604_v4 = vadd.f32 %v5541_v51, %v5426_v59  ;;  %v6565_v59 = vld [vmem:[%s14397_s5 + $0x68] sm:$0xff] }
 0x4ff   :  { %v13843_v38 = vpack.c.bf16 %v6565_v59, %v6561_v56 }
 0x500   :  { %v10323_v55 = vpop.f32.mrb[112].mxu1 }
 0x501   :  { %v5550_v28 = vpop.f32.mrb[113].mxu1  ;;  %10912 = vmatprep.subr.bf16.mxu1 %v13843_v38 }
 0x502   :  { %v5605_v47 = vadd.f32 %v5550_v28, %v5427_v57  ;;  %10914 = vmatpush1.bf16.msra.mxu1 %v13848_v45 }
 0x504   :  { %v10326_v12 = vpop.f32.mrb[114].mxu1 }
 0x505   :  { %v5559_v13 = vpop.f32.mrb[115].mxu1 }
 0x506   :  { %v5606_v27 = vadd.f32 %v5559_v13, %v5428_v21 }
 0x508   :  { %v10329_v41 = vpop.f32.mrb[116].mxu1 }
 0x509   :  { %v5568_v26 = vpop.f32.mrb[117].mxu1 }
 0x50a   :  { %v5607_v34 = vadd.f32 %v5568_v26, %v5429_v10  ;;  %v6555_v10 = vld [vmem:[%s14397_s5 + $0x18] sm:$0xff] }
 0x50c   :  { %v10332_v5 = vpop.f32.mrb[118].mxu1 }
 0x50d   :  { %v5577_v29 = vpop.f32.mrb[119].mxu1 }
 0x50e   :  { %v5608_v15 = vadd.f32 %v5577_v29, %v5430_v43  ;;  %v13858_v43 = vpack.c.bf16 %v6559_v44, %v6555_v10 }
 0x510   :  { %v10335_v36 = vpop.f32.mrb[120].mxu1  ;;  %10916 = vmatprep.subr.bf16.mxu1 %v13858_v43 }
 0x511   :  { %v5586_v48 = vpop.f32.mrb[121].mxu1 }
 0x512   :  { %v5609_v30 = vadd.f32 %v5586_v48, %v5431_v40 }
 0x514   :  { %v10338_v3 = vpop.f32.mrb[122].mxu1 }
 0x515   :  { %v5595_v20 = vpop.f32.mrb[123].mxu1 }
 0x516   :  { %v5610_v23 = vadd.f32 %v5595_v20, %v5432_v11 }
 0x518   :  { %v10373_v7 = vpop.f32.mrb[124].mxu1 }
 0x519   :  { %v5710_v62 = vpop.f32.mrb[125].mxu1 }
 0x51a   :  { %v5781_v61 = vadd.f32 %v5710_v62, %v5603_v52 }
 0x51c   :  { %v10376_v58 = vpop.f32.mrb[126].mxu1 }
 0x51d   :  { %v5719_v35 = vpop.f32.mrb[127].mxu1 }
 0x51e   :  { %v5782_v37 = vadd.f32 %v5719_v35, %v5604_v4 }
 0x520   :  { %v10379_v33 = vpop.f32.mrb[128].mxu1 }
 0x521   :  { %v5728_v14 = vpop.f32.mrb[129].mxu1 }
 0x522   :  { %v5783_v17 = vadd.f32 %v5728_v14, %v5605_v47 }
 0x524   :  { %v10382_v6 = vpop.f32.mrb[130].mxu1 }
 0x525   :  { %v5737_v9 = vpop.f32.mrb[131].mxu1 }
 0x526   :  { %v5784_v2 = vadd.f32 %v5737_v9, %v5606_v27 }
 0x528   :  { %v10385_v57 = vpop.f32.mrb[132].mxu1 }
 0x529   :  { %v5746_v1 = vpop.f32.mrb[133].mxu1 }
 0x52a   :  { %v5785_v21 = vadd.f32 %v5746_v1, %v5607_v34 }
 0x52c   :  { %v10388_v54 = vpop.f32.mrb[134].mxu1 }
 0x52d   :  { %v5755_v42 = vpop.f32.mrb[135].mxu1 }
 0x52e   :  { %v5786_v50 = vadd.f32 %v5755_v42, %v5608_v15 }
 0x530   :  { %v10391_v46 = vpop.f32.mrb[136].mxu1 }
 0x531   :  { %v5764_v39 = vpop.f32.mrb[137].mxu1 }
 0x532   :  { %v5787_v40 = vadd.f32 %v5764_v39, %v5609_v30 }
 0x534   :  { %v10394_v49 = vpop.f32.mrb[138].mxu1 }
 0x535   :  { %v5773_v19 = vpop.f32.mrb[139].mxu1 }
 0x536   :  { %v5788_v11 = vadd.f32 %v5773_v19, %v5610_v23 }
 0x538   :  { %v10429_v63 = vpop.f32.mrb[140].mxu1 }
 0x539   :  { %v5888_v60 = vpop.f32.mrb[141].mxu1 }
 0x53a   :  { %v5959_v52 = vadd.f32 %v5888_v60, %v5781_v61 }
 0x53c   :  { %v10432_v32 = vpop.f32.mrb[142].mxu1 }
 0x53d   :  { %v5897_v51 = vpop.f32.mrb[143].mxu1 }
 0x53e   :  { %v5960_v4 = vadd.f32 %v5897_v51, %v5782_v37 }
 0x540   :  { %v10435_v55 = vpop.f32.mrb[144].mxu1 }
 0x541   :  { %v5906_v28 = vpop.f32.mrb[145].mxu1 }
 0x542   :  { %v5961_v47 = vadd.f32 %v5906_v28, %v5783_v17 }
 0x544   :  { %v10438_v12 = vpop.f32.mrb[146].mxu1 }
 0x545   :  { %v5915_v13 = vpop.f32.mrb[147].mxu1 }
 0x546   :  { %v5962_v27 = vadd.f32 %v5915_v13, %v5784_v2 }
 0x548   :  { %v10441_v41 = vpop.f32.mrb[148].mxu1 }
 0x549   :  { %v5924_v26 = vpop.f32.mrb[149].mxu1 }
 0x54a   :  { %v5963_v34 = vadd.f32 %v5924_v26, %v5785_v21 }
 0x54c   :  { %v10444_v5 = vpop.f32.mrb[150].mxu1 }
 0x54d   :  { %v5933_v29 = vpop.f32.mrb[151].mxu1 }
 0x54e   :  { %v5964_v15 = vadd.f32 %v5933_v29, %v5786_v50 }
 0x550   :  { %v10447_v16 = vpop.f32.mrb[152].mxu1 }
 0x551   :  { %v5942_v53 = vpop.f32.mrb[153].mxu1 }
 0x552   :  { %v5965_v36 = vadd.f32 %v5942_v53, %v5787_v40 }
 0x554   :  { %v10450_v0 = vpop.f32.mrb[154].mxu1 }
 0x555   :  { %v5951_v31 = vpop.f32.mrb[155].mxu1 }
 0x556   :  { %v5966_v48 = vadd.f32 %v5951_v31, %v5788_v11 }
 0x558   :  { %v10485_v30 = vpop.f32.mrb[156].mxu1 }
 0x559   :  { %v6066_v3 = vpop.f32.mrb[157].mxu1 }
 0x55a   :  { %v6137_v20 = vadd.f32 %v6066_v3, %v5959_v52 }
 0x55c   :  { %v10488_v23 = vpop.f32.mrb[158].mxu1 }
 0x55d   :  { %v6075_v7 = vpop.f32.mrb[159].mxu1 }
 0x55e   :  { %v6138_v62 = vadd.f32 %v6075_v7, %v5960_v4 }
 0x560   :  { %v10491_v61 = vpop.f32.mrb[160].mxu1 }
 0x561   :  { %v6084_v58 = vpop.f32.mrb[161].mxu1 }
 0x562   :  { %v6139_v35 = vadd.f32 %v6084_v58, %v5961_v47 }
 0x564   :  { %v10494_v37 = vpop.f32.mrb[162].mxu1 }
 0x565   :  { %v6093_v33 = vpop.f32.mrb[163].mxu1 }
 0x566   :  { %v6140_v14 = vadd.f32 %v6093_v33, %v5962_v27 }
 0x568   :  { %v10497_v17 = vpop.f32.mrb[164].mxu1 }
 0x569   :  { %v6102_v6 = vpop.f32.mrb[165].mxu1 }
 0x56a   :  { %v6141_v9 = vadd.f32 %v6102_v6, %v5963_v34 }
 0x56c   :  { %v10500_v2 = vpop.f32.mrb[166].mxu1 }
 0x56d   :  { %v6111_v56 = vpop.f32.mrb[167].mxu1  ;;  %v6554_v2 = vld [vmem:[%s14397_s5 + $0x10] sm:$0xff] }
 0x56e   :  { %v6142_v59 = vadd.f32 %v6111_v56, %v5964_v15  ;;  %v13866_v15 = vld [vmem:[%s14398_s4] ss:$0 sm:$0xff]  ;;  %v6558_v56 = vld [vmem:[%s14397_s5 + $0x30] sm:$0xff] }
 0x570   :  { %v10503_v18 = vpop.f32.mrb[168].mxu1 }
 0x571   :  { %v6120_v24 = vpop.f32.mrb[169].mxu1 }
 0x572   :  { %v6143_v57 = vadd.f32 %v6120_v24, %v5965_v36  ;;  %v6563_v24 = vld [vmem:[%s14397_s5 + $0x58] sm:$0xff] }
 0x574   :  { %v10506_v1 = vpop.f32.mrb[170].mxu1 }
 0x575   :  { %v6129_v21 = vpop.f32.mrb[171].mxu1 }
 0x576   :  { %v6144_v54 = vadd.f32 %v6129_v21, %v5966_v48 }
 0x578   :  { %v10541_v42 = vpop.f32.mrb[172].mxu1 }
 0x579   :  { %v6244_v10 = vpop.f32.mrb[173].mxu1 }
 0x57a   :  { %v6315_v44 = vadd.f32 %v6244_v10, %v6137_v20 }
 0x57c   :  { %v10544_v50 = vpop.f32.mrb[174].mxu1 }
 0x57d   :  { %v6253_v46 = vpop.f32.mrb[175].mxu1 }
 0x57e   :  { %v6316_v39 = vadd.f32 %v6253_v46, %v6138_v62 }
 0x580   :  { %v10547_v40 = vpop.f32.mrb[176].mxu1 }
 0x581   :  { %v6262_v49 = vpop.f32.mrb[177].mxu1  ;;  %v6566_v40 = vld [vmem:[%s14397_s5 + $0x70] sm:$0xff] }
 0x582   :  { %v6317_v19 = vadd.f32 %v6262_v49, %v6139_v35 }
 0x584   :  { %v10550_v11 = vpop.f32.mrb[178].mxu1 }
 0x585   :  { %v6271_v63 = vpop.f32.mrb[179].mxu1  ;;  %v6585_v11 = vld [vmem:[%s14399_s7 + $0x80] sm:$0xff] }
 0x586   :  { %v6318_v60 = vadd.f32 %v6271_v63, %v6140_v14  ;;  %v6586_v63 = vld [vmem:[%s14399_s7 + $0x88] sm:$0xff] }
 0x588   :  { %v10553_v52 = vpop.f32.mrb[180].mxu1 }
 0x589   :  { %v6280_v32 = vpop.f32.mrb[181].mxu1 }
 0x58a   :  { %v6319_v51 = vadd.f32 %v6280_v32, %v6141_v9 }
 0x58c   :  { %v10556_v4 = vpop.f32.mrb[182].mxu1 }
 0x58d   :  { %v6289_v55 = vpop.f32.mrb[183].mxu1 }
 0x58e   :  { %v6320_v28 = vadd.f32 %v6289_v55, %v6142_v59  ;;  %v13910_v55 = vpack.c.bf16 %v6586_v63, %v6585_v11  ;;  %v6600_v11 = vld [vmem:[%s14399_s7 + $0xf8] sm:$0xff] }
 0x590   :  { %v10559_v47 = vpop.f32.mrb[184].mxu1 }
 0x591   :  { %v6298_v12 = vpop.f32.mrb[185].mxu1  ;;  %v6570_v47 = vld [vmem:[%s14399_s7 + $0x8] sm:$0xff] }
 0x592   :  { %v6321_v13 = vadd.f32 %v6298_v12, %v6143_v57  ;;  %v6567_v57 = vld [vmem:[%s14397_s5 + $0x78] sm:$0xff] }
 0x593   :  { %v13889_v46 = vpack.c.bf16 %v6567_v57, %v6563_v24 }
 0x594   :  { %v10562_v27 = vpop.f32.mrb[186].mxu1 }
 0x595   :  { %v6307_v41 = vpop.f32.mrb[187].mxu1 }
 0x596   :  { %v13861_v26 = vadd.f32 %v6307_v41, %v6144_v54 }
 0x598   :  { %v10597_v34 = vpop.f32.mrb[188].mxu1 }
 0x599   :  { %v6422_v5 = vpop.f32.mrb[189].mxu1 }
 0x59a   :  { %v6493_v29 = vadd.f32 %v6422_v5, %v6315_v44  ;;  %v13887_v44 = vpack.c.bf16 %v6558_v56, %v6554_v2  ;;  %v6577_v2 = vld [vmem:[%s14399_s7 + $0x40] sm:$0xff]  ;;  %v6578_v56 = vld [vmem:[%s14399_s7 + $0x48] sm:$0xff] }
 0x59b   :  { %v14003_v24 = vpack.c.bf16 %v6578_v56, %v6577_v2  ;;  %v6621_v2 = vld [vmem:[%s14399_s7 + $0x1a0] sm:$0xff]  ;;  %v6622_v56 = vld [vmem:[%s14399_s7 + $0x1a8] sm:$0xff] }
 0x59c   :  { %v10600_v16 = vpop.f32.mrb[190].mxu1  ;;  %v6508_v36 = vadd.f32 %v13866_v15, %v6493_v29 }
 0x59d   :  { %v6431_v53 = vpop.f32.mrb[191].mxu1 }
 0x59e   :  { %v6494_v0 = vadd.f32 %v6431_v53, %v6316_v39  ;;  %v6516_v3 = vmax.f32 %v6508_v36, 0.0  ;;  %v6562_v39 = vld [vmem:[%s14397_s5 + $0x50] sm:$0xff]  ;;  %v6572_v36 = vld [vmem:[%s14399_s7 + $0x18] sm:$0xff] }
 0x59f   :  { %v13906_v4 = vpack.c.bf16 %v6566_v40, %v6562_v39  ;;  %v6571_v53 = vld [vmem:[%s14399_s7 + $0x10] sm:$0xff]  ;;  %v6581_v39 = vld [vmem:[%s14399_s7 + $0x60] sm:$0xff]  ;;  %v6582_v40 = vld [vmem:[%s14399_s7 + $0x68] sm:$0xff] }
 0x5a0   :  { %v6509_v31 = vadd.f32 %v13866_v15, %v6494_v0  ;;  %v10603_v48 = vpop.f32.mrb[192].mxu1 }
 0x5a1   :  { %v6440_v30 = vpop.f32.mrb[193].mxu1 }
 0x5a2   :  { %v6517_v20 = vmax.f32 %v6509_v31, 0.0  ;;  %v6495_v23 = vadd.f32 %v6440_v30, %v6317_v19  ;;  %v6590_v31 = vld [vmem:[%s14399_s7 + $0xa8] sm:$0xff] }
 0x5a4   :  { %v6524_v7 = vmax.f32 %v6516_v3, %v6517_v20  ;;  %v10606_v62 = vpop.f32.mrb[194].mxu1  ;;  %v6510_v58 = vadd.f32 %v13866_v15, %v6495_v23  ;;  %v13948_v3 = vpack.c.bf16 %v6572_v36, %v6571_v53  ;;  %v6574_v23 = vld [vmem:[%s14399_s7 + $0x28] sm:$0xff] }
 0x5a5   :  { %v6449_v61 = vpop.f32.mrb[195].mxu1  ;;  %v6591_v62 = vld [vmem:[%s14399_s7 + $0xb0] sm:$0xff] }
 0x5a6   :  { %6529 = vst.msk [vmem:[#allocation5] sm:$0xff] %vm6528_vm1, %v6524_v7  ;;  %v6496_v35 = vadd.f32 %v6449_v61, %v6318_v60  ;;  %v6518_v17 = vmax.f32 %v6510_v58, 0.0  ;;  %v6592_v61 = vld [vmem:[%s14399_s7 + $0xb8] sm:$0xff] }
 0x5a8   :  { %v6511_v37 = vadd.f32 %v13866_v15, %v6496_v35  ;;  %v10609_v33 = vpop.f32.mrb[196].mxu1  ;;  %v13970_v35 = vpack.c.bf16 %v6592_v61, %v6591_v62 }
 0x5a9   :  { %v6458_v14 = vpop.f32.mrb[197].mxu1  ;;  %v6576_v33 = vld [vmem:[%s14399_s7 + $0x38] sm:$0xff] }
 0x5aa   :  { %v6519_v6 = vmax.f32 %v6511_v37, 0.0  ;;  %v6497_v9 = vadd.f32 %v6458_v14, %v6319_v51  ;;  %v6575_v37 = vld [vmem:[%s14399_s7 + $0x30] sm:$0xff]  ;;  %v6593_v14 = vld [vmem:[%s14399_s7 + $0xc0] sm:$0xff] }
 0x5ac   :  { %v6525_v59 = vmax.f32 %v6518_v17, %v6519_v6  ;;  %v10612_v18 = vpop.f32.mrb[198].mxu1  ;;  %v6512_v54 = vadd.f32 %v13866_v15, %v6497_v9  ;;  %v6594_v17 = vld [vmem:[%s14399_s7 + $0xc8] sm:$0xff]  ;;  %v13985_v6 = vpack.c.bf16 %v6576_v33, %v6575_v37  ;;  %v6603_v33 = vld [vmem:[%s14399_s7 + $0x110] sm:$0xff] }
 0x5ad   :  { %v6467_v1 = vpop.f32.mrb[199].mxu1  ;;  %v6533_v21 = vld [vmem:[#allocation5] ss:$2 sm:$0xf]  ;;  %v13988_v9 = vpack.c.bf16 %v6594_v17, %v6593_v14  ;;  %v6596_v18 = vld [vmem:[%s14399_s7 + $0xd8] sm:$0xff] }
 0x5ae   :  { %6530 = vst.msk [vmem:[#allocation5 + $0x8] sm:$0xff] %vm6528_vm1, %v6525_v59  ;;  %v6498_v42 = vadd.f32 %v6467_v1, %v6320_v28  ;;  %v6541_v10 = vld [vmem:[#allocation5 + $0x1] ss:$2 sm:$0xf]  ;;  %v6520_v52 = vmax.f32 %v6512_v54, 0.0  ;;  %v6595_v59 = vld [vmem:[%s14399_s7 + $0xd0] sm:$0xff] }
 0x5af   :  { %v6548_v50 = vmax.f32 %v6533_v21, %v6541_v10  ;;  %v6569_v28 = vld [vmem:[%s14399_s7] sm:$0xff]  ;;  %v14006_v57 = vpack.c.bf16 %v6596_v18, %v6595_v59  ;;  %v6579_v1 = vld [vmem:[%s14399_s7 + $0x50] sm:$0xff]  ;;  %v6580_v21 = vld [vmem:[%s14399_s7 + $0x58] sm:$0xff] }
 0x5b0   :  { %v6513_v49 = vadd.f32 %v13866_v15, %v6498_v42  ;;  %v10615_v19 = vpop.f32.mrb[200].mxu1  ;;  %v13928_v29 = vpack.c.bf16 %v6570_v47, %v6569_v28  ;;  %v6597_v54 = vld [vmem:[%s14399_s7 + $0xe0] sm:$0xff]  ;;  %v6598_v42 = vld [vmem:[%s14399_s7 + $0xe8] sm:$0xff]  ;;  %v14021_v10 = vpack.c.bf16 %v6580_v21, %v6579_v1  ;;  %v6604_v14 = vld [vmem:[%s14399_s7 + $0x118] sm:$0xff]  ;;  %v14117_v21 = vpack.c.bf16 %v6622_v56, %v6621_v2 }
 0x5b1   :  { %8428 = vmatmul.mubr.msk.f32.vlgmr.msra.gmra.mrb[204].mxu1 %vm6528_vm1, %v6548_v50  ;;  %v6476_v60 = vpop.f32.mrb[201].mxu1  ;;  %v6599_v19 = vld [vmem:[%s14399_s7 + $0xf0] sm:$0xff]  ;;  %v6618_v28 = vld [vmem:[%s14399_s7 + $0x188] sm:$0xff]  ;;  %v14114_v18 = vpack.c.bf16 %v6604_v14, %v6603_v33  ;;  %v6613_v56 = vld [vmem:[%s14399_s7 + $0x160] sm:$0xff] }
 0x5b2   :  { %v6521_v32 = vmax.f32 %v6513_v49, 0.0  ;;  %10918 = vmatpush1.bf16.msra.mxu1 %v13887_v44  ;;  %v6499_v51 = vadd.f32 %v6476_v60, %v6321_v13  ;;  %6793 = vmatprep.mubr.f32.mxu1 %v13546_v8  ;;  %v6587_v13 = vld [vmem:[%s14399_s7 + $0x90] sm:$0xff]  ;;  %v6588_v8 = vld [vmem:[%s14399_s7 + $0x98] sm:$0xff]  ;;  %v14033_v49 = vpack.c.bf16 %v6582_v40, %v6581_v39  ;;  %v14043_v63 = vpack.c.bf16 %v6600_v11, %v6599_v19 }
 0x5b3   :  { %10920 = vmatprep.subr.bf16.mxu1 %v13889_v46  ;;  %v13931_v16 = vpack.c.bf16 %v6588_v8, %v6587_v13  ;;  %v6583_v60 = vld [vmem:[%s14399_s7 + $0x70] sm:$0xff]  ;;  %v14070_v8 = vld [vmem:[%s14400_s6] sm:$0xf]  ;;  %v6624_v19 = vld [vmem:[%s14399_s7 + $0x1b8] sm:$0xff] }
 0x5b4   :  { %v6526_v12 = vmax.f32 %v6520_v52, %v6521_v32  ;;  %v10618_v27 = vpop.f32.mrb[202].mxu1  ;;  %v6514_v34 = vadd.f32 %v13866_v15, %v6499_v51  ;;  %v6584_v52 = vld [vmem:[%s14399_s7 + $0x78] sm:$0xff]  ;;  %v6617_v51 = vld [vmem:[%s14399_s7 + $0x180] sm:$0xff]  ;;  %v6623_v40 = vld [vmem:[%s14399_s7 + $0x1b0] sm:$0xff] }
 0x5b5   :  { %v6485_v41 = vpop.f32.mrb[203].mxu1  ;;  %v14051_v32 = vpack.c.bf16 %v6584_v52, %v6583_v60  ;;  %v14061_v47 = vpack.c.bf16 %v6618_v28, %v6617_v51  ;;  %v14136_v52 = vpack.c.bf16 %v6624_v19, %v6623_v40  ;;  %v6607_v51 = vld [vmem:[%s14399_s7 + $0x130] sm:$0xff]  ;;  %v6608_v28 = vld [vmem:[%s14399_s7 + $0x138] sm:$0xff] }
 0x5b6   :  { %6531 = vst.msk [vmem:[#allocation5 + $0x10] sm:$0xff] %vm6528_vm1, %v6526_v12  ;;  %10922 = vmatpush1.bf16.msra.mxu1 %v13906_v4  ;;  %v6500_v5 = vadd.f32 %v6485_v41, %v13861_v26  ;;  %v6589_v26 = vld [vmem:[%s14399_s7 + $0xa0] sm:$0xff]  ;;  %v6522_v48 = vmax.f32 %v6514_v34, 0.0  ;;  %v6635_v12 = vlaneseq  ;;  %v6615_v19 = vld [vmem:[%s14399_s7 + $0x170] sm:$0xff] }
 0x5b7   :  { %10924 = vmatprep.subr.bf16.mxu1 %v13910_v55  ;;  %v13951_v20 = vpack.c.bf16 %v6590_v31, %v6589_v26  ;;  %v6601_v26 = vld [vmem:[%s14399_s7 + $0x100] sm:$0xff]  ;;  %v6602_v31 = vld [vmem:[%s14399_s7 + $0x108] sm:$0xff] }
 0x5b8   :  { %v6515_v0 = vadd.f32 %v13866_v15, %v6500_v5  ;;  %v6573_v15 = vld [vmem:[%s14399_s7 + $0x20] sm:$0xff]  ;;  %v14064_v27 = vshrl.u32 %v6635_v12, 7  ;;  %v14094_v62 = vpack.c.bf16 %v6602_v31, %v6601_v26  ;;  %v6627_v26 = vld [vmem:[%s14399_s7 + $0x1d0] sm:$0xff]  ;;  %v6628_v31 = vld [vmem:[%s14399_s7 + $0x1d8] sm:$0xff] }
 0x5b9   :  { %8429 = vmatmul.mubr.msk.f32.vlgmr.msra.gmra.mrb[206].mxu1 %vm6528_vm1, %v6548_v50  ;;  %v13967_v58 = vpack.c.bf16 %v6574_v23, %v6573_v15  ;;  %v14024_v50 = vpack.c.bf16 %v6598_v42, %v6597_v54  ;;  %v6619_v15 = vld [vmem:[%s14399_s7 + $0x190] sm:$0xff]  ;;  %v6620_v23 = vld [vmem:[%s14399_s7 + $0x198] sm:$0xff]  ;;  %v6605_v54 = vld [vmem:[%s14399_s7 + $0x120] sm:$0xff] }
 0x5ba   :  { %v6523_v30 = vmax.f32 %v6515_v0, 0.0  ;;  %10926 = vmatpush3.bf16.msra.mxu1 %v13928_v29  ;;  %v6637_v13 = vsub.s32 0, %v14064_v27  ;;  %v6641_v41 = vsub.s32 1, %v14064_v27  ;;  %v14096_v37 = vpack.c.bf16 %v6620_v23, %v6619_v15  ;;  %v6606_v42 = vld [vmem:[%s14399_s7 + $0x128] sm:$0xff]  ;;  %v6625_v12 = vld [vmem:[%s14399_s7 + $0x1c0] sm:$0xff]  ;;  %v6611_v15 = vld [vmem:[%s14399_s7 + $0x150] sm:$0xff] }
 0x5bb   :  { %10928 = vmatprep.subr.bf16.mxu1 %v13931_v16  ;;  %v14133_v60 = vpack.c.bf16 %v6606_v42, %v6605_v54  ;;  %v6612_v23 = vld [vmem:[%s14399_s7 + $0x158] sm:$0xff]  ;;  %v6645_v14 = vsub.s32 2, %v14064_v27  ;;  %v6631_v54 = vld [vmem:[%s14399_s7 + $0x1f0] sm:$0xff] }
 0x5bc   :  { %v6527_v7 = vmax.f32 %v6522_v48, %v6523_v30  ;;  %v14074_v34 = vrot.slane %v14070_v8, %v6637_v13  ;;  %v14077_v5 = vrot.slane %v14070_v8, %v6641_v41  ;;  %v6649_v30 = vsub.s32 3, %v14064_v27  ;;  %v6626_v13 = vld [vmem:[%s14399_s7 + $0x1c8] sm:$0xff]  ;;  %v6632_v27 = vld [vmem:[%s14399_s7 + $0x1f8] sm:$0xff] }
 0x5bd   :  { %v14151_v41 = vpack.c.bf16 %v6608_v28, %v6607_v51  ;;  %v14187_v33 = vpack.c.bf16 %v6612_v23, %v6611_v15  ;;  %v14212_v40 = vpack.c.bf16 %v6632_v27, %v6631_v54  ;;  %v14260_v15 = vld [vmem:[%s14401_s8] ss:$0 sm:$0xff] }
 0x5be   :  { %6532 = vst.msk [vmem:[#allocation5 + $0x18] sm:$0xff] %vm6528_vm1, %v6527_v7  ;;  %10930 = vmatpush3.bf16.msra.mxu1 %v13948_v3  ;;  %v14105_v17 = vrot.slane %v14070_v8, %v6649_v30  ;;  %v14172_v30 = vpack.c.bf16 %v6628_v31, %v6627_v26 }
 0x5bf   :  { %10932 = vmatprep.subr.bf16.mxu1 %v13951_v20 }
 0x5c2   :  { %10934 = vmatpush3.bf16.msra.mxu1 %v13967_v58 }
 0x5c3   :  { %10936 = vmatprep.subr.bf16.mxu1 %v13970_v35 }
 0x5c6   :  { %10938 = vmatpush3.bf16.msra.mxu1 %v13985_v6 }
 0x5c7   :  { %10940 = vmatprep.subr.bf16.mxu1 %v13988_v9 }
 0x5ca   :  { %10942 = vmatpush3.bf16.msra.mxu1 %v14003_v24 }
 0x5cb   :  { %10944 = vmatprep.subr.bf16.mxu1 %v14006_v57 }
 0x5ce   :  { %10946 = vmatpush3.bf16.msra.mxu1 %v14021_v10 }
 0x5cf   :  { %10948 = vmatprep.subr.bf16.mxu1 %v14024_v50 }
 0x5d2   :  { %10950 = vmatpush3.bf16.msra.mxu1 %v14033_v49 }
 0x5d3   :  { %10952 = vmatprep.subr.bf16.mxu1 %v14043_v63 }
 0x5d6   :  { %10954 = vmatpush3.bf16.msra.mxu1 %v14051_v32 }
 0x5d7   :  { %10956 = vmatprep.subr.bf16.mxu1 %v14061_v47 }
 0x684   :  { %v6724_v53 = vpop.f32.mrb[204].mxu1 }
 0x685   :  { %v6725_v36 = vadd.f32 %v6724_v53, %v14074_v34  ;;  %v6726_v0 = vpop.f32.mrb[205].mxu1  ;;  %v14154_v53 = vpack.c.bf16 %v6626_v13, %v6625_v12  ;;  %v14228_v12 = vld [vmem:[#allocation3] sm:$0xff]  ;;  %v6535_v13 = vld [vmem:[#allocation5 + $0x8] ss:$2 sm:$0xf] }
 0x686   :  { %v6727_v48 = vadd.f32 %v6726_v0, %v14077_v5  ;;  %v6610_v0 = vld [vmem:[%s14399_s7 + $0x148] sm:$0xff] }
 0x687   :  { %v6800_v61 = vmax.f32 %v6725_v36, 0.0  ;;  %v6609_v36 = vld [vmem:[%s14399_s7 + $0x140] sm:$0xff] }
 0x688   :  { %v6801_v7 = vmax.f32 %v6727_v48, 0.0  ;;  %v14169_v48 = vpack.c.bf16 %v6610_v0, %v6609_v36  ;;  %v6543_v36 = vld [vmem:[#allocation5 + $0x9] ss:$2 sm:$0xf] }
 0x68a   :  { %6874 = vmatprep.mubr.f32.mxu1 %v6801_v7  ;;  %v6629_v7 = vld [vmem:[%s14399_s7 + $0x1e0] sm:$0xff] }
 0x68b   :  { %6875 = vmatmul.mubr.f32.vlgmr.msra.gmra.mrb[208].mxu1 %v6800_v61  ;;  %v6630_v61 = vld [vmem:[%s14399_s7 + $0x1e8] sm:$0xff] }
 0x68c   :  { %v6795_v59 = vpop.f32.mrb[206].mxu1  ;;  %10958 = vmatpush3.bf16.msra.mxu1 %v14094_v62  ;;  %v14191_v2 = vpack.c.bf16 %v6630_v61, %v6629_v7 }
 0x68d   :  { %v6797_v1 = vpop.f32.mrb[207].mxu1  ;;  %10960 = vmatprep.subr.bf16.mxu1 %v14096_v37 }
 0x68e   :  { %v6798_v39 = vadd.f32 %v6797_v1, %v14105_v17  ;;  %v6614_v1 = vld [vmem:[%s14399_s7 + $0x168] sm:$0xff] }
 0x68f   :  { %v14206_v42 = vpack.c.bf16 %v6614_v1, %v6613_v56 }
 0x690   :  { %v6803_v11 = vmax.f32 %v6798_v39, 0.0  ;;  %10962 = vmatpush3.bf16.msra.mxu1 %v14114_v18  ;;  %v14209_v39 = vrot.slane %v14070_v8, %v6645_v14 }
 0x691   :  { %10964 = vmatprep.subr.bf16.mxu1 %v14117_v21 }
 0x692   :  { %6944 = vmatprep.mubr.f32.mxu1 %v6803_v11  ;;  %v6616_v11 = vld [vmem:[%s14399_s7 + $0x178] sm:$0xff]  ;;  %v6796_v28 = vadd.f32 %v6795_v59, %v14209_v39  ;;  %v6549_v59 = vmax.f32 %v6535_v13, %v6543_v36 }
 0x693   :  { %v14221_v51 = vpack.c.bf16 %v6616_v11, %v6615_v19 }
 0x694   :  { %10966 = vmatpush3.bf16.msra.mxu1 %v14133_v60  ;;  %v6802_v8 = vmax.f32 %v6796_v28, 0.0 }
 0x695   :  { %10968 = vmatprep.subr.bf16.mxu1 %v14136_v52 }
 0x698   :  { %10970 = vmatpush3.bf16.msra.mxu1 %v14151_v41 }
 0x699   :  { %10972 = vmatprep.subr.bf16.mxu1 %v14154_v53 }
 0x69c   :  { %10974 = vmatpush3.bf16.msra.mxu1 %v14169_v48 }
 0x69d   :  { %10976 = vmatprep.subr.bf16.mxu1 %v14172_v30 }
 0x6a0   :  { %10978 = vmatpush3.bf16.msra.mxu1 %v14187_v33 }
 0x6a1   :  { %10980 = vmatprep.subr.bf16.mxu1 %v14191_v2 }
 0x6a4   :  { %10982 = vmatpush3.bf16.msra.mxu1 %v14206_v42 }
 0x6a5   :  { %10984 = vmatprep.subr.bf16.mxu1 %v14212_v40 }
 0x6a8   :  { %10986 = vmatpush3.bf16.msra.mxu1 %v14221_v51 }
 0x6a9   :  { %10988 = vmatprep.subr.bf16.mxu1 %v13822_v25 }
 0x6ab   :  { %6945 = vmatmul.mubr.f32.vlgmr.msra.gmra.mrb[210].mxu1 %v6802_v8 }
 0x6ac   :  { %10990 = vmatpush1.bf16.msra.mxu1 %v13830_v22  ;;  %7018 = vmatprep.mubr.f32.mxu1 %v14228_v12 }
 0x6ad   :  { %10992 = vmatprep.subr.bf16.mxu1 %v13843_v38 }
 0x6b0   :  { %10994 = vmatpush1.bf16.msra.mxu1 %v13848_v45 }
 0x6b1   :  { %10996 = vmatprep.subr.bf16.mxu1 %v13858_v43 }
 0x6b3   :  { %8431 = vmatmul.mubr.msk.f32.vlgmr.msra.gmra.mrb[212].mxu1 %vm6528_vm1, %v6549_v59 }
 0x6b4   :  { %10998 = vmatpush1.bf16.msra.mxu1 %v13887_v44  ;;  %7089 = vmatprep.mubr.f32.mxu1 %v14228_v12 }
 0x6b5   :  { %11000 = vmatprep.subr.bf16.mxu1 %v13889_v46 }
 0x6b8   :  { %11002 = vmatpush1.bf16.msra.mxu1 %v13906_v4 }
 0x6b9   :  { %11004 = vmatprep.subr.bf16.mxu1 %v13910_v55 }
 0x6bb   :  { %8432 = vmatmul.mubr.msk.f32.vlgmr.msra.gmra.mrb[214].mxu1 %vm6528_vm1, %v6549_v59 }
 0x6bc   :  { %11006 = vmatpush3.bf16.msra.mxu1 %v13928_v29 }
 0x6bd   :  { %11008 = vmatprep.subr.bf16.mxu1 %v13931_v16 }
 0x6c0   :  { %11010 = vmatpush3.bf16.msra.mxu1 %v13948_v3 }
 0x6c1   :  { %11012 = vmatprep.subr.bf16.mxu1 %v13951_v20 }
 0x6c4   :  { %11014 = vmatpush3.bf16.msra.mxu1 %v13967_v58 }
 0x6c5   :  { %11016 = vmatprep.subr.bf16.mxu1 %v13970_v35 }
 0x6c8   :  { %11018 = vmatpush3.bf16.msra.mxu1 %v13985_v6 }
 0x6c9   :  { %11020 = vmatprep.subr.bf16.mxu1 %v13988_v9 }
 0x6cc   :  { %11022 = vmatpush3.bf16.msra.mxu1 %v14003_v24 }
 0x6cd   :  { %11024 = vmatprep.subr.bf16.mxu1 %v14006_v57 }
 0x6d0   :  { %11026 = vmatpush3.bf16.msra.mxu1 %v14021_v10 }
 0x6d1   :  { %11028 = vmatprep.subr.bf16.mxu1 %v14024_v50 }
 0x6d4   :  { %11030 = vmatpush3.bf16.msra.mxu1 %v14033_v49 }
 0x6d5   :  { %11032 = vmatprep.subr.bf16.mxu1 %v14043_v63 }
 0x6d8   :  { %11034 = vmatpush3.bf16.msra.mxu1 %v14051_v32 }
 0x6d9   :  { %11036 = vmatprep.subr.bf16.mxu1 %v14061_v47 }
 0x75e   :  { %v9201_v0 = vpop.f32.mrb[208].mxu1 }
 0x75f   :  { %v9202_v26 = vpop.f32.mrb[209].mxu1 }
 0x760   :  { %v9203_v31 = vadd.f32 %v9202_v26, %v9201_v0 }
 0x762   :  { %v6877_v61 = vadd.f32 %v9203_v31, %v14260_v15  ;;  %v6537_v31 = vld [vmem:[#allocation5 + $0x10] ss:$2 sm:$0xf] }
 0x77e   :  { %v9236_v23 = vpop.f32.mrb[210].mxu1 }
 0x77f   :  { %v9237_v7 = vpop.f32.mrb[211].mxu1 }
 0x780   :  { %v9238_v14 = vadd.f32 %v9237_v7, %v9236_v23  ;;  %v6545_v23 = vld [vmem:[#allocation5 + $0x11] ss:$2 sm:$0xf] }
 0x781   :  { %v6550_v7 = vmax.f32 %v6537_v31, %v6545_v23 }
 0x782   :  { %v6947_v56 = vadd.f32 %v9238_v14, %v6877_v61 }
 0x784   :  { %6950 = vst [vmem:[%s14402_s9] sm:$0xf] %v6947_v56 }
 0x786   :  { %v7020_v1 = vpop.f32.mrb[212].mxu1 }
 0x787   :  { %v7021_v54 = vadd.f32 %v7020_v1, %v14074_v34  ;;  %v7022_v27 = vpop.f32.mrb[213].mxu1 }
 0x788   :  { %v7023_v19 = vadd.f32 %v7022_v27, %v14077_v5 }
 0x789   :  { %v7096_v28 = vmax.f32 %v7021_v54, 0.0 }
 0x78a   :  { %v7097_v11 = vmax.f32 %v7023_v19, 0.0 }
 0x78c   :  { %7164 = vmatprep.mubr.f32.mxu1 %v7097_v11 }
 0x78d   :  { %7165 = vmatmul.mubr.f32.vlgmr.msra.gmra.mrb[216].mxu1 %v7096_v28 }
 0x78e   :  { %11038 = vmatpush3.bf16.msra.mxu1 %v14094_v62  ;;  %v7091_v8 = vpop.f32.mrb[214].mxu1 }
 0x78f   :  { %v7093_v13 = vpop.f32.mrb[215].mxu1  ;;  %11040 = vmatprep.subr.bf16.mxu1 %v14096_v37  ;;  %v7092_v0 = vadd.f32 %v7091_v8, %v14209_v39 }
 0x790   :  { %v7094_v36 = vadd.f32 %v7093_v13, %v14105_v17 }
 0x791   :  { %v7098_v26 = vmax.f32 %v7092_v0, 0.0 }
 0x792   :  { %v7099_v59 = vmax.f32 %v7094_v36, 0.0  ;;  %11042 = vmatpush3.bf16.msra.mxu1 %v14114_v18 }
 0x793   :  { %11044 = vmatprep.subr.bf16.mxu1 %v14117_v21 }
 0x794   :  { %7234 = vmatprep.mubr.f32.mxu1 %v7099_v59 }
 0x796   :  { %11046 = vmatpush3.bf16.msra.mxu1 %v14133_v60 }
 0x797   :  { %11048 = vmatprep.subr.bf16.mxu1 %v14136_v52 }
 0x79a   :  { %11050 = vmatpush3.bf16.msra.mxu1 %v14151_v41 }
 0x79b   :  { %11052 = vmatprep.subr.bf16.mxu1 %v14154_v53 }
 0x79e   :  { %11054 = vmatpush3.bf16.msra.mxu1 %v14169_v48 }
 0x79f   :  { %11056 = vmatprep.subr.bf16.mxu1 %v14172_v30 }
 0x7a2   :  { %11058 = vmatpush3.bf16.msra.mxu1 %v14187_v33 }
 0x7a3   :  { %11060 = vmatprep.subr.bf16.mxu1 %v14191_v2 }
 0x7a6   :  { %11062 = vmatpush3.bf16.msra.mxu1 %v14206_v42 }
 0x7a7   :  { %11064 = vmatprep.subr.bf16.mxu1 %v14212_v40 }
 0x7aa   :  { %11066 = vmatpush3.bf16.msra.mxu1 %v14221_v51 }
 0x7ab   :  { %11068 = vmatprep.subr.bf16.mxu1 %v13822_v25 }
 0x7ad   :  { %7235 = vmatmul.mubr.f32.vlgmr.msra.gmra.mrb[218].mxu1 %v7098_v26 }
 0x7ae   :  { %11070 = vmatpush1.bf16.msra.mxu1 %v13830_v22  ;;  %7309 = vmatprep.mubr.f32.mxu1 %v14228_v12 }
 0x7af   :  { %11072 = vmatprep.subr.bf16.mxu1 %v13843_v38 }
 0x7b2   :  { %11074 = vmatpush1.bf16.msra.mxu1 %v13848_v45 }
 0x7b3   :  { %11076 = vmatprep.subr.bf16.mxu1 %v13858_v43 }
 0x7b5   :  { %8434 = vmatmul.mubr.msk.f32.vlgmr.msra.gmra.mrb[220].mxu1 %vm6528_vm1, %v6550_v7 }
 0x7b6   :  { %11078 = vmatpush1.bf16.msra.mxu1 %v13887_v44  ;;  %7380 = vmatprep.mubr.f32.mxu1 %v14228_v12 }
 0x7b7   :  { %11080 = vmatprep.subr.bf16.mxu1 %v13889_v46 }
 0x7ba   :  { %11082 = vmatpush1.bf16.msra.mxu1 %v13906_v4 }
 0x7bb   :  { %11084 = vmatprep.subr.bf16.mxu1 %v13910_v55 }
 0x7bd   :  { %8435 = vmatmul.mubr.msk.f32.vlgmr.msra.gmra.mrb[222].mxu1 %vm6528_vm1, %v6550_v7 }
 0x7be   :  { %11086 = vmatpush3.bf16.msra.mxu1 %v13928_v29 }
 0x7bf   :  { %11088 = vmatprep.subr.bf16.mxu1 %v13931_v16 }
 0x7c2   :  { %11090 = vmatpush3.bf16.msra.mxu1 %v13948_v3 }
 0x7c3   :  { %11092 = vmatprep.subr.bf16.mxu1 %v13951_v20 }
 0x7c6   :  { %11094 = vmatpush3.bf16.msra.mxu1 %v13967_v58 }
 0x7c7   :  { %11096 = vmatprep.subr.bf16.mxu1 %v13970_v35 }
 0x7ca   :  { %11098 = vmatpush3.bf16.msra.mxu1 %v13985_v6 }
 0x7cb   :  { %11100 = vmatprep.subr.bf16.mxu1 %v13988_v9 }
 0x7ce   :  { %11102 = vmatpush3.bf16.msra.mxu1 %v14003_v24 }
 0x7cf   :  { %11104 = vmatprep.subr.bf16.mxu1 %v14006_v57 }
 0x7d2   :  { %11106 = vmatpush3.bf16.msra.mxu1 %v14021_v10 }
 0x7d3   :  { %11108 = vmatprep.subr.bf16.mxu1 %v14024_v50 }
 0x7d6   :  { %11110 = vmatpush3.bf16.msra.mxu1 %v14033_v49 }
 0x7d7   :  { %11112 = vmatprep.subr.bf16.mxu1 %v14043_v63 }
 0x7da   :  { %11114 = vmatpush3.bf16.msra.mxu1 %v14051_v32 }
 0x7db   :  { %11116 = vmatprep.subr.bf16.mxu1 %v14061_v47 }
 0x860   :  { %v9271_v61 = vpop.f32.mrb[216].mxu1 }
 0x861   :  { %v9272_v14 = vpop.f32.mrb[217].mxu1 }
 0x862   :  { %v9273_v56 = vadd.f32 %v9272_v14, %v9271_v61 }
 0x864   :  { %v7167_v27 = vadd.f32 %v9273_v56, %v14260_v15  ;;  %v6539_v56 = vld [vmem:[#allocation5 + $0x18] ss:$2 sm:$0xf] }
 0x880   :  { %v9306_v1 = vpop.f32.mrb[218].mxu1 }
 0x881   :  { %v9307_v54 = vpop.f32.mrb[219].mxu1 }
 0x882   :  { %v9308_v19 = vadd.f32 %v9307_v54, %v9306_v1  ;;  %v6547_v1 = vld [vmem:[#allocation5 + $0x19] ss:$2 sm:$0xf] }
 0x883   :  { %v6551_v54 = vmax.f32 %v6539_v56, %v6547_v1 }
 0x884   :  { %v7237_v11 = vadd.f32 %v9308_v19, %v7167_v27 }
 0x886   :  { %8433 = vst [vmem:[%s14402_s9 + $0x4] sm:$0xf] %v7237_v11 }
 0x888   :  { %v7311_v28 = vpop.f32.mrb[220].mxu1 }
 0x889   :  { %v7312_v8 = vadd.f32 %v7311_v28, %v14074_v34  ;;  %v7313_v13 = vpop.f32.mrb[221].mxu1 }
 0x88a   :  { %v7314_v36 = vadd.f32 %v7313_v13, %v14077_v5 }
 0x88b   :  { %v7387_v0 = vmax.f32 %v7312_v8, 0.0 }
 0x88c   :  { %v7388_v59 = vmax.f32 %v7314_v36, 0.0 }
 0x88e   :  { %7455 = vmatprep.mubr.f32.mxu1 %v7388_v59 }
 0x88f   :  { %7456 = vmatmul.mubr.f32.vlgmr.msra.gmra.mrb[224].mxu1 %v7387_v0 }
 0x890   :  { %11118 = vmatpush3.bf16.msra.mxu1 %v14094_v62  ;;  %v7382_v26 = vpop.f32.mrb[222].mxu1 }
 0x891   :  { %v7384_v31 = vpop.f32.mrb[223].mxu1  ;;  %11120 = vmatprep.subr.bf16.mxu1 %v14096_v37  ;;  %v7383_v61 = vadd.f32 %v7382_v26, %v14209_v39 }
 0x892   :  { %v7385_v23 = vadd.f32 %v7384_v31, %v14105_v17 }
 0x893   :  { %v7389_v14 = vmax.f32 %v7383_v61, 0.0 }
 0x894   :  { %v7390_v7 = vmax.f32 %v7385_v23, 0.0  ;;  %11122 = vmatpush3.bf16.msra.mxu1 %v14114_v18 }
 0x895   :  { %11124 = vmatprep.subr.bf16.mxu1 %v14117_v21 }
 0x896   :  { %7525 = vmatprep.mubr.f32.mxu1 %v7390_v7 }
 0x898   :  { %11126 = vmatpush3.bf16.msra.mxu1 %v14133_v60 }
 0x899   :  { %11128 = vmatprep.subr.bf16.mxu1 %v14136_v52 }
 0x89c   :  { %11130 = vmatpush3.bf16.msra.mxu1 %v14151_v41 }
 0x89d   :  { %11132 = vmatprep.subr.bf16.mxu1 %v14154_v53 }
 0x8a0   :  { %11134 = vmatpush3.bf16.msra.mxu1 %v14169_v48 }
 0x8a1   :  { %11136 = vmatprep.subr.bf16.mxu1 %v14172_v30 }
 0x8a4   :  { %11138 = vmatpush3.bf16.msra.mxu1 %v14187_v33 }
 0x8a5   :  { %11140 = vmatprep.subr.bf16.mxu1 %v14191_v2 }
 0x8a8   :  { %11142 = vmatpush3.bf16.msra.mxu1 %v14206_v42 }
 0x8a9   :  { %11144 = vmatprep.subr.bf16.mxu1 %v14212_v40 }
 0x8ac   :  { %11146 = vmatpush3.bf16.msra.mxu1 %v14221_v51 }
 0x8ad   :  { %11148 = vmatprep.subr.bf16.mxu1 %v13822_v25 }
 0x8af   :  { %7526 = vmatmul.mubr.f32.vlgmr.msra.gmra.mrb[226].mxu1 %v7389_v14 }
 0x8b0   :  { %11150 = vmatpush1.bf16.msra.mxu1 %v13830_v22  ;;  %7600 = vmatprep.mubr.f32.mxu1 %v14228_v12 }
 0x8b1   :  { %11152 = vmatprep.subr.bf16.mxu1 %v13843_v38 }
 0x8b4   :  { %11154 = vmatpush1.bf16.msra.mxu1 %v13848_v45 }
 0x8b5   :  { %11156 = vmatprep.subr.bf16.mxu1 %v13858_v43 }
 0x8b7   :  { %8437 = vmatmul.mubr.msk.f32.vlgmr.msra.gmra.mrb[228].mxu1 %vm6528_vm1, %v6551_v54 }
 0x8b8   :  { %11158 = vmatpush1.bf16.msra.mxu1 %v13887_v44  ;;  %7671 = vmatprep.mubr.f32.mxu1 %v14228_v12 }
 0x8b9   :  { %11160 = vmatprep.subr.bf16.mxu1 %v13889_v46 }
 0x8bc   :  { %11162 = vmatpush1.bf16.msra.mxu1 %v13906_v4 }
 0x8bd   :  { %11164 = vmatprep.subr.bf16.mxu1 %v13910_v55 }
 0x8bf   :  { %8438 = vmatmul.mubr.msk.f32.vlgmr.msra.gmra.mrb[230].mxu1 %vm6528_vm1, %v6551_v54 }
 0x8c0   :  { %11166 = vmatpush3.bf16.msra.mxu1 %v13928_v29 }
 0x8c1   :  { %11168 = vmatprep.subr.bf16.mxu1 %v13931_v16 }
 0x8c4   :  { %11170 = vmatpush3.bf16.msra.mxu1 %v13948_v3 }
 0x8c5   :  { %11172 = vmatprep.subr.bf16.mxu1 %v13951_v20 }
 0x8c8   :  { %11174 = vmatpush3.bf16.msra.mxu1 %v13967_v58 }
 0x8c9   :  { %11176 = vmatprep.subr.bf16.mxu1 %v13970_v35 }
 0x8cc   :  { %11178 = vmatpush3.bf16.msra.mxu1 %v13985_v6 }
 0x8cd   :  { %11180 = vmatprep.subr.bf16.mxu1 %v13988_v9 }
 0x8d0   :  { %11182 = vmatpush3.bf16.msra.mxu1 %v14003_v24 }
 0x8d1   :  { %11184 = vmatprep.subr.bf16.mxu1 %v14006_v57 }
 0x8d4   :  { %11186 = vmatpush3.bf16.msra.mxu1 %v14021_v10 }
 0x8d5   :  { %11188 = vmatprep.subr.bf16.mxu1 %v14024_v50 }
 0x8d8   :  { %11190 = vmatpush3.bf16.msra.mxu1 %v14033_v49 }
 0x8d9   :  { %11192 = vmatprep.subr.bf16.mxu1 %v14043_v63 }
 0x8dc   :  { %11194 = vmatpush3.bf16.msra.mxu1 %v14051_v32 }
 0x8dd   :  { %11196 = vmatprep.subr.bf16.mxu1 %v14061_v47 }
 0x962   :  { %v9341_v25 = vpop.f32.mrb[224].mxu1 }
 0x963   :  { %v9342_v22 = vpop.f32.mrb[225].mxu1 }
 0x964   :  { %v9343_v38 = vadd.f32 %v9342_v22, %v9341_v25 }
 0x966   :  { %v7458_v44 = vadd.f32 %v9343_v38, %v14260_v15 }
 0x982   :  { %v9376_v45 = vpop.f32.mrb[226].mxu1 }
 0x983   :  { %v9377_v43 = vpop.f32.mrb[227].mxu1 }
 0x984   :  { %v9378_v46 = vadd.f32 %v9377_v43, %v9376_v45 }
 0x986   :  { %v7528_v4 = vadd.f32 %v9378_v46, %v7458_v44 }
 0x988   :  { %8436 = vst [vmem:[%s14402_s9 + $0x8] sm:$0xf] %v7528_v4 }
 0x98a   :  { %v7602_v55 = vpop.f32.mrb[228].mxu1 }
 0x98b   :  { %v7603_v29 = vadd.f32 %v7602_v55, %v14074_v34  ;;  %v7604_v16 = vpop.f32.mrb[229].mxu1 }
 0x98c   :  { %v7605_v3 = vadd.f32 %v7604_v16, %v14077_v5 }
 0x98d   :  { %v7678_v58 = vmax.f32 %v7603_v29, 0.0 }
 0x98e   :  { %v7679_v20 = vmax.f32 %v7605_v3, 0.0 }
 0x990   :  { %7746 = vmatprep.mubr.f32.mxu1 %v7679_v20 }
 0x991   :  { %7747 = vmatmul.mubr.f32.vlgmr.msra.gmra.mrb[232].mxu1 %v7678_v58 }
 0x992   :  { %11198 = vmatpush3.bf16.msra.mxu1 %v14094_v62  ;;  %v7673_v35 = vpop.f32.mrb[230].mxu1 }
 0x993   :  { %v7675_v6 = vpop.f32.mrb[231].mxu1  ;;  %11200 = vmatprep.subr.bf16.mxu1 %v14096_v37  ;;  %v7674_v57 = vadd.f32 %v7673_v35, %v14209_v39 }
 0x994   :  { %v7676_v9 = vadd.f32 %v7675_v6, %v14105_v17 }
 0x995   :  { %v7680_v10 = vmax.f32 %v7674_v57, 0.0 }
 0x996   :  { %v7681_v24 = vmax.f32 %v7676_v9, 0.0  ;;  %11202 = vmatpush3.bf16.msra.mxu1 %v14114_v18 }
 0x997   :  { %11204 = vmatprep.subr.bf16.mxu1 %v14117_v21 }
 0x998   :  { %7816 = vmatprep.mubr.f32.mxu1 %v7681_v24 }
 0x99a   :  { %11206 = vmatpush3.bf16.msra.mxu1 %v14133_v60 }
 0x99b   :  { %11208 = vmatprep.subr.bf16.mxu1 %v14136_v52 }
 0x99e   :  { %11210 = vmatpush3.bf16.msra.mxu1 %v14151_v41 }
 0x99f   :  { %11212 = vmatprep.subr.bf16.mxu1 %v14154_v53 }
 0x9a2   :  { %11214 = vmatpush3.bf16.msra.mxu1 %v14169_v48 }
 0x9a3   :  { %11216 = vmatprep.subr.bf16.mxu1 %v14172_v30 }
 0x9a6   :  { %11218 = vmatpush3.bf16.msra.mxu1 %v14187_v33 }
 0x9a7   :  { %11220 = vmatprep.subr.bf16.mxu1 %v14191_v2 }
 0x9aa   :  { %11222 = vmatpush3.bf16.msra.mxu1 %v14206_v42 }
 0x9ab   :  { %11224 = vmatprep.subr.bf16.mxu1 %v14212_v40 }
 0x9ae   :  { %11226 = vmatpush3.bf16.msra.mxu1 %v14221_v51 }
 0x9b1   :  { %7817 = vmatmul.mubr.f32.vlgmr.msra.gmra.mrb[234].mxu1 %v7680_v10 }
 0xa64   :  { %v9411_v50 = vpop.f32.mrb[232].mxu1 }
 0xa65   :  { %v9412_v49 = vpop.f32.mrb[233].mxu1 }
 0xa66   :  { %v9413_v63 = vadd.f32 %v9412_v49, %v9411_v50 }
 0xa68   :  { %v7749_v34 = vadd.f32 %v9413_v63, %v14260_v15 }
 0xa84   :  { %v9446_v32 = vpop.f32.mrb[234].mxu1 }
 0xa85   :  { %v9447_v47 = vpop.f32.mrb[235].mxu1 }
 0xa86   :  { %v9448_v5 = vadd.f32 %v9447_v47, %v9446_v32 }
 0xa88   :  { %v7819_v62 = vadd.f32 %v9448_v5, %v7749_v34 }
 0xa8a   :  { %8439 = vst [vmem:[%s14402_s9 + $0xc] sm:$0xf] %v7819_v62 }

</bundles_post_ra>
